<compile_context>
chip_gen: v6e
topology: v6e:2x2x1
jax: 0.10.0
libtpu: 0.0.40
codegen_flags: <defaults>
</compile_context>

<pallas_src>
import functools

import jax
import jax.numpy as jnp
from jax import lax
from jax.experimental import pallas as pl
from jax.experimental.pallas import tpu as pltpu

EPS = 1e-5


def _round_up(x, m):
    return (x + m - 1) // m * m


# ----------------------------------------------------------------------------
# Fused kernel: conv1+bn1+relu -> conv2+bn2+residual+relu, one batch element.
# ----------------------------------------------------------------------------
def _basic_block_kernel(x_ref, mask_ref, w1_ref, b1_ref, w2_ref, b2_ref,
                        o_ref, patch_ref, xext_ref, yext_ref,
                        *, offs, L, LP, ext, group):
    # x_ref:     (1, C, L)  f32  flattened spatially-padded input
    # mask_ref:  (1, LP)    f32  1.0 at interior positions of the padded grid
    # w*_ref:    (C, KP)    bf16 im2col conv weights, BN scale folded in
    # b*_ref:    (C, 1)     f32  folded BatchNorm bias
    # o_ref:     (1, C, LP) f32  output on the padded grid (interior valid)
    # patch_ref: (KP, LP)   bf16 im2col scratch (reused by both convs)
    # xext_ref:  (C, LE)    f32  zero-extended input slab (also the residual)
    # yext_ref:  (C, LE)    bf16 zero-extended intermediate slab
    C = o_ref.shape[1]
    LE = xext_ref.shape[1]
    n_taps = len(offs)

    def zero_halo(ref, interior_len):
        # Zero only the constant halo bands; the interior is fully overwritten
        # right below.  Re-done every step (cheap) so megacore "parallel"
        # splitting of the grid stays correct with per-core scratch.
        ref[:, :ext] = jnp.zeros((C, ext), ref.dtype)
        ref[:, ext + interior_len:] = jnp.zeros(
            (C, LE - ext - interior_len), ref.dtype)

    # ---- build the zero-extended input slab in VMEM (no wrapper halo pad).
    zero_halo(xext_ref, L)
    xext_ref[:, ext:ext + L] = x_ref[0]

    def conv_mxu(src_ref, w_ref):
        # im2col: tap slices of the zero-extended slab, grouped so every
        # patch store is a whole number of bf16 (16,128) tiles, cast fused
        # into the store; then ONE MXU matmul with K = KP, lanes = LP.
        src = src_ref[...]                                   # (C, LE)
        for g0 in range(0, n_taps, group):
            taps = offs[g0:g0 + group]
            parts = [src[:, o:o + LP] for o in taps]
            pad_rows = (group - len(taps)) * C               # K padding rows
            if pad_rows:
                parts.append(jnp.zeros((pad_rows, LP), src.dtype))
            blk = parts[0] if len(parts) == 1 else jnp.concatenate(parts, 0)
            patch_ref[g0 * C:(g0 + group) * C, :] = blk.astype(jnp.bfloat16)
        return jnp.dot(w_ref[...], patch_ref[...],
                       preferred_element_type=jnp.float32)   # (C, LP) f32

    mask = mask_ref[...]                                     # (1, LP)

    # ---- conv1 (+ folded BN scale) + bias + relu; mask the halo so it
    #      becomes conv2's zero padding.
    y = jnp.maximum(conv_mxu(xext_ref, w1_ref) + b1_ref[...], 0.0) * mask

    # Re-embed the intermediate (bf16) into the zero-extended layout.
    zero_halo(yext_ref, LP)
    yext_ref[:, ext:ext + LP] = y.astype(yext_ref.dtype)

    # ---- conv2 (+ folded BN scale) + bias + residual + relu.
    out = conv_mxu(yext_ref, w2_ref) + b2_ref[...]
    out = out + xext_ref[:, ext:ext + LP]                    # f32 identity
    o_ref[0] = jnp.maximum(out, 0.0) * mask                  # halo/tail = 0


# ----------------------------------------------------------------------------
# Wrapper (layout plumbing in plain JAX, all heavy work in the kernel)
# ----------------------------------------------------------------------------
def _fold_bn(gamma, beta, mean, var):
    scale = gamma / jnp.sqrt(var + EPS)
    bias = beta - mean * scale
    return scale[:, None].astype(jnp.float32), bias[:, None].astype(jnp.float32)


def basic_block_forward(x_ncdhw, params):
    """x_ncdhw: (N, C, D, H, W) float32 (PyTorch layout). Returns same layout."""
    N, C, D, H, W = x_ncdhw.shape
    Dp, Hp, Wp = D + 2, H + 2, W + 2
    L = Dp * Hp * Wp                         # flattened padded volume
    LP = _round_up(L, 128)                   # lane-dense padded length
    maxoff = Hp * Wp + Wp + 1                # largest |tap offset| (flat index)
    ext = _round_up(maxoff, 128)             # lane-aligned halo extension
    LE = _round_up(ext + maxoff + LP, 128)   # zero-extended slab length

    n_taps = 27
    # Group taps so each bf16 patch store covers whole (16,128) tiles.
    group = 1
    while (group * C) % 16:
        group += 1
    n_groups = -(-n_taps // group)
    KP = n_groups * group * C                # K padded (zero weight columns)

    x = x_ncdhw.astype(jnp.float32)
    # Single wrapper pad (conv 'same' padding); halo extension is in-kernel.
    x_flat = jnp.pad(x, ((0, 0), (0, 0), (1, 1), (1, 1), (1, 1))).reshape(N, C, L)

    # Interior mask on the padded grid, lane-padded to LP.
    dd = (jnp.arange(Dp) >= 1) & (jnp.arange(Dp) <= Dp - 2)
    hh = (jnp.arange(Hp) >= 1) & (jnp.arange(Hp) <= Hp - 2)
    ww = (jnp.arange(Wp) >= 1) & (jnp.arange(Wp) <= Wp - 2)
    mask = (dd[:, None, None] & hh[None, :, None] & ww[None, None, :]).reshape(1, L)
    mask = jnp.pad(mask.astype(jnp.float32), ((0, 0), (0, LP - L)))

    s1, b1 = _fold_bn(*params["bn1"])
    s2, b2 = _fold_bn(*params["bn2"])

    # Conv weights: PyTorch (Cout, Cin, 3,3,3) -> im2col (Cout, 27*Cin),
    # tap-major (kd, kh, kw) then Cin (matches the in-kernel patch stacking),
    # BN scale folded into the rows, K padded to KP with zero columns, bf16.
    def flat_w(w, scale):
        wf = jnp.transpose(w, (0, 2, 3, 4, 1)).reshape(C, 27 * C) * scale
        wf = jnp.pad(wf, ((0, 0), (0, KP - 27 * C)))
        return wf.astype(jnp.bfloat16)

    w1f, w2f = flat_w(params["w1"], s1), flat_w(params["w2"], s2)

    # Static flat-index offsets of the 27 taps (shifted by `ext` so every
    # length-LP slice of the extended slab is in bounds).
    offs = tuple(ext + (kd - 1) * Hp * Wp + (kh - 1) * Wp + (kw - 1)
                 for kd in range(3) for kh in range(3) for kw in range(3))

    kernel = functools.partial(_basic_block_kernel, offs=offs, L=L, LP=LP,
                               ext=ext, group=group)

    # VMEM budget from the real per-step footprint (+ headroom), capped for
    # v7x's 64 MiB physical VMEM.
    footprint = (2 * C * L * 4            # input block, double-buffered
                 + 2 * C * LP * 4         # output block, double-buffered
                 + 2 * 2 * (C * KP * 2 + C * 4)   # weights + biases
                 + 2 * LP * 4             # mask
                 + KP * LP * 2            # patch scratch (bf16)
                 + C * LE * 4             # xext scratch (f32)
                 + C * LE * 2)            # yext scratch (bf16)
    vmem_limit = int(min(max(2 * footprint + (4 << 20), 16 << 20), 48 << 20))

    const = lambda n: (0, 0)
    out_flat = pl.pallas_call(
        kernel,
        out_shape=jax.ShapeDtypeStruct((N, C, LP), jnp.float32),
        grid=(N,),
        in_specs=[
            pl.BlockSpec((1, C, L), lambda n: (n, 0, 0)),    # x (flat, padded)
            pl.BlockSpec((1, LP), const),                    # interior mask
            pl.BlockSpec((C, KP), const),                    # w1 (bf16, scaled)
            pl.BlockSpec((C, 1), const),                     # bn1 bias
            pl.BlockSpec((C, KP), const),                    # w2 (bf16, scaled)
            pl.BlockSpec((C, 1), const),                     # bn2 bias
        ],
        out_specs=pl.BlockSpec((1, C, LP), lambda n: (n, 0, 0)),
        scratch_shapes=[
            pltpu.VMEM((KP, LP), jnp.bfloat16),              # im2col patch
            pltpu.VMEM((C, LE), jnp.float32),                # extended input
            pltpu.VMEM((C, LE), jnp.bfloat16),               # extended interm.
        ],
        compiler_params=pltpu.CompilerParams(
            dimension_semantics=("parallel",),
            vmem_limit_bytes=vmem_limit),
    )(x_flat, mask, w1f, b1, w2f, b2)

    # Output is channel-first already; drop lane tail + the padding halo.
    return out_flat[:, :, :L].reshape(N, C, Dp, Hp, Wp)[:, :, 1:-1, 1:-1, 1:-1]


# ----------------------------------------------------------------------------
# Pure-JAX references (for correctness check)
# ----------------------------------------------------------------------------
def _conv3d(x, w):
    return lax.conv_general_dilated(
        x, w, window_strides=(1, 1, 1), padding=[(1, 1)] * 3,
        dimension_numbers=("NCDHW", "OIDHW", "NCDHW"),
        preferred_element_type=jnp.float32)


def basic_block_ref_quant(x, params):
    """Precision-matched reference: BN scale folded into bf16 conv weights,
    bf16 activations into the matmul, f32 accumulation (= kernel pipeline)."""
    C = x.shape[1]
    s1, b1 = _fold_bn(*params["bn1"])
    s2, b2 = _fold_bn(*params["bn2"])
    w1s = (params["w1"] * s1[:, :, None, None, None]).astype(jnp.bfloat16)
    w2s = (params["w2"] * s2[:, :, None, None, None]).astype(jnp.bfloat16)
    y = _conv3d(x.astype(jnp.bfloat16), w1s) + b1.reshape(1, C, 1, 1, 1)
    y = jnp.maximum(y, 0.0)
    out = _conv3d(y.astype(jnp.bfloat16), w2s) + b2.reshape(1, C, 1, 1, 1)
    return jnp.maximum(out + x, 0.0)


def basic_block_ref_f32(x, params):
    """Pure-f32 reference matching the PyTorch module (eval-mode BN)."""
    def bn(y, gamma, beta, mean, var):
        sh = (1, -1, 1, 1, 1)
        return (y - mean.reshape(sh)) / jnp.sqrt(var.reshape(sh) + EPS) \
            * gamma.reshape(sh) + beta.reshape(sh)
    out = _conv3d(x, params["w1"])
    out = jnp.maximum(bn(out, *params["bn1"]), 0.0)
    out = _conv3d(out, params["w2"])
    out = bn(out, *params["bn2"]) + x
    return jnp.maximum(out, 0.0)


# ----------------------------------------------------------------------------
# Main
# ----------------------------------------------------------------------------
if __name__ == "__main__":
    N, C, D, H, W = 2, 8, 8, 8, 8   # inplanes == planes, stride=1, no downsample

    key = jax.random.PRNGKey(0)
    ks = jax.random.split(key, 11)

    params = {
        "w1": jax.random.normal(ks[0], (C, C, 3, 3, 3), jnp.float32) * 0.1,
        "w2": jax.random.normal(ks[1], (C, C, 3, 3, 3), jnp.float32) * 0.1,
        "bn1": (jax.random.uniform(ks[2], (C,), minval=0.5, maxval=1.5),   # gamma
                jax.random.normal(ks[3], (C,)) * 0.1,                      # beta
                jax.random.normal(ks[4], (C,)) * 0.1,                      # running_mean
                jax.random.uniform(ks[5], (C,), minval=0.5, maxval=1.5)),  # running_var
        "bn2": (jax.random.uniform(ks[6], (C,), minval=0.5, maxval=1.5),
                jax.random.normal(ks[7], (C,)) * 0.1,
                jax.random.normal(ks[8], (C,)) * 0.1,
                jax.random.uniform(ks[9], (C,), minval=0.5, maxval=1.5)),
    }
    x = jax.random.normal(ks[10], (N, C, D, H, W), jnp.float32)

    fwd = jax.jit(basic_block_forward)
    out = jax.block_until_ready(fwd(x, params))
    assert out.shape == (N, C, D, H, W), out.shape

    # Tight check against a precision-matched reference (bf16 scale-folded
    # weights, bf16 activations, f32 accumulation) -- validates kernel logic.
    ref_q = jax.block_until_ready(basic_block_ref_quant(x, params))
    if not jnp.allclose(out, ref_q, atol=1e-2, rtol=1e-2):
        raise AssertionError(
            "mismatch vs precision-matched reference, max |diff| = %e"
            % float(jnp.max(jnp.abs(out - ref_q))))

    # Loose sanity check against the pure-f32 module semantics (bf16 MXU
    # operand rounding makes a tight f32 comparison inappropriate).
    ref_f32 = jax.block_until_ready(basic_block_ref_f32(x, params))
    if not jnp.allclose(out, ref_f32, atol=3e-1, rtol=1e-1):
        raise AssertionError(
            "mismatch vs f32 reference, max |diff| = %e"
            % float(jnp.max(jnp.abs(out - ref_f32))))

    print("KERNEL_OK")
</pallas_src>

<mosaic_0001>
module attributes {stable_mosaic.version = 11 : i64} {
  func.func @_basic_block_kernel(%arg0: i32, %arg1: memref<1x8x1000xf32, #tpu.memory_space<vmem>>, %arg2: memref<1x1024xf32, #tpu.memory_space<vmem>>, %arg3: memref<8x224xbf16, #tpu.memory_space<vmem>>, %arg4: memref<8x1xf32, #tpu.memory_space<vmem>>, %arg5: memref<8x224xbf16, #tpu.memory_space<vmem>>, %arg6: memref<8x1xf32, #tpu.memory_space<vmem>>, %arg7: memref<1x8x1024xf32, #tpu.memory_space<vmem>>, %arg8: memref<224x1024xbf16, #tpu.memory_space<vmem>>, %arg9: memref<8x1280xf32, #tpu.memory_space<vmem>>, %arg10: memref<8x1280xbf16, #tpu.memory_space<vmem>>) attributes {dimension_semantics = [#tpu.dimension_semantics<parallel>], iteration_bounds = array<i64: 2>, scalar_prefetch = 0 : i64, scratch_operands = 3 : i64, tpu.core_type = #tpu.core_type<tc>, window_params = [{transform_indices = @transform_0, window_bounds = array<i64: 1, 8, 1000>}, {pipeline_mode = #tpu.pipeline_mode<synchronous>, transform_indices = @transform_1, window_bounds = array<i64: 1, 1024>}, {pipeline_mode = #tpu.pipeline_mode<synchronous>, transform_indices = @transform_2, window_bounds = array<i64: 8, 224>}, {pipeline_mode = #tpu.pipeline_mode<synchronous>, transform_indices = @transform_3, window_bounds = array<i64: 8, 1>}, {pipeline_mode = #tpu.pipeline_mode<synchronous>, transform_indices = @transform_4, window_bounds = array<i64: 8, 224>}, {pipeline_mode = #tpu.pipeline_mode<synchronous>, transform_indices = @transform_5, window_bounds = array<i64: 8, 1>}, {transform_indices = @transform_6, window_bounds = array<i64: 1, 8, 1024>}]} {
    %cst = arith.constant 0.000000e+00 : f32
    %0 = vector.broadcast %cst : f32 to vector<8x128xf32>
    %c0 = arith.constant 0 : index
    %c0_0 = arith.constant 0 : index
    %1 = vector.load %arg9[%c0, %c0_0] : memref<8x1280xf32, #tpu.memory_space<vmem>>, vector<8x128xf32>
    tpu.vector_store %arg9[%c0, %c0_0], %0 {strides = array<i32>} : memref<8x1280xf32, #tpu.memory_space<vmem>>, vector<8x128xf32>,
    %cst_1 = arith.constant 0.000000e+00 : f32
    %2 = vector.broadcast %cst_1 : f32 to vector<8x152xf32>
    %c0_2 = arith.constant 0 : index
    %c1128 = arith.constant 1128 : index
    %3 = vector.load %arg9[%c0_2, %c1128] : memref<8x1280xf32, #tpu.memory_space<vmem>>, vector<8x152xf32>
    tpu.vector_store %arg9[%c0_2, %c1128], %2 {strides = array<i32>} : memref<8x1280xf32, #tpu.memory_space<vmem>>, vector<8x152xf32>,
    %c0_3 = arith.constant 0 : index
    %c0_4 = arith.constant 0 : index
    %c0_5 = arith.constant 0 : index
    %4 = vector.load %arg1[%c0_3, %c0_4, %c0_5] : memref<1x8x1000xf32, #tpu.memory_space<vmem>>, vector<1x8x1000xf32>
    %5 = vector.shape_cast %4 : vector<1x8x1000xf32> to vector<8x1000xf32>
    %c0_6 = arith.constant 0 : index
    %c128 = arith.constant 128 : index
    %6 = vector.load %arg9[%c0_6, %c128] : memref<8x1280xf32, #tpu.memory_space<vmem>>, vector<8x1000xf32>
    tpu.vector_store %arg9[%c0_6, %c128], %5 {strides = array<i32>} : memref<8x1280xf32, #tpu.memory_space<vmem>>, vector<8x1000xf32>,
    %c0_7 = arith.constant 0 : index
    %c0_8 = arith.constant 0 : index
    %7 = vector.load %arg2[%c0_7, %c0_8] : memref<1x1024xf32, #tpu.memory_space<vmem>>, vector<1x1024xf32>
    %c0_9 = arith.constant 0 : index
    %c0_10 = arith.constant 0 : index
    %8 = vector.load %arg9[%c0_9, %c0_10] : memref<8x1280xf32, #tpu.memory_space<vmem>>, vector<8x1280xf32>
    %9 = vector.extract_strided_slice %8 {offsets = [0, 17], sizes = [8, 1024], strides = [1, 1]} : vector<8x1280xf32> to vector<8x1024xf32>
    %10 = vector.extract_strided_slice %8 {offsets = [0, 18], sizes = [8, 1024], strides = [1, 1]} : vector<8x1280xf32> to vector<8x1024xf32>
    %11 = tpu.concatenate %9, %10 in 0 : vector<8x1024xf32>, vector<8x1024xf32> -> vector<16x1024xf32>
    %12 = arith.truncf %11 : vector<16x1024xf32> to vector<16x1024xbf16>
    %c0_11 = arith.constant 0 : index
    %c0_12 = arith.constant 0 : index
    %13 = vector.load %arg8[%c0_11, %c0_12] : memref<224x1024xbf16, #tpu.memory_space<vmem>>, vector<16x1024xbf16>
    tpu.vector_store %arg8[%c0_11, %c0_12], %12 {strides = array<i32>} : memref<224x1024xbf16, #tpu.memory_space<vmem>>, vector<16x1024xbf16>,
    %14 = vector.extract_strided_slice %8 {offsets = [0, 19], sizes = [8, 1024], strides = [1, 1]} : vector<8x1280xf32> to vector<8x1024xf32>
    %15 = vector.extract_strided_slice %8 {offsets = [0, 27], sizes = [8, 1024], strides = [1, 1]} : vector<8x1280xf32> to vector<8x1024xf32>
    %16 = tpu.concatenate %14, %15 in 0 : vector<8x1024xf32>, vector<8x1024xf32> -> vector<16x1024xf32>
    %17 = arith.truncf %16 : vector<16x1024xf32> to vector<16x1024xbf16>
    %c16 = arith.constant 16 : index
    %c0_13 = arith.constant 0 : index
    %18 = vector.load %arg8[%c16, %c0_13] : memref<224x1024xbf16, #tpu.memory_space<vmem>>, vector<16x1024xbf16>
    tpu.vector_store %arg8[%c16, %c0_13], %17 {strides = array<i32>} : memref<224x1024xbf16, #tpu.memory_space<vmem>>, vector<16x1024xbf16>,
    %19 = vector.extract_strided_slice %8 {offsets = [0, 28], sizes = [8, 1024], strides = [1, 1]} : vector<8x1280xf32> to vector<8x1024xf32>
    %20 = vector.extract_strided_slice %8 {offsets = [0, 29], sizes = [8, 1024], strides = [1, 1]} : vector<8x1280xf32> to vector<8x1024xf32>
    %21 = tpu.concatenate %19, %20 in 0 : vector<8x1024xf32>, vector<8x1024xf32> -> vector<16x1024xf32>
    %22 = arith.truncf %21 : vector<16x1024xf32> to vector<16x1024xbf16>
    %c32 = arith.constant 32 : index
    %c0_14 = arith.constant 0 : index
    %23 = vector.load %arg8[%c32, %c0_14] : memref<224x1024xbf16, #tpu.memory_space<vmem>>, vector<16x1024xbf16>
    tpu.vector_store %arg8[%c32, %c0_14], %22 {strides = array<i32>} : memref<224x1024xbf16, #tpu.memory_space<vmem>>, vector<16x1024xbf16>,
    %24 = vector.extract_strided_slice %8 {offsets = [0, 37], sizes = [8, 1024], strides = [1, 1]} : vector<8x1280xf32> to vector<8x1024xf32>
    %25 = vector.extract_strided_slice %8 {offsets = [0, 38], sizes = [8, 1024], strides = [1, 1]} : vector<8x1280xf32> to vector<8x1024xf32>
    %26 = tpu.concatenate %24, %25 in 0 : vector<8x1024xf32>, vector<8x1024xf32> -> vector<16x1024xf32>
    %27 = arith.truncf %26 : vector<16x1024xf32> to vector<16x1024xbf16>
    %c48 = arith.constant 48 : index
    %c0_15 = arith.constant 0 : index
    %28 = vector.load %arg8[%c48, %c0_15] : memref<224x1024xbf16, #tpu.memory_space<vmem>>, vector<16x1024xbf16>
    tpu.vector_store %arg8[%c48, %c0_15], %27 {strides = array<i32>} : memref<224x1024xbf16, #tpu.memory_space<vmem>>, vector<16x1024xbf16>,
    %29 = vector.extract_strided_slice %8 {offsets = [0, 39], sizes = [8, 1024], strides = [1, 1]} : vector<8x1280xf32> to vector<8x1024xf32>
    %30 = vector.extract_strided_slice %8 {offsets = [0, 117], sizes = [8, 1024], strides = [1, 1]} : vector<8x1280xf32> to vector<8x1024xf32>
    %31 = tpu.concatenate %29, %30 in 0 : vector<8x1024xf32>, vector<8x1024xf32> -> vector<16x1024xf32>
    %32 = arith.truncf %31 : vector<16x1024xf32> to vector<16x1024xbf16>
    %c64 = arith.constant 64 : index
    %c0_16 = arith.constant 0 : index
    %33 = vector.load %arg8[%c64, %c0_16] : memref<224x1024xbf16, #tpu.memory_space<vmem>>, vector<16x1024xbf16>
    tpu.vector_store %arg8[%c64, %c0_16], %32 {strides = array<i32>} : memref<224x1024xbf16, #tpu.memory_space<vmem>>, vector<16x1024xbf16>,
    %34 = vector.extract_strided_slice %8 {offsets = [0, 118], sizes = [8, 1024], strides = [1, 1]} : vector<8x1280xf32> to vector<8x1024xf32>
    %35 = vector.extract_strided_slice %8 {offsets = [0, 119], sizes = [8, 1024], strides = [1, 1]} : vector<8x1280xf32> to vector<8x1024xf32>
    %36 = tpu.concatenate %34, %35 in 0 : vector<8x1024xf32>, vector<8x1024xf32> -> vector<16x1024xf32>
    %37 = arith.truncf %36 : vector<16x1024xf32> to vector<16x1024xbf16>
    %c80 = arith.constant 80 : index
    %c0_17 = arith.constant 0 : index
    %38 = vector.load %arg8[%c80, %c0_17] : memref<224x1024xbf16, #tpu.memory_space<vmem>>, vector<16x1024xbf16>
    tpu.vector_store %arg8[%c80, %c0_17], %37 {strides = array<i32>} : memref<224x1024xbf16, #tpu.memory_space<vmem>>, vector<16x1024xbf16>,
    %39 = vector.extract_strided_slice %8 {offsets = [0, 127], sizes = [8, 1024], strides = [1, 1]} : vector<8x1280xf32> to vector<8x1024xf32>
    %40 = vector.extract_strided_slice %8 {offsets = [0, 128], sizes = [8, 1024], strides = [1, 1]} : vector<8x1280xf32> to vector<8x1024xf32>
    %41 = tpu.concatenate %39, %40 in 0 : vector<8x1024xf32>, vector<8x1024xf32> -> vector<16x1024xf32>
    %42 = arith.truncf %41 : vector<16x1024xf32> to vector<16x1024xbf16>
    %c96 = arith.constant 96 : index
    %c0_18 = arith.constant 0 : index
    %43 = vector.load %arg8[%c96, %c0_18] : memref<224x1024xbf16, #tpu.memory_space<vmem>>, vector<16x1024xbf16>
    tpu.vector_store %arg8[%c96, %c0_18], %42 {strides = array<i32>} : memref<224x1024xbf16, #tpu.memory_space<vmem>>, vector<16x1024xbf16>,
    %44 = vector.extract_strided_slice %8 {offsets = [0, 129], sizes = [8, 1024], strides = [1, 1]} : vector<8x1280xf32> to vector<8x1024xf32>
    %45 = vector.extract_strided_slice %8 {offsets = [0, 137], sizes = [8, 1024], strides = [1, 1]} : vector<8x1280xf32> to vector<8x1024xf32>
    %46 = tpu.concatenate %44, %45 in 0 : vector<8x1024xf32>, vector<8x1024xf32> -> vector<16x1024xf32>
    %47 = arith.truncf %46 : vector<16x1024xf32> to vector<16x1024xbf16>
    %c112 = arith.constant 112 : index
    %c0_19 = arith.constant 0 : index
    %48 = vector.load %arg8[%c112, %c0_19] : memref<224x1024xbf16, #tpu.memory_space<vmem>>, vector<16x1024xbf16>
    tpu.vector_store %arg8[%c112, %c0_19], %47 {strides = array<i32>} : memref<224x1024xbf16, #tpu.memory_space<vmem>>, vector<16x1024xbf16>,
    %49 = vector.extract_strided_slice %8 {offsets = [0, 138], sizes = [8, 1024], strides = [1, 1]} : vector<8x1280xf32> to vector<8x1024xf32>
    %50 = vector.extract_strided_slice %8 {offsets = [0, 139], sizes = [8, 1024], strides = [1, 1]} : vector<8x1280xf32> to vector<8x1024xf32>
    %51 = tpu.concatenate %49, %50 in 0 : vector<8x1024xf32>, vector<8x1024xf32> -> vector<16x1024xf32>
    %52 = arith.truncf %51 : vector<16x1024xf32> to vector<16x1024xbf16>
    %c128_20 = arith.constant 128 : index
    %c0_21 = arith.constant 0 : index
    %53 = vector.load %arg8[%c128_20, %c0_21] : memref<224x1024xbf16, #tpu.memory_space<vmem>>, vector<16x1024xbf16>
    tpu.vector_store %arg8[%c128_20, %c0_21], %52 {strides = array<i32>} : memref<224x1024xbf16, #tpu.memory_space<vmem>>, vector<16x1024xbf16>,
    %54 = vector.extract_strided_slice %8 {offsets = [0, 217], sizes = [8, 1024], strides = [1, 1]} : vector<8x1280xf32> to vector<8x1024xf32>
    %55 = vector.extract_strided_slice %8 {offsets = [0, 218], sizes = [8, 1024], strides = [1, 1]} : vector<8x1280xf32> to vector<8x1024xf32>
    %56 = tpu.concatenate %54, %55 in 0 : vector<8x1024xf32>, vector<8x1024xf32> -> vector<16x1024xf32>
    %57 = arith.truncf %56 : vector<16x1024xf32> to vector<16x1024xbf16>
    %c144 = arith.constant 144 : index
    %c0_22 = arith.constant 0 : index
    %58 = vector.load %arg8[%c144, %c0_22] : memref<224x1024xbf16, #tpu.memory_space<vmem>>, vector<16x1024xbf16>
    tpu.vector_store %arg8[%c144, %c0_22], %57 {strides = array<i32>} : memref<224x1024xbf16, #tpu.memory_space<vmem>>, vector<16x1024xbf16>,
    %59 = vector.extract_strided_slice %8 {offsets = [0, 219], sizes = [8, 1024], strides = [1, 1]} : vector<8x1280xf32> to vector<8x1024xf32>
    %60 = vector.extract_strided_slice %8 {offsets = [0, 227], sizes = [8, 1024], strides = [1, 1]} : vector<8x1280xf32> to vector<8x1024xf32>
    %61 = tpu.concatenate %59, %60 in 0 : vector<8x1024xf32>, vector<8x1024xf32> -> vector<16x1024xf32>
    %62 = arith.truncf %61 : vector<16x1024xf32> to vector<16x1024xbf16>
    %c160 = arith.constant 160 : index
    %c0_23 = arith.constant 0 : index
    %63 = vector.load %arg8[%c160, %c0_23] : memref<224x1024xbf16, #tpu.memory_space<vmem>>, vector<16x1024xbf16>
    tpu.vector_store %arg8[%c160, %c0_23], %62 {strides = array<i32>} : memref<224x1024xbf16, #tpu.memory_space<vmem>>, vector<16x1024xbf16>,
    %64 = vector.extract_strided_slice %8 {offsets = [0, 228], sizes = [8, 1024], strides = [1, 1]} : vector<8x1280xf32> to vector<8x1024xf32>
    %65 = vector.extract_strided_slice %8 {offsets = [0, 229], sizes = [8, 1024], strides = [1, 1]} : vector<8x1280xf32> to vector<8x1024xf32>
    %66 = tpu.concatenate %64, %65 in 0 : vector<8x1024xf32>, vector<8x1024xf32> -> vector<16x1024xf32>
    %67 = arith.truncf %66 : vector<16x1024xf32> to vector<16x1024xbf16>
    %c176 = arith.constant 176 : index
    %c0_24 = arith.constant 0 : index
    %68 = vector.load %arg8[%c176, %c0_24] : memref<224x1024xbf16, #tpu.memory_space<vmem>>, vector<16x1024xbf16>
    tpu.vector_store %arg8[%c176, %c0_24], %67 {strides = array<i32>} : memref<224x1024xbf16, #tpu.memory_space<vmem>>, vector<16x1024xbf16>,
    %69 = vector.extract_strided_slice %8 {offsets = [0, 237], sizes = [8, 1024], strides = [1, 1]} : vector<8x1280xf32> to vector<8x1024xf32>
    %70 = vector.extract_strided_slice %8 {offsets = [0, 238], sizes = [8, 1024], strides = [1, 1]} : vector<8x1280xf32> to vector<8x1024xf32>
    %71 = tpu.concatenate %69, %70 in 0 : vector<8x1024xf32>, vector<8x1024xf32> -> vector<16x1024xf32>
    %72 = arith.truncf %71 : vector<16x1024xf32> to vector<16x1024xbf16>
    %c192 = arith.constant 192 : index
    %c0_25 = arith.constant 0 : index
    %73 = vector.load %arg8[%c192, %c0_25] : memref<224x1024xbf16, #tpu.memory_space<vmem>>, vector<16x1024xbf16>
    tpu.vector_store %arg8[%c192, %c0_25], %72 {strides = array<i32>} : memref<224x1024xbf16, #tpu.memory_space<vmem>>, vector<16x1024xbf16>,
    %74 = vector.extract_strided_slice %8 {offsets = [0, 239], sizes = [8, 1024], strides = [1, 1]} : vector<8x1280xf32> to vector<8x1024xf32>
    %cst_26 = arith.constant 0.000000e+00 : f32
    %75 = vector.broadcast %cst_26 : f32 to vector<8x1024xf32>
    %76 = tpu.concatenate %74, %75 in 0 : vector<8x1024xf32>, vector<8x1024xf32> -> vector<16x1024xf32>
    %77 = arith.truncf %76 : vector<16x1024xf32> to vector<16x1024xbf16>
    %c208 = arith.constant 208 : index
    %c0_27 = arith.constant 0 : index
    %78 = vector.load %arg8[%c208, %c0_27] : memref<224x1024xbf16, #tpu.memory_space<vmem>>, vector<16x1024xbf16>
    tpu.vector_store %arg8[%c208, %c0_27], %77 {strides = array<i32>} : memref<224x1024xbf16, #tpu.memory_space<vmem>>, vector<16x1024xbf16>,
    %c0_28 = arith.constant 0 : index
    %c0_29 = arith.constant 0 : index
    %79 = vector.load %arg3[%c0_28, %c0_29] : memref<8x224xbf16, #tpu.memory_space<vmem>>, vector<8x224xbf16>
    %c0_30 = arith.constant 0 : index
    %c0_31 = arith.constant 0 : index
    %80 = vector.load %arg8[%c0_30, %c0_31] : memref<224x1024xbf16, #tpu.memory_space<vmem>>, vector<224x1024xbf16>
    %cst_32 = arith.constant dense<0.000000e+00> : vector<8x1024xf32>
    %81 = tpu.matmul %79, %80, %cst_32 {dimension_numbers = #tpu.dot_dimension_numbers<[1], [0], [0], [1], [0, 0, 1, 1], [], []>} : vector<8x224xbf16>, vector<224x1024xbf16>, vector<8x1024xf32> -> vector<8x1024xf32>
    %c0_33 = arith.constant 0 : index
    %c0_34 = arith.constant 0 : index
    %82 = vector.load %arg4[%c0_33, %c0_34] : memref<8x1xf32, #tpu.memory_space<vmem>>, vector<8x1xf32>
    %83 = vector.broadcast %82 : vector<8x1xf32> to vector<8x1024xf32>
    %84 = arith.addf %81, %83 : vector<8x1024xf32>
    %cst_35 = arith.constant 0.000000e+00 : f32
    %85 = vector.broadcast %cst_35 : f32 to vector<8x1024xf32>
    %86 = arith.maximumf %84, %85 : vector<8x1024xf32>
    %87 = vector.broadcast %7 : vector<1x1024xf32> to vector<8x1024xf32>
    %88 = arith.mulf %86, %87 : vector<8x1024xf32>
    %cst_36 = arith.constant 0.000000e+00 : bf16
    %89 = vector.broadcast %cst_36 : bf16 to vector<8x128xbf16>
    %c0_37 = arith.constant 0 : index
    %c0_38 = arith.constant 0 : index
    %90 = vector.load %arg10[%c0_37, %c0_38] : memref<8x1280xbf16, #tpu.memory_space<vmem>>, vector<8x128xbf16>
    tpu.vector_store %arg10[%c0_37, %c0_38], %89 {strides = array<i32>} : memref<8x1280xbf16, #tpu.memory_space<vmem>>, vector<8x128xbf16>,
    %cst_39 = arith.constant 0.000000e+00 : bf16
    %91 = vector.broadcast %cst_39 : bf16 to vector<8x128xbf16>
    %c0_40 = arith.constant 0 : index
    %c1152 = arith.constant 1152 : index
    %92 = vector.load %arg10[%c0_40, %c1152] : memref<8x1280xbf16, #tpu.memory_space<vmem>>, vector<8x128xbf16>
    tpu.vector_store %arg10[%c0_40, %c1152], %91 {strides = array<i32>} : memref<8x1280xbf16, #tpu.memory_space<vmem>>, vector<8x128xbf16>,
    %93 = arith.truncf %88 : vector<8x1024xf32> to vector<8x1024xbf16>
    %c0_41 = arith.constant 0 : index
    %c128_42 = arith.constant 128 : index
    %94 = vector.load %arg10[%c0_41, %c128_42] : memref<8x1280xbf16, #tpu.memory_space<vmem>>, vector<8x1024xbf16>
    tpu.vector_store %arg10[%c0_41, %c128_42], %93 {strides = array<i32>} : memref<8x1280xbf16, #tpu.memory_space<vmem>>, vector<8x1024xbf16>,
    %c0_43 = arith.constant 0 : index
    %c0_44 = arith.constant 0 : index
    %95 = vector.load %arg10[%c0_43, %c0_44] : memref<8x1280xbf16, #tpu.memory_space<vmem>>, vector<8x1280xbf16>
    %96 = vector.extract_strided_slice %95 {offsets = [0, 17], sizes = [8, 1024], strides = [1, 1]} : vector<8x1280xbf16> to vector<8x1024xbf16>
    %97 = vector.extract_strided_slice %95 {offsets = [0, 18], sizes = [8, 1024], strides = [1, 1]} : vector<8x1280xbf16> to vector<8x1024xbf16>
    %98 = tpu.concatenate %96, %97 in 0 : vector<8x1024xbf16>, vector<8x1024xbf16> -> vector<16x1024xbf16>
    %c0_45 = arith.constant 0 : index
    %c0_46 = arith.constant 0 : index
    %99 = vector.load %arg8[%c0_45, %c0_46] : memref<224x1024xbf16, #tpu.memory_space<vmem>>, vector<16x1024xbf16>
    tpu.vector_store %arg8[%c0_45, %c0_46], %98 {strides = array<i32>} : memref<224x1024xbf16, #tpu.memory_space<vmem>>, vector<16x1024xbf16>,
    %100 = vector.extract_strided_slice %95 {offsets = [0, 19], sizes = [8, 1024], strides = [1, 1]} : vector<8x1280xbf16> to vector<8x1024xbf16>
    %101 = vector.extract_strided_slice %95 {offsets = [0, 27], sizes = [8, 1024], strides = [1, 1]} : vector<8x1280xbf16> to vector<8x1024xbf16>
    %102 = tpu.concatenate %100, %101 in 0 : vector<8x1024xbf16>, vector<8x1024xbf16> -> vector<16x1024xbf16>
    %c16_47 = arith.constant 16 : index
    %c0_48 = arith.constant 0 : index
    %103 = vector.load %arg8[%c16_47, %c0_48] : memref<224x1024xbf16, #tpu.memory_space<vmem>>, vector<16x1024xbf16>
    tpu.vector_store %arg8[%c16_47, %c0_48], %102 {strides = array<i32>} : memref<224x1024xbf16, #tpu.memory_space<vmem>>, vector<16x1024xbf16>,
    %104 = vector.extract_strided_slice %95 {offsets = [0, 28], sizes = [8, 1024], strides = [1, 1]} : vector<8x1280xbf16> to vector<8x1024xbf16>
    %105 = vector.extract_strided_slice %95 {offsets = [0, 29], sizes = [8, 1024], strides = [1, 1]} : vector<8x1280xbf16> to vector<8x1024xbf16>
    %106 = tpu.concatenate %104, %105 in 0 : vector<8x1024xbf16>, vector<8x1024xbf16> -> vector<16x1024xbf16>
    %c32_49 = arith.constant 32 : index
    %c0_50 = arith.constant 0 : index
    %107 = vector.load %arg8[%c32_49, %c0_50] : memref<224x1024xbf16, #tpu.memory_space<vmem>>, vector<16x1024xbf16>
    tpu.vector_store %arg8[%c32_49, %c0_50], %106 {strides = array<i32>} : memref<224x1024xbf16, #tpu.memory_space<vmem>>, vector<16x1024xbf16>,
    %108 = vector.extract_strided_slice %95 {offsets = [0, 37], sizes = [8, 1024], strides = [1, 1]} : vector<8x1280xbf16> to vector<8x1024xbf16>
    %109 = vector.extract_strided_slice %95 {offsets = [0, 38], sizes = [8, 1024], strides = [1, 1]} : vector<8x1280xbf16> to vector<8x1024xbf16>
    %110 = tpu.concatenate %108, %109 in 0 : vector<8x1024xbf16>, vector<8x1024xbf16> -> vector<16x1024xbf16>
    %c48_51 = arith.constant 48 : index
    %c0_52 = arith.constant 0 : index
    %111 = vector.load %arg8[%c48_51, %c0_52] : memref<224x1024xbf16, #tpu.memory_space<vmem>>, vector<16x1024xbf16>
    tpu.vector_store %arg8[%c48_51, %c0_52], %110 {strides = array<i32>} : memref<224x1024xbf16, #tpu.memory_space<vmem>>, vector<16x1024xbf16>,
    %112 = vector.extract_strided_slice %95 {offsets = [0, 39], sizes = [8, 1024], strides = [1, 1]} : vector<8x1280xbf16> to vector<8x1024xbf16>
    %113 = vector.extract_strided_slice %95 {offsets = [0, 117], sizes = [8, 1024], strides = [1, 1]} : vector<8x1280xbf16> to vector<8x1024xbf16>
    %114 = tpu.concatenate %112, %113 in 0 : vector<8x1024xbf16>, vector<8x1024xbf16> -> vector<16x1024xbf16>
    %c64_53 = arith.constant 64 : index
    %c0_54 = arith.constant 0 : index
    %115 = vector.load %arg8[%c64_53, %c0_54] : memref<224x1024xbf16, #tpu.memory_space<vmem>>, vector<16x1024xbf16>
    tpu.vector_store %arg8[%c64_53, %c0_54], %114 {strides = array<i32>} : memref<224x1024xbf16, #tpu.memory_space<vmem>>, vector<16x1024xbf16>,
    %116 = vector.extract_strided_slice %95 {offsets = [0, 118], sizes = [8, 1024], strides = [1, 1]} : vector<8x1280xbf16> to vector<8x1024xbf16>
    %117 = vector.extract_strided_slice %95 {offsets = [0, 119], sizes = [8, 1024], strides = [1, 1]} : vector<8x1280xbf16> to vector<8x1024xbf16>
    %118 = tpu.concatenate %116, %117 in 0 : vector<8x1024xbf16>, vector<8x1024xbf16> -> vector<16x1024xbf16>
    %c80_55 = arith.constant 80 : index
    %c0_56 = arith.constant 0 : index
    %119 = vector.load %arg8[%c80_55, %c0_56] : memref<224x1024xbf16, #tpu.memory_space<vmem>>, vector<16x1024xbf16>
    tpu.vector_store %arg8[%c80_55, %c0_56], %118 {strides = array<i32>} : memref<224x1024xbf16, #tpu.memory_space<vmem>>, vector<16x1024xbf16>,
    %120 = vector.extract_strided_slice %95 {offsets = [0, 127], sizes = [8, 1024], strides = [1, 1]} : vector<8x1280xbf16> to vector<8x1024xbf16>
    %121 = vector.extract_strided_slice %95 {offsets = [0, 128], sizes = [8, 1024], strides = [1, 1]} : vector<8x1280xbf16> to vector<8x1024xbf16>
    %122 = tpu.concatenate %120, %121 in 0 : vector<8x1024xbf16>, vector<8x1024xbf16> -> vector<16x1024xbf16>
    %c96_57 = arith.constant 96 : index
    %c0_58 = arith.constant 0 : index
    %123 = vector.load %arg8[%c96_57, %c0_58] : memref<224x1024xbf16, #tpu.memory_space<vmem>>, vector<16x1024xbf16>
    tpu.vector_store %arg8[%c96_57, %c0_58], %122 {strides = array<i32>} : memref<224x1024xbf16, #tpu.memory_space<vmem>>, vector<16x1024xbf16>,
    %124 = vector.extract_strided_slice %95 {offsets = [0, 129], sizes = [8, 1024], strides = [1, 1]} : vector<8x1280xbf16> to vector<8x1024xbf16>
    %125 = vector.extract_strided_slice %95 {offsets = [0, 137], sizes = [8, 1024], strides = [1, 1]} : vector<8x1280xbf16> to vector<8x1024xbf16>
    %126 = tpu.concatenate %124, %125 in 0 : vector<8x1024xbf16>, vector<8x1024xbf16> -> vector<16x1024xbf16>
    %c112_59 = arith.constant 112 : index
    %c0_60 = arith.constant 0 : index
    %127 = vector.load %arg8[%c112_59, %c0_60] : memref<224x1024xbf16, #tpu.memory_space<vmem>>, vector<16x1024xbf16>
    tpu.vector_store %arg8[%c112_59, %c0_60], %126 {strides = array<i32>} : memref<224x1024xbf16, #tpu.memory_space<vmem>>, vector<16x1024xbf16>,
    %128 = vector.extract_strided_slice %95 {offsets = [0, 138], sizes = [8, 1024], strides = [1, 1]} : vector<8x1280xbf16> to vector<8x1024xbf16>
    %129 = vector.extract_strided_slice %95 {offsets = [0, 139], sizes = [8, 1024], strides = [1, 1]} : vector<8x1280xbf16> to vector<8x1024xbf16>
    %130 = tpu.concatenate %128, %129 in 0 : vector<8x1024xbf16>, vector<8x1024xbf16> -> vector<16x1024xbf16>
    %c128_61 = arith.constant 128 : index
    %c0_62 = arith.constant 0 : index
    %131 = vector.load %arg8[%c128_61, %c0_62] : memref<224x1024xbf16, #tpu.memory_space<vmem>>, vector<16x1024xbf16>
    tpu.vector_store %arg8[%c128_61, %c0_62], %130 {strides = array<i32>} : memref<224x1024xbf16, #tpu.memory_space<vmem>>, vector<16x1024xbf16>,
    %132 = vector.extract_strided_slice %95 {offsets = [0, 217], sizes = [8, 1024], strides = [1, 1]} : vector<8x1280xbf16> to vector<8x1024xbf16>
    %133 = vector.extract_strided_slice %95 {offsets = [0, 218], sizes = [8, 1024], strides = [1, 1]} : vector<8x1280xbf16> to vector<8x1024xbf16>
    %134 = tpu.concatenate %132, %133 in 0 : vector<8x1024xbf16>, vector<8x1024xbf16> -> vector<16x1024xbf16>
    %c144_63 = arith.constant 144 : index
    %c0_64 = arith.constant 0 : index
    %135 = vector.load %arg8[%c144_63, %c0_64] : memref<224x1024xbf16, #tpu.memory_space<vmem>>, vector<16x1024xbf16>
    tpu.vector_store %arg8[%c144_63, %c0_64], %134 {strides = array<i32>} : memref<224x1024xbf16, #tpu.memory_space<vmem>>, vector<16x1024xbf16>,
    %136 = vector.extract_strided_slice %95 {offsets = [0, 219], sizes = [8, 1024], strides = [1, 1]} : vector<8x1280xbf16> to vector<8x1024xbf16>
    %137 = vector.extract_strided_slice %95 {offsets = [0, 227], sizes = [8, 1024], strides = [1, 1]} : vector<8x1280xbf16> to vector<8x1024xbf16>
    %138 = tpu.concatenate %136, %137 in 0 : vector<8x1024xbf16>, vector<8x1024xbf16> -> vector<16x1024xbf16>
    %c160_65 = arith.constant 160 : index
    %c0_66 = arith.constant 0 : index
    %139 = vector.load %arg8[%c160_65, %c0_66] : memref<224x1024xbf16, #tpu.memory_space<vmem>>, vector<16x1024xbf16>
    tpu.vector_store %arg8[%c160_65, %c0_66], %138 {strides = array<i32>} : memref<224x1024xbf16, #tpu.memory_space<vmem>>, vector<16x1024xbf16>,
    %140 = vector.extract_strided_slice %95 {offsets = [0, 228], sizes = [8, 1024], strides = [1, 1]} : vector<8x1280xbf16> to vector<8x1024xbf16>
    %141 = vector.extract_strided_slice %95 {offsets = [0, 229], sizes = [8, 1024], strides = [1, 1]} : vector<8x1280xbf16> to vector<8x1024xbf16>
    %142 = tpu.concatenate %140, %141 in 0 : vector<8x1024xbf16>, vector<8x1024xbf16> -> vector<16x1024xbf16>
    %c176_67 = arith.constant 176 : index
    %c0_68 = arith.constant 0 : index
    %143 = vector.load %arg8[%c176_67, %c0_68] : memref<224x1024xbf16, #tpu.memory_space<vmem>>, vector<16x1024xbf16>
    tpu.vector_store %arg8[%c176_67, %c0_68], %142 {strides = array<i32>} : memref<224x1024xbf16, #tpu.memory_space<vmem>>, vector<16x1024xbf16>,
    %144 = vector.extract_strided_slice %95 {offsets = [0, 237], sizes = [8, 1024], strides = [1, 1]} : vector<8x1280xbf16> to vector<8x1024xbf16>
    %145 = vector.extract_strided_slice %95 {offsets = [0, 238], sizes = [8, 1024], strides = [1, 1]} : vector<8x1280xbf16> to vector<8x1024xbf16>
    %146 = tpu.concatenate %144, %145 in 0 : vector<8x1024xbf16>, vector<8x1024xbf16> -> vector<16x1024xbf16>
    %c192_69 = arith.constant 192 : index
    %c0_70 = arith.constant 0 : index
    %147 = vector.load %arg8[%c192_69, %c0_70] : memref<224x1024xbf16, #tpu.memory_space<vmem>>, vector<16x1024xbf16>
    tpu.vector_store %arg8[%c192_69, %c0_70], %146 {strides = array<i32>} : memref<224x1024xbf16, #tpu.memory_space<vmem>>, vector<16x1024xbf16>,
    %148 = vector.extract_strided_slice %95 {offsets = [0, 239], sizes = [8, 1024], strides = [1, 1]} : vector<8x1280xbf16> to vector<8x1024xbf16>
    %cst_71 = arith.constant 0.000000e+00 : bf16
    %149 = vector.broadcast %cst_71 : bf16 to vector<8x1024xbf16>
    %150 = tpu.concatenate %148, %149 in 0 : vector<8x1024xbf16>, vector<8x1024xbf16> -> vector<16x1024xbf16>
    %c208_72 = arith.constant 208 : index
    %c0_73 = arith.constant 0 : index
    %151 = vector.load %arg8[%c208_72, %c0_73] : memref<224x1024xbf16, #tpu.memory_space<vmem>>, vector<16x1024xbf16>
    tpu.vector_store %arg8[%c208_72, %c0_73], %150 {strides = array<i32>} : memref<224x1024xbf16, #tpu.memory_space<vmem>>, vector<16x1024xbf16>,
    %c0_74 = arith.constant 0 : index
    %c0_75 = arith.constant 0 : index
    %152 = vector.load %arg5[%c0_74, %c0_75] : memref<8x224xbf16, #tpu.memory_space<vmem>>, vector<8x224xbf16>
    %c0_76 = arith.constant 0 : index
    %c0_77 = arith.constant 0 : index
    %153 = vector.load %arg8[%c0_76, %c0_77] : memref<224x1024xbf16, #tpu.memory_space<vmem>>, vector<224x1024xbf16>
    %cst_78 = arith.constant dense<0.000000e+00> : vector<8x1024xf32>
    %154 = tpu.matmul %152, %153, %cst_78 {dimension_numbers = #tpu.dot_dimension_numbers<[1], [0], [0], [1], [0, 0, 1, 1], [], []>} : vector<8x224xbf16>, vector<224x1024xbf16>, vector<8x1024xf32> -> vector<8x1024xf32>
    %c0_79 = arith.constant 0 : index
    %c0_80 = arith.constant 0 : index
    %155 = vector.load %arg6[%c0_79, %c0_80] : memref<8x1xf32, #tpu.memory_space<vmem>>, vector<8x1xf32>
    %156 = vector.broadcast %155 : vector<8x1xf32> to vector<8x1024xf32>
    %157 = arith.addf %154, %156 : vector<8x1024xf32>
    %c0_81 = arith.constant 0 : index
    %c128_82 = arith.constant 128 : index
    %158 = vector.load %arg9[%c0_81, %c128_82] : memref<8x1280xf32, #tpu.memory_space<vmem>>, vector<8x1024xf32>
    %159 = arith.addf %157, %158 : vector<8x1024xf32>
    %cst_83 = arith.constant 0.000000e+00 : f32
    %160 = vector.broadcast %cst_83 : f32 to vector<8x1024xf32>
    %161 = arith.maximumf %159, %160 : vector<8x1024xf32>
    %162 = vector.broadcast %7 : vector<1x1024xf32> to vector<8x1024xf32>
    %163 = arith.mulf %161, %162 : vector<8x1024xf32>
    %c0_84 = arith.constant 0 : index
    %c0_85 = arith.constant 0 : index
    %c0_86 = arith.constant 0 : index
    %164 = vector.load %arg7[%c0_84, %c0_85, %c0_86] : memref<1x8x1024xf32, #tpu.memory_space<vmem>>, vector<1x8x1024xf32>
    %165 = vector.shape_cast %164 : vector<1x8x1024xf32> to vector<8x1024xf32>
    %166 = vector.shape_cast %163 : vector<8x1024xf32> to vector<1x8x1024xf32>
    tpu.vector_store %arg7[%c0_84, %c0_85, %c0_86], %166 {strides = array<i32>} : memref<1x8x1024xf32, #tpu.memory_space<vmem>>, vector<1x8x1024xf32>,
    return
  }
  func.func @transform_0(%arg0: i32) -> (i32, i32, i32) {
    %c0_i32 = arith.constant 0 : i32
    %c0_i32_0 = arith.constant 0 : i32
    %c0_i32_1 = arith.constant 0 : i32
    return %arg0, %c0_i32, %c0_i32_0 : i32, i32, i32
  }
  func.func @transform_1(%arg0: i32) -> (i32, i32) {
    %c0_i32 = arith.constant 0 : i32
    %c0_i32_0 = arith.constant 0 : i32
    %c0_i32_1 = arith.constant 0 : i32
    return %c0_i32, %c0_i32_0 : i32, i32
  }
  func.func @transform_2(%arg0: i32) -> (i32, i32) {
    %c0_i32 = arith.constant 0 : i32
    %c0_i32_0 = arith.constant 0 : i32
    %c0_i32_1 = arith.constant 0 : i32
    return %c0_i32, %c0_i32_0 : i32, i32
  }
  func.func @transform_3(%arg0: i32) -> (i32, i32) {
    %c0_i32 = arith.constant 0 : i32
    %c0_i32_0 = arith.constant 0 : i32
    %c0_i32_1 = arith.constant 0 : i32
    return %c0_i32, %c0_i32_0 : i32, i32
  }
  func.func @transform_4(%arg0: i32) -> (i32, i32) {
    %c0_i32 = arith.constant 0 : i32
    %c0_i32_0 = arith.constant 0 : i32
    %c0_i32_1 = arith.constant 0 : i32
    return %c0_i32, %c0_i32_0 : i32, i32
  }
  func.func @transform_5(%arg0: i32) -> (i32, i32) {
    %c0_i32 = arith.constant 0 : i32
    %c0_i32_0 = arith.constant 0 : i32
    %c0_i32_1 = arith.constant 0 : i32
    return %c0_i32, %c0_i32_0 : i32, i32
  }
  func.func @transform_6(%arg0: i32) -> (i32, i32, i32) {
    %c0_i32 = arith.constant 0 : i32
    %c0_i32_0 = arith.constant 0 : i32
    %c0_i32_1 = arith.constant 0 : i32
    return %arg0, %c0_i32, %c0_i32_0 : i32, i32, i32
  }
}

</mosaic_0001>

<bundles_post_ra>
// kernel: basic_block_forward.1
= control target key start
LH: loop header
LB: loop body
LE: loop exit
PB: predicated region body
PF: predicated region fallthrough
CT: control target
= control target key end

     0   :  { %s5625_s21 = smov 0   ;;  %s8675_s0 = inlined_call_operand.vmem [shape: f32[2,8,1000], index: 0, kind: input, shape index: {}]   ;;  %s8676_s1 = inlined_call_operand.vmem [shape: f32[1,1024], index: 1, kind: input, shape index: {}]   ;;  %s8677_s2 = inlined_call_operand.vmem [shape: bf16[8,224], index: 2, kind: input, shape index: {}]   ;;  %s8678_s3 = inlined_call_operand.vmem [shape: f32[8,1], index: 3, kind: input, shape index: {}]   ;;  %s8679_s4 = inlined_call_operand.vmem [shape: bf16[8,224], index: 4, kind: input, shape index: {}]   ;;  %s8680_s5 = inlined_call_operand.vmem [shape: f32[8,1], index: 5, kind: input, shape index: {}]   ;;  %s8681_s6 = inlined_call_operand.vmem [shape: f32[2,8,1024], index: 6, kind: output, shape index: {}]  }
   0x1 LB: > { %s4955_s22 = sadd.s32 4294967295, %s5563_s21   ;;  %p4959_p0 = scmp.ge.s32.totalorder %s5563_s21, 1  ;;  %s5563_s21 = sphi %s5625_s21, %s16_s21  }
   0x2   : > { %p212_p1 = scmp.lt.s32.totalorder %s5563_s21, 3 }
   0x4   : > { %p213_p2 = pnand %p4959_p0, %p212_p1 }
   0x6   : > { %216 = sbr.rel (%p213_p2) target bundleno = 1356 (0x54c), region = 44 }
   0xb   : > { %p242_p3 = scmp.lt.s32.totalorder %s4955_s22, 1  ;;  %vm254_vm0 = vcmask 1048384   ;;  %v5565_v0 = vmov 0.0   ;;  %vm272_vm1 = vcmask 850944   ;;  %s5566_s27 = smov 120   ;;  %v8683_v28 = vmov 0.0|0.0  }
   0xc   : > { %255 = vst.msk [vmem:[#allocation3 + $0x40] sm:$0xff] %vm254_vm0, %v5565_v0  ;;  %s5567_s28 = smov 127   ;;  %s5568_s29 = smov 50   ;;  %vm8696_vm2 = vcmask 982016   ;;  %vm8782_vm3 = vcmask 1039360   ;;  %vm8700_vm4 = vcmask 408576  }
   0xd   : > { %s9118_s22 = smov (!%p242_p3, %s4955_s22), 1  ;;  %s5569_s30 = smov 1   ;;  %vm8781_vm5 = vcmask 785408   ;;  %vm406_vm6 = vcmask 1043456   ;;  %vm8780_vm7 = vcmask 7168   ;;  %vm887_vm8 = vcmask 80896  }
   0xe   : > { %s8712_s23 = sshll.u32 %s9118_s22, 6  ;;  %s5570_s7 = smov 10   ;;  %vm824_vm9 = vcmask 728064   ;;  %vm8795_vm10 = vcmask 744448   ;;  %vm8791_vm11 = vcmask 818176   ;;  %vm553_vm12 = vcmask 891904  }
   0xf   : > { %s246_s26 = scalar_lea.vmem %s8675_s0, %s8712_s23  ;;  %s5571_s8 = smov 89   ;;  %vm8713_vm13 = vcmask 908288   ;;  %vm1491_vm14 = vcmask 138240   ;;  %vm1382_vm15 = vcmask 154624   ;;  %vm1319_vm0 = vcmask 228352  }
  0x10   : > { %v261_v1 = vld [vmem:[%s246_s26 + $0x20] sm:$0xff]  ;;  %v262_v2 = vld [vmem:[%s246_s26 + $0x28] sm:$0xff]  ;;  %v263_v6 = vld [vmem:[%s246_s26 + $0x30] sm:$0xff]  ;;  %s5572_s9 = smov 91   ;;  %s5573_s10 = smov 100  }
  0x11   : > { %v257_v3 = vld [vmem:[%s246_s26] sm:$0xff]  ;;  %269 = vst [vmem:[#allocation3 + $0x28] sm:$0xff] %v261_v1  ;;  %270 = vst [vmem:[#allocation3 + $0x30] sm:$0xff] %v262_v2  ;;  %v5481_v4 = vpack.i.bf16 %v262_v2, %v261_v1  ;;  %v258_v5 = vld [vmem:[%s246_s26 + $0x8] sm:$0xff]  ;;  %v5641_v9 = vpack.c.bf16 %v263_v6, %v262_v2  ;;  %v5486_v12 = vpack.i.bf16 %v5565_v0, %v263_v6  ;;  %s5574_s11 = smov 109   ;;  %s5575_s12 = smov 111  }
  0x12   : > { %265 = vst [vmem:[#allocation3 + $0x8] sm:$0xff] %v257_v3  ;;  %v259_v7 = vld [vmem:[%s246_s26 + $0x10] sm:$0xff]  ;;  %266 = vst [vmem:[#allocation3 + $0x10] sm:$0xff] %v258_v5  ;;  %v5471_v8 = vpack.i.bf16 %v258_v5, %v257_v3  ;;  %v260_v10 = vld [vmem:[%s246_s26 + $0x18] sm:$0xff]  ;;  %v5506_v15 = vpack.i.bf16 %v263_v6, %v5565_v0  ;;  %v5511_v18 = vpack.i.bf16 %v257_v3, %v5565_v0  ;;  %s5576_s13 = smov 17   ;;  %s5578_s14 = smov 19  }
  0x13   : > { %271 = vst [vmem:[#allocation3 + $0x38] sm:$0xff] %v263_v6  ;;  %267 = vst [vmem:[#allocation3 + $0x18] sm:$0xff] %v259_v7  ;;  %v264_v11 = vld [vmem:[%s246_s26 + $0x38] sm:$0xff]  ;;  %5482 = vrot.lane.b32.xlu1 %v5481_v4, %s5566_s27  ;;  %v5476_v13 = vpack.i.bf16 %v260_v10, %v259_v7  ;;  %v5516_v17 = vpack.i.bf16 %v259_v7, %v258_v5  ;;  %v5526_v19 = vpack.i.bf16 %v263_v6, %v262_v2  ;;  %s5579_s15 = smov 28   ;;  %s5580_s16 = smov 37  }
  0x14   : > { %268 = vst [vmem:[#allocation3 + $0x20] sm:$0xff] %v260_v10  ;;  %273 = vst.msk [vmem:[#allocation3 + $0x40] sm:$0xff] %vm272_vm1, %v264_v11  ;;  %5472 = vrot.lane.b32.xlu0 %v5471_v8, %s5566_s27  ;;  %v5521_v20 = vpack.i.bf16 %v261_v1, %v260_v10  ;;  %v5662_v22 = vpack.c.bf16 %v260_v10, %v259_v7  ;;  %v5665_v23 = vpack.c.bf16 %v258_v5, %v257_v3  ;;  %s5581_s17 = smov 39   ;;  %s5582_s18 = smov 118   ;;  %vm1256_vm1 = vcmask 302080  }
  0x15   : > { %v5369_v24 = vpack.c.bf16 %v259_v7, %v258_v5  ;;  %v5670_v25 = vpack.c.bf16 %v262_v2, %v261_v1  ;;  %v5368_v26 = vpack.c.bf16 %v257_v3, %v5565_v0  ;;  %v5370_v27 = vpack.c.bf16 %v261_v1, %v260_v10  ;;  %s5584_s20 = smov 119   ;;  %s5585_s24 = smov 18  }
  0x16   : > { %s5586_s25 = smov 27   ;;  %s5587_s26 = smov 29  }
  0x17   : > { %5487 = vrot.lane.b32.xlu1 %v5486_v12, %s5566_s27  ;;  %s5588_s19 = smov 38   ;;  %s5589_s23 = smov 117  }
  0x18   : > { %5477 = vrot.lane.b32.xlu0 %v5476_v13, %s5566_s27 }
  0x1b   : > { %v5648_v14 = vld [vmem:[#allocation3 + $0x40] sm:$0xff]  ;;  %5497 = vrot.lane.b32.xlu1 %v5476_v13, %s5567_s28 }
  0x1c   : > { %v5652_v16 = vpack.c.bf16 %v5648_v14, %v263_v6  ;;  %5492 = vrot.lane.b32.xlu0 %v5471_v8, %s5567_s28  ;;  %v5536_v21 = vpack.i.bf16 %v5565_v0, %v5648_v14 }
  0x1f   : > { %5507 = vrot.lane.b32.xlu1 %v5506_v15, %s5567_s28 }
  0x20   : > { %5502 = vrot.lane.b32.xlu0 %v5481_v4, %s5567_s28 }
  0x23   : > { %5517 = vrot.lane.b32.xlu1 %v5516_v17, %s5568_s29 }
  0x24   : > { %5512 = vrot.lane.b32.xlu0 %v5511_v18, %s5568_s29 }
  0x27   : > { %5527 = vrot.lane.b32.xlu1 %v5526_v19, %s5568_s29 }
  0x28   : > { %5522 = vrot.lane.b32.xlu0 %v5521_v20, %s5568_s29 }
  0x2b   : > { %5537 = vrot.lane.b32.xlu1 %v5536_v21, %s5567_s28 }
  0x2c   : > { %5532 = vrot.lane.b32.xlu0 %v5536_v21, %s5566_s27 }
  0x2f   : > { %1015 = vrot.lane.b32.xlu1 %v5662_v22, %s5567_s28 }
  0x30   : > { %1013 = vrot.lane.b32.xlu0 %v5665_v23, %s5567_s28 }
  0x33   : > { %928 = vrot.lane.b32.xlu1 %v5369_v24, %s5569_s30 }
  0x34   : > { %1017 = vrot.lane.b32.xlu0 %v5670_v25, %s5567_s28 }
  0x37   : > { %856 = vrot.lane.b32.xlu1 %v5368_v26, %s5570_s7 }
  0x38   : > { %926 = vrot.lane.b32.xlu0 %v5368_v26, %s5569_s30 }
  0x3b   : > { %860 = vrot.lane.b32.xlu1 %v5370_v27, %s5570_s7 }
  0x3c   : > { %930 = vrot.lane.b32.xlu0 %v5370_v27, %s5569_s30 }
  0x3f   : > { %793 = vrot.lane.b32.xlu1 %v5368_v26, %s5571_s8 }
  0x40   : > { %727 = vrot.lane.b32.xlu0 %v5648_v14, %s5568_s29 }
  0x43   : > { %797 = vrot.lane.b32.xlu1 %v5370_v27, %s5571_s8 }
  0x44   : > { %858 = vrot.lane.b32.xlu0 %v5369_v24, %s5570_s7 }
  0x47   : > { %648 = vrot.lane.b32.xlu1 %v5368_v26, %s5572_s9 }
  0x48   : > { %795 = vrot.lane.b32.xlu0 %v5369_v24, %s5571_s8 }
  0x4b   : > { %652 = vrot.lane.b32.xlu1 %v5370_v27, %s5572_s9 }
  0x4c   : > { %650 = vrot.lane.b32.xlu0 %v5369_v24, %s5572_s9 }
  0x4f   : > { %585 = vrot.lane.b32.xlu1 %v5368_v26, %s5573_s10 }
  0x50   : > { %587 = vrot.lane.b32.xlu0 %v5369_v24, %s5573_s10 }
  0x53   : > { %589 = vrot.lane.b32.xlu1 %v5370_v27, %s5573_s10 }
  0x54   : > { %524 = vrot.lane.b32.xlu0 %v5369_v24, %s5574_s11 }
  0x57   : > { %522 = vrot.lane.b32.xlu1 %v5368_v26, %s5574_s11 }
  0x58   : > { %378 = vrot.lane.b32.xlu0 %v5369_v24, %s5575_s12 }
  0x5b   : > { %526 = vrot.lane.b32.xlu1 %v5370_v27, %s5574_s11 }
  0x5c   : > { %1462 = vrot.lane.b32.xlu0 %v5662_v22, %s5576_s13 }
  0x5f   : > { %376 = vrot.lane.b32.xlu1 %v5368_v26, %s5575_s12 }
  0x60   : > { %1470 = vrot.lane.b32.xlu0 %v8683_v28, %s5576_s13 }
  0x63   : > { %380 = vrot.lane.b32.xlu1 %v5370_v27, %s5575_s12 }
  0x67   : > { %1460 = vrot.lane.b32.xlu1 %v5665_v23, %s5576_s13 }
  0x6b   : > { %1464 = vrot.lane.b32.xlu1 %v5670_v25, %s5576_s13 }
  0x6f   : > { %1472 = vrot.lane.b32.xlu1 %v8683_v28, %s5576_s13 }
  0x85   : > { %v5483_v29 = vpop.permute.xlu1 %5482 }
  0x86   : > { %v5709_v30 = vpop.permute.xlu0 %5472  ;;  %v5484_v35 = vunpack.i.l.bf16 %v5483_v29  ;;  %v5485_v39 = vunpack.i.h.bf16 %v5483_v29 }
  0x87   : > { %v5475_v31 = vunpack.i.h.bf16 %v5709_v30  ;;  %v5474_v32 = vunpack.i.l.bf16 %v5709_v30 }
  0x88   : > { %v5756_v56 = vsel %vm8696_vm2, %v5484_v35, %v5485_v39 }
  0x89   : > { %v5713_v33 = vpop.permute.xlu1 %5487  ;;  %v5719_v41 = vsel %vm8696_vm2, %v5474_v32, %v5475_v31 }
  0x8a   : > { %v5478_v34 = vpop.permute.xlu0 %5477  ;;  %v5489_v36 = vunpack.i.l.bf16 %v5713_v33 }
  0x8b   : > { %v5480_v37 = vunpack.i.h.bf16 %v5478_v34  ;;  %v5479_v38 = vunpack.i.l.bf16 %v5478_v34 }
  0x8c   : > { %v5741_v52 = vsel %vm8696_vm2, %v5485_v39, %v5489_v36 }
  0x8d   : > { %v5498_v40 = vpop.permute.xlu1 %5497  ;;  %v5722_v42 = vsel %vm8696_vm2, %v5475_v31, %v5479_v38  ;;  %v5725_v43 = vsel %vm8696_vm2, %v5479_v38, %v5480_v37  ;;  %v5728_v44 = vsel %vm8696_vm2, %v5480_v37, %v5484_v35  ;;  %v5767_v60 = vpack.c.bf16 %v5741_v52, %v5756_v56 }
  0x8e   : > { %v5500_v45 = vunpack.i.h.bf16 %v5498_v40  ;;  %v5499_v46 = vunpack.i.l.bf16 %v5498_v40  ;;  %v5493_v47 = vpop.permute.xlu0 %5492  ;;  %v5732_v48 = vpack.c.bf16 %v5722_v42, %v5719_v41  ;;  %v5736_v49 = vpack.c.bf16 %v5728_v44, %v5725_v43 }
  0x8f   : > { %v5495_v50 = vunpack.i.h.bf16 %v5493_v47  ;;  %v5494_v51 = vunpack.i.l.bf16 %v5493_v47 }
  0x90   : > { %v5744_v53 = vsel %vm8782_vm3, %v5499_v46, %v5500_v45  ;;  %1023 = vrot.lane.b32.xlu1 %v5732_v48, %s5567_s28  ;;  %1025 = vrot.lane.b32.xlu0 %v5736_v49, %s5567_s28 }
  0x91   : > { %v5751_v54 = vsel %vm8782_vm3, %v5495_v50, %v5499_v46  ;;  %v5753_v55 = vpop.permute.xlu1 %5507  ;;  %v5772_v63 = vsel %vm8782_vm3, %v5494_v51, %v5495_v50 }
  0x92   : > { %v5760_v57 = vpack.c.bf16 %v5744_v53, %v5751_v54  ;;  %v5509_v58 = vunpack.i.l.bf16 %v5753_v55  ;;  %v5763_v59 = vpop.permute.xlu0 %5502  ;;  %v5399_v5 = vpack.c.bf16 %v5772_v63, %v5494_v51  ;;  %v5510_v24 = vunpack.i.h.bf16 %v5753_v55 }
  0x93   : > { %v5505_v61 = vunpack.i.h.bf16 %v5763_v59  ;;  %v5504_v62 = vunpack.i.l.bf16 %v5763_v59 }
  0x94   : > { %v313_v0 = vsel %vm8782_vm3, %v5509_v58, %v5494_v51  ;;  %1027 = vrot.lane.b32.xlu1 %v5767_v60, %s5567_s28  ;;  %938 = vrot.lane.b32.xlu0 %v5760_v57, %s5569_s30 }
  0x95   : > { %v5518_v1 = vpop.permute.xlu1 %5517  ;;  %v5780_v2 = vpack.c.bf16 %v5772_v63, %v313_v0  ;;  %v5784_v6 = vsel %vm8782_vm3, %v5500_v45, %v5504_v62  ;;  %v5789_v7 = vsel %vm8782_vm3, %v5504_v62, %v5505_v61 }
  0x96   : > { %v5519_v3 = vunpack.i.l.bf16 %v5518_v1  ;;  %v5513_v4 = vpop.permute.xlu0 %5512  ;;  %v5798_v12 = vpack.c.bf16 %v5789_v7, %v5784_v6  ;;  %v5520_v19 = vunpack.i.h.bf16 %v5518_v1 }
  0x97   : > { %v5515_v8 = vunpack.i.h.bf16 %v5513_v4  ;;  %v5514_v10 = vunpack.i.l.bf16 %v5513_v4  ;;  %v5490_v4 = vunpack.i.h.bf16 %v5713_v33 }
  0x98   : > { %936 = vrot.lane.b32.xlu1 %v5399_v5, %s5569_s30  ;;  %866 = vrot.lane.b32.xlu0 %v5780_v2, %s5570_s7  ;;  %v732_v39 = vsel %vm8700_vm4, %v5519_v3, %v5520_v19 }
  0x99   : > { %v5794_v11 = vpop.permute.xlu1 %5527  ;;  %v730_v17 = vsel %vm8700_vm4, %v5514_v10, %v5515_v8  ;;  %v731_v18 = vsel %vm8700_vm4, %v5515_v8, %v5519_v3  ;;  %v5384_v3 = vpack.c.bf16 %v5725_v43, %v5722_v42  ;;  %v459_v8 = vsel %vm8696_vm2, %v5490_v4, %v5474_v32 }
  0x9a   : > { %v8682_v13 = vunpack.i.l.bf16 %v5794_v11  ;;  %v5523_v15 = vpop.permute.xlu0 %5522  ;;  %v5393_v27 = vpack.c.bf16 %v731_v18, %v730_v17  ;;  %v5383_v33 = vpack.c.bf16 %v5719_v41, %v459_v8  ;;  %v5385_v43 = vpack.c.bf16 %v5756_v56, %v5728_v44 }
  0x9b   : > { %v5525_v20 = vunpack.i.h.bf16 %v5523_v15  ;;  %v5524_v21 = vunpack.i.l.bf16 %v5523_v15  ;;  %v5416_v41 = vpack.c.bf16 %v5784_v6, %v5744_v53  ;;  %v5415_v6 = vpack.c.bf16 %v5751_v54, %v5772_v63 }
  0x9c   : > { %940 = vrot.lane.b32.xlu1 %v5798_v12, %s5569_s30  ;;  %870 = vrot.lane.b32.xlu0 %v5798_v12, %s5570_s7  ;;  %v319_v10 = vsel %vm8782_vm3, %v5505_v61, %v5510_v24 }
  0x9d   : > { %v5538_v26 = vpop.permute.xlu1 %5537  ;;  %v734_v35 = vsel %vm8700_vm4, %v5524_v21, %v5525_v20  ;;  %v735_v37 = vsel %vm8700_vm4, %v5525_v20, %v8682_v13  ;;  %v733_v40 = vsel %vm8700_vm4, %v5520_v19, %v5524_v21  ;;  %v5931_v15 = vpack.c.bf16 %v319_v10, %v5789_v7 }
  0x9e   : > { %v5808_v29 = vunpack.i.h.bf16 %v5538_v26  ;;  %v5810_v31 = vunpack.i.l.bf16 %v5538_v26  ;;  %v5812_v34 = vpop.permute.xlu0 %5532  ;;  %v5395_v50 = vpack.c.bf16 %v735_v37, %v734_v35  ;;  %v5394_v58 = vpack.c.bf16 %v733_v40, %v732_v39 }
  0x9f   : > { %v5819_v38 = vunpack.i.l.bf16 %v5812_v34  ;;  %v5535_v21 = vunpack.i.h.bf16 %v5812_v34 }
  0xa0   : > { %v5827_v45 = vsel %vm8782_vm3, %v5510_v24, %v5810_v31  ;;  %v1078_v46 = vsel %vm8782_vm3, %v5810_v31, %v5808_v29  ;;  %868 = vrot.lane.b32.xlu1 %v5760_v57, %s5570_s7  ;;  %803 = vrot.lane.b32.xlu0 %v5393_v27, %s5571_s8  ;;  %v6008_v27 = vld [vmem:[%s8677_s2] sm:$0xff] }
  0xa1   : > { %v5838_v47 = vsel %vm8696_vm2, %v5489_v36, %v5819_v38  ;;  %v5841_v51 = vpop.permute.xlu1 %1015  ;;  %v5846_v0 = vpack.c.bf16 %v1078_v46, %v5827_v45  ;;  %8811 = vst [vmem:[#allocation6_spill] sm:$0xff] %v6008_v27  ;;  %v6014_v34 = vcombine.high %v6008_v27, %v6008_v27  ;;  %v6019_v35 = vpack.c.bf16 %v5827_v45, %v319_v10 }
  0xa2   : > { %v5890_v32 = vpop.permute.xlu0 %1013  ;;  %v1034_v46 = vrot.slane %v5841_v51, 4 }
  0xa3   : > { %8812 = vst [vmem:[#allocation7_spill] sm:$0xff] %v6014_v34  ;;  %5140 = vmatprep.mubr.msk.bf16.mxu0 %vm8781_vm5, %v6014_v34  ;;  %5141 = vmatprep.mubr.msk.bf16.mxu1 %vm8781_vm5, %v6014_v34  ;;  %v1033_v40 = vrot.slane %v5890_v32, 4 }
  0xa4   : > { %805 = vrot.lane.b32.xlu1 %v5394_v58, %s5571_s8  ;;  %807 = vrot.lane.b32.xlu0 %v5395_v50, %s5571_s8 }
  0xa5   : > { %v5850_v1 = vpop.permute.xlu1 %928  ;;  %v1043_v4 = vsel %vm406_vm6, %v1033_v40, %v1034_v46 }
  0xa6   : > { %v5899_v44 = vpop.permute.xlu0 %1017  ;;  %v947_v13 = vrot.slane %v5850_v1, 4 }
  0xa7   : > { %8810 = vst [vmem:[#allocation5_spill] sm:$0xff] %v5899_v44  ;;  %v8685_v50 = vrot.slane %v5899_v44, 4 }
  0xa8   : > { %660 = vrot.lane.b32.xlu1 %v5760_v57, %s5572_s9  ;;  %658 = vrot.lane.b32.xlu0 %v5780_v2, %s5572_s9 }
  0xa9   : > { %v5856_v36 = vpop.permute.xlu1 %856 }
  0xaa   : > { %v5911_v56 = vpop.permute.xlu0 %926  ;;  %v876_v44 = vrot.slane %v5856_v36, 4 }
  0xac   : > { %597 = vrot.lane.b32.xlu1 %v5760_v57, %s5573_s10  ;;  %662 = vrot.lane.b32.xlu0 %v5798_v12, %s5572_s9 }
  0xad   : > { %v5866_v5 = vpop.permute.xlu1 %860 }
  0xb0   : > { %534 = vrot.lane.b32.xlu1 %v5384_v3, %s5574_s11  ;;  %595 = vrot.lane.b32.xlu0 %v5780_v2, %s5573_s10 }
  0xb1   : > { %v5877_v42 = vpop.permute.xlu1 %793 }
  0xb4   : > { %388 = vrot.lane.b32.xlu1 %v5760_v57, %s5575_s12  ;;  %599 = vrot.lane.b32.xlu0 %v5798_v12, %s5573_s10 }
  0xb5   : > { %v5887_v30 = vpop.permute.xlu1 %797 }
  0xb8   : > { %1351 = vrot.lane.b32.xlu1 %v5665_v23, %s5578_s14  ;;  %532 = vrot.lane.b32.xlu0 %v5383_v33, %s5574_s11  ;;  %v946_v33 = vrot.slane %v5911_v56, 4 }
  0xb9   : > { %v5897_v57 = vpop.permute.xlu1 %648 }
  0xbc   : > { %1355 = vrot.lane.b32.xlu1 %v5670_v25, %s5578_s14  ;;  %536 = vrot.lane.b32.xlu0 %v5385_v43, %s5574_s11 }
  0xbd   : > { %v5907_v53 = vpop.permute.xlu1 %652 }
  0xc0   : > { %1363 = vrot.lane.b32.xlu1 %v5416_v41, %s5578_s14  ;;  %386 = vrot.lane.b32.xlu0 %v5780_v2, %s5575_s12 }
  0xc1   : > { %v5916_v2 = vpop.permute.xlu1 %585 }
  0xc4   : > { %1288 = vrot.lane.b32.xlu1 %v5665_v23, %s5579_s15  ;;  %390 = vrot.lane.b32.xlu0 %v5798_v12, %s5575_s12  ;;  %v5925_v12 = vpop.permute.xlu0 %930 }
  0xc5   : > { %v5935_v54 = vpop.permute.xlu1 %589 }
  0xc8   : > { %1292 = vrot.lane.b32.xlu1 %v5670_v25, %s5579_s15  ;;  %1474 = vrot.lane.b32.xlu0 %v8683_v28, %s5576_s13  ;;  %v5939_v55 = vpop.permute.xlu0 %727  ;;  %v6055_v28 = vpack.c.bf16 %v5535_v21, %v5535_v21 }
  0xc9   : > { %v5947_v61 = vpop.permute.xlu1 %522 }
  0xcc   : > { %1300 = vrot.lane.b32.xlu1 %v5416_v41, %s5579_s15  ;;  %1353 = vrot.lane.b32.xlu0 %v5662_v22, %s5578_s14  ;;  %v5945_v59 = vpop.permute.xlu0 %858 }
  0xcd   : > { %v5956_v7 = vpop.permute.xlu1 %526 }
  0xd0   : > { %1225 = vrot.lane.b32.xlu1 %v5665_v23, %s5580_s16  ;;  %1361 = vrot.lane.b32.xlu0 %v5415_v6, %s5578_s14  ;;  %v5952_v63 = vpop.permute.xlu0 %795 }
  0xd1   : > { %v5965_v17 = vpop.permute.xlu1 %376 }
  0xd4   : > { %1229 = vrot.lane.b32.xlu1 %v5670_v25, %s5580_s16  ;;  %1365 = vrot.lane.b32.xlu0 %v5931_v15, %s5578_s14 }
  0xd5   : > { %v5975_v19 = vpop.permute.xlu1 %380 }
  0xd8   : > { %1237 = vrot.lane.b32.xlu1 %v5736_v49, %s5580_s16  ;;  %1290 = vrot.lane.b32.xlu0 %v5662_v22, %s5579_s15  ;;  %v5960_v49 = vpop.permute.xlu0 %650 }
  0xdc   : > { %1162 = vrot.lane.b32.xlu1 %v5665_v23, %s5581_s17  ;;  %1298 = vrot.lane.b32.xlu0 %v5415_v6, %s5579_s15  ;;  %v5967_v18 = vpop.permute.xlu0 %587 }
  0xe0   : > { %1166 = vrot.lane.b32.xlu1 %v5670_v25, %s5581_s17  ;;  %1302 = vrot.lane.b32.xlu0 %v5931_v15, %s5579_s15  ;;  %v5977_v20 = vpop.permute.xlu0 %524 }
  0xe4   : > { %1174 = vrot.lane.b32.xlu1 %v5416_v41, %s5581_s17  ;;  %1227 = vrot.lane.b32.xlu0 %v5662_v22, %s5580_s16 }
  0xe8   : > { %1099 = vrot.lane.b32.xlu1 %v5665_v23, %s5582_s18  ;;  %1235 = vrot.lane.b32.xlu0 %v5732_v48, %s5580_s16  ;;  %v5985_v23 = vpop.permute.xlu1 %1460  ;;  %v5987_v48 = vpop.permute.xlu0 %378 }
  0xec   : > { %1103 = vrot.lane.b32.xlu1 %v5670_v25, %s5582_s18  ;;  %1239 = vrot.lane.b32.xlu0 %v5767_v60, %s5580_s16  ;;  %v992_v25 = vsel %vm8696_vm2, %v5819_v38, %v5535_v21  ;;  %v5997_v24 = vpop.permute.xlu1 %1464  ;;  %v5999_v26 = vpop.permute.xlu0 %1462  ;;  %vm8715_vm2 = vcmask 318464  }
  0xed   : > { %v5995_v60 = vpack.c.bf16 %v992_v25, %v5838_v47 }
  0xf0   : > { %1111 = vrot.lane.b32.xlu1 %v5416_v41, %s5582_s18  ;;  %1164 = vrot.lane.b32.xlu0 %v5662_v22, %s5581_s17  ;;  %v6021_v37 = vpop.permute.xlu1 %1472  ;;  %v6023_v39 = vpop.permute.xlu0 %1470 }
  0xf4   : > { %1019 = vrot.lane.b32.xlu1 %v5652_v16, %s5567_s28  ;;  %1172 = vrot.lane.b32.xlu0 %v5415_v6, %s5581_s17 }
  0xf8   : > { %1029 = vrot.lane.b32.xlu1 %v5995_v60, %s5567_s28  ;;  %1176 = vrot.lane.b32.xlu0 %v5931_v15, %s5581_s17 }
  0xfc   : > { %932 = vrot.lane.b32.xlu1 %v5641_v9, %s5569_s30  ;;  %1101 = vrot.lane.b32.xlu0 %v5662_v22, %s5582_s18 }
 0x100   : > { %942 = vrot.lane.b32.xlu1 %v6019_v35, %s5569_s30  ;;  %1109 = vrot.lane.b32.xlu0 %v5415_v6, %s5582_s18  ;;  %v1045_v6 = vsel %vm8782_vm3, %v5890_v32, %v1043_v4 }
 0x102   : > { %v1024_v22 = vpop.permute.xlu1 %1023  ;;  %v1026_v45 = vpop.permute.xlu0 %1025 }
 0x103   : > { %v1038_v58 = vrot.slane %v1024_v22, 4  ;;  %v1039_v3 = vrot.slane %v1026_v45, 4 }
 0x104   : > { %862 = vrot.lane.b32.xlu1 %v5641_v9, %s5570_s7  ;;  %1113 = vrot.lane.b32.xlu0 %v5931_v15, %s5582_s18  ;;  %v1046_v15 = vsel %vm406_vm6, %v1034_v46, %v8685_v50  ;;  %v956_v50 = vsel %vm406_vm6, %v946_v33, %v947_v13  ;;  %v8693_v33 = vrot.slane %v5866_v5, 4 }
 0x105   : > { %v1052_v8 = vsel %vm406_vm6, %v1038_v58, %v1039_v3  ;;  %v5530_v58 = vunpack.i.h.bf16 %v5794_v11  ;;  %v1047_v21 = vsel %vm8782_vm3, %v5841_v51, %v1046_v15  ;;  %v8815_v51 = vrot.slane %v5925_v12, 4 }
 0x106   : > { %v6042_v43 = vpop.permute.xlu1 %1027  ;;  %v939_v41 = vpop.permute.xlu0 %938  ;;  %v1053_v10 = vsel %vm8782_vm3, %v1024_v22, %v1052_v8  ;;  %v8813_v22 = vmov 0.0|0.0   ;;  %v877_v15 = vrot.slane %v5945_v59, 4 }
 0x107   : > { %v8689_v25 = vrot.slane %v6042_v43, 4  ;;  %v5085_v40 = vcombine.high %v1045_v6, %v1053_v10  ;;  %v5084_v62 = vcombine.low %v1045_v6, %v1053_v10  ;;  %v737_v46 = vsel %vm8700_vm4, %v5530_v58, %v5939_v55 }
 0x108   : > { %872 = vrot.lane.b32.xlu1 %v6019_v35, %s5570_s7  ;;  %1021 = vrot.lane.b32.xlu0 %v8813_v22, %s5567_s28  ;;  %v952_v32 = vrot.slane %v939_v41, 4 }
 0x109   : > { %2212 = vmatprep.subr.bf16.mxu0 %v5085_v40  ;;  %v1054_v4 = vsel %vm406_vm6, %v1039_v3, %v8689_v25  ;;  %v6073_v3 = vpack.c.bf16 %v5648_v14, %v5648_v14  ;;  %v8814_v25 = vunpack.i.l.bf16 %v5794_v11 }
 0x10a   : > { %v937_v8 = vpop.permute.xlu1 %936  ;;  %2213 = vmatpush1.bf16.msra.mxu0 %v5084_v62  ;;  %v6065_v6 = vpop.permute.xlu0 %866  ;;  %v1055_v10 = vsel %vm8782_vm3, %v1026_v45, %v1054_v4  ;;  %v959_v45 = vsel %vm406_vm6, %v947_v13, %v8815_v51  ;;  %v958_v13 = vsel %vm8780_vm7, %v5911_v56, %v956_v50  ;;  %v889_v56 = vsel %vm406_vm6, %v877_v15, %v8693_v33 }
 0x10b   : > { %v951_v40 = vrot.slane %v937_v8, 4  ;;  %v5087_v34 = vcombine.high %v1047_v21, %v1055_v10  ;;  %v5086_v27 = vcombine.low %v1047_v21, %v1055_v10  ;;  %v736_v62 = vsel %vm8700_vm4, %v8814_v25, %v5530_v58 }
 0x10c   : > { %799 = vrot.lane.b32.xlu1 %v5641_v9, %s5571_s8  ;;  %1031 = vrot.lane.b32.xlu0 %v6055_v28, %s5567_s28  ;;  %v5396_v11 = vpack.c.bf16 %v737_v46, %v736_v62  ;;  %v886_v50 = vsel %vm406_vm6, %v876_v44, %v877_v15  ;;  %v814_v46 = vrot.slane %v5952_v63, 4  ;;  %vm8714_vm4 = vcmask 965632  }
 0x10d   : > { %v965_v14 = vsel %vm406_vm6, %v951_v40, %v952_v32  ;;  %2253 = vmatprep.subr.bf16.mxu1 %v5087_v34  ;;  %v6099_v40 = vpack.c.bf16 %v5810_v31, %v5810_v31  ;;  %v960_v34 = vsel %vm8780_vm7, %v5850_v1, %v959_v45  ;;  %v813_v1 = vrot.slane %v5877_v42, 4 }
 0x10e   : > { %v966_v25 = vsel %vm8780_vm7, %v937_v8, %v965_v14  ;;  %v6090_v58 = vpop.permute.xlu1 %940  ;;  %2254 = vmatpush1.bf16.msra.mxu1 %v5086_v27  ;;  %v6092_v4 = vpop.permute.xlu0 %870  ;;  %v8692_v27 = vrot.slane %v5887_v30, 4  ;;  %v881_v8 = vrot.slane %v6065_v6, 4  ;;  %v888_v44 = vsel %vm887_vm8, %v5856_v36, %v886_v50 }
 0x10f   : > { %v953_v21 = vrot.slane %v6090_v58, 4  ;;  %v5077_v10 = vcombine.high %v958_v13, %v966_v25  ;;  %v5076_v51 = vcombine.low %v958_v13, %v966_v25  ;;  %v8694_v14 = vrot.slane %v6092_v4, 4 }
 0x110   : > { %809 = vrot.lane.b32.xlu1 %v5396_v11, %s5571_s8  ;;  %934 = vrot.lane.b32.xlu0 %v6073_v3, %s5569_s30 }
 0x111   : > { %2214 = vmatprep.subr.bf16.mxu0 %v5077_v10  ;;  %v967_v31 = vsel %vm406_vm6, %v952_v32, %v953_v21  ;;  %v890_v32 = vsel %vm887_vm8, %v5945_v59, %v889_v56 }
 0x112   : > { %v869_v62 = vpop.permute.xlu1 %868  ;;  %2215 = vmatpush1.bf16.msra.mxu0 %v5076_v51  ;;  %v968_v45 = vsel %vm8780_vm7, %v939_v41, %v967_v31  ;;  %v804_v25 = vpop.permute.xlu0 %803  ;;  %v826_v41 = vsel %vm406_vm6, %v814_v46, %v8692_v27  ;;  %v823_v31 = vsel %vm406_vm6, %v813_v1, %v814_v46  ;;  %v670_v46 = vrot.slane %v5907_v53, 4 }
 0x113   : > { %v882_v11 = vrot.slane %v869_v62, 4  ;;  %v5079_v13 = vcombine.high %v960_v34, %v968_v45  ;;  %v5078_v10 = vcombine.low %v960_v34, %v968_v45  ;;  %v818_v34 = vrot.slane %v804_v25, 4 }
 0x114   : > { %654 = vrot.lane.b32.xlu1 %v5641_v9, %s5572_s9  ;;  %944 = vrot.lane.b32.xlu0 %v6099_v40, %s5569_s30 }
 0x115   : > { %v897_v15 = vsel %vm406_vm6, %v882_v11, %v8694_v14  ;;  %2255 = vmatprep.subr.bf16.mxu1 %v5079_v13  ;;  %v895_v59 = vsel %vm406_vm6, %v881_v8, %v882_v11  ;;  %v668_v13 = vrot.slane %v5897_v57, 4  ;;  %v669_v8 = vrot.slane %v5960_v49, 4 }
 0x116   : > { %v898_v51 = vsel %vm887_vm8, %v869_v62, %v897_v15  ;;  %v806_v56 = vpop.permute.xlu1 %805  ;;  %2256 = vmatpush1.bf16.msra.mxu1 %v5078_v10  ;;  %v896_v36 = vsel %vm887_vm8, %v6065_v6, %v895_v59  ;;  %v6138_v45 = vpop.permute.xlu0 %807  ;;  %v827_v6 = vsel %vm824_vm9, %v5952_v63, %v826_v41 }
 0x117   : > { %v819_v50 = vrot.slane %v806_v56, 4  ;;  %v5069_v27 = vcombine.high %v888_v44, %v896_v36  ;;  %v5071_v33 = vcombine.high %v890_v32, %v898_v51  ;;  %v5068_v14 = vcombine.low %v888_v44, %v896_v36 }
 0x118   : > { %v820_v62 = vrot.slane %v6138_v45, 4  ;;  %664 = vrot.lane.b32.xlu1 %v6019_v35, %s5572_s9  ;;  %v5070_v11 = vcombine.low %v890_v32, %v898_v51  ;;  %864 = vrot.lane.b32.xlu0 %v6073_v3, %s5570_s7  ;;  %v825_v44 = vsel %vm824_vm9, %v5877_v42, %v823_v31  ;;  %v678_v42 = vsel %vm406_vm6, %v668_v13, %v669_v8 }
 0x119   : > { %2216 = vmatprep.subr.bf16.mxu0 %v5069_v27  ;;  %v832_v1 = vsel %vm406_vm6, %v818_v34, %v819_v50  ;;  %2257 = vmatprep.subr.bf16.mxu1 %v5071_v33  ;;  %v606_v31 = vrot.slane %v5967_v18, 4  ;;  %v680_v13 = vsel %vm8795_vm10, %v5897_v57, %v678_v42 }
 0x11a   : > { %v661_v10 = vpop.permute.xlu1 %660  ;;  %2217 = vmatpush1.bf16.msra.mxu0 %v5068_v14  ;;  %v833_v32 = vsel %vm824_vm9, %v804_v25, %v832_v1  ;;  %v834_v63 = vsel %vm406_vm6, %v819_v50, %v820_v62  ;;  %2258 = vmatpush1.bf16.msra.mxu1 %v5070_v11  ;;  %v659_v15 = vpop.permute.xlu0 %658 }
 0x11b   : > { %v674_v41 = vrot.slane %v661_v10, 4  ;;  %v5061_v27 = vcombine.high %v825_v44, %v833_v32  ;;  %v835_v59 = vsel %vm824_vm9, %v806_v56, %v834_v63  ;;  %v5060_v51 = vcombine.low %v825_v44, %v833_v32 }
 0x11c   : > { %v673_v34 = vrot.slane %v659_v15, 4  ;;  %591 = vrot.lane.b32.xlu1 %v5641_v9, %s5573_s10  ;;  %v5063_v33 = vcombine.high %v827_v6, %v835_v59  ;;  %v5062_v14 = vcombine.low %v827_v6, %v835_v59  ;;  %874 = vrot.lane.b32.xlu0 %v6099_v40, %s5570_s7  ;;  %v605_v56 = vrot.slane %v5916_v2, 4 }
 0x11d   : > { %2218 = vmatprep.subr.bf16.mxu0 %v5061_v27  ;;  %v681_v6 = vsel %vm406_vm6, %v669_v8, %v670_v46  ;;  %v5397_v63 = vpack.c.bf16 %v5939_v55, %v5939_v55 }
 0x11e   : > { %v687_v25 = vsel %vm406_vm6, %v673_v34, %v674_v41  ;;  %2259 = vmatprep.subr.bf16.mxu1 %v5063_v33  ;;  %v598_v36 = vpop.permute.xlu1 %597  ;;  %2219 = vmatpush1.bf16.msra.mxu0 %v5060_v51  ;;  %v6167_v11 = vpop.permute.xlu0 %662  ;;  %v682_v27 = vsel %vm8795_vm10, %v5960_v49, %v681_v6  ;;  %v615_v34 = vsel %vm406_vm6, %v605_v56, %v606_v31  ;;  %v542_v49 = vrot.slane %v5947_v61, 4 }
 0x11f   : > { %v688_v50 = vsel %vm8795_vm10, %v659_v15, %v687_v25  ;;  %2260 = vmatpush1.bf16.msra.mxu1 %v5062_v14  ;;  %v675_v1 = vrot.slane %v6167_v11, 4  ;;  %v607_v15 = vrot.slane %v5935_v54, 4  ;;  %v611_v55 = vrot.slane %v598_v36, 4 }
 0x120   : > { %601 = vrot.lane.b32.xlu1 %v6019_v35, %s5573_s10  ;;  %v5053_v44 = vcombine.high %v680_v13, %v688_v50  ;;  %v5052_v32 = vcombine.low %v680_v13, %v688_v50  ;;  %801 = vrot.lane.b32.xlu0 %v6073_v3, %s5571_s8  ;;  %v617_v50 = vsel %vm8791_vm11, %v5916_v2, %v615_v34  ;;  %v544_v2 = vrot.slane %v5956_v7, 4 }
 0x121   : > { %v689_v8 = vsel %vm406_vm6, %v674_v41, %v675_v1  ;;  %v618_v13 = vsel %vm406_vm6, %v606_v31, %v607_v15 }
 0x122   : > { %2220 = vmatprep.subr.bf16.mxu0 %v5053_v44  ;;  %v6181_v57 = vpop.permute.xlu1 %534  ;;  %v596_v59 = vpop.permute.xlu0 %595  ;;  %v690_v51 = vsel %vm8795_vm10, %v661_v10, %v689_v8  ;;  %v8816_v44 = vpack.c.bf16 %v5838_v47, %v5741_v52  ;;  %v543_v8 = vrot.slane %v5977_v20, 4  ;;  %v619_v52 = vsel %vm8791_vm11, %v5967_v18, %v618_v13 }
 0x123   : > { %2221 = vmatpush1.bf16.msra.mxu0 %v5052_v32  ;;  %v610_v33 = vrot.slane %v596_v59, 4  ;;  %v5055_v14 = vcombine.high %v682_v27, %v690_v51  ;;  %v5054_v42 = vcombine.low %v682_v27, %v690_v51  ;;  %v548_v34 = vrot.slane %v6181_v57, 4 }
 0x124   : > { %528 = vrot.lane.b32.xlu1 %v5641_v9, %s5574_s11  ;;  %811 = vrot.lane.b32.xlu0 %v5397_v63, %s5571_s8  ;;  %v552_v51 = vsel %vm406_vm6, %v542_v49, %v543_v8  ;;  %v396_v18 = vrot.slane %v5965_v17, 4  ;;  %v1480_v49 = vrot.slane %v5985_v23, 4 }
 0x125   : > { %v624_v41 = vsel %vm406_vm6, %v610_v33, %v611_v55  ;;  %2261 = vmatprep.subr.bf16.mxu1 %v5055_v14 }
 0x126   : > { %v6195_v25 = vpop.permute.xlu1 %388  ;;  %v625_v10 = vsel %vm8791_vm11, %v596_v59, %v624_v41  ;;  %2262 = vmatpush1.bf16.msra.mxu1 %v5054_v42  ;;  %v6199_v56 = vpop.permute.xlu0 %599 }
 0x127   : > { %v612_v6 = vrot.slane %v6199_v56, 4  ;;  %v5045_v32 = vcombine.high %v617_v50, %v625_v10  ;;  %v5044_v63 = vcombine.low %v617_v50, %v625_v10  ;;  %v1486_v10 = vrot.slane %v6021_v37, 4 }
 0x128   : > { %538 = vrot.lane.b32.xlu1 %v8816_v44, %s5574_s11  ;;  %656 = vrot.lane.b32.xlu0 %v6073_v3, %s5572_s9  ;;  %v1485_v50 = vrot.slane %v6023_v39, 4 }
 0x129   : > { %2222 = vmatprep.subr.bf16.mxu0 %v5045_v32  ;;  %v626_v31 = vsel %vm406_vm6, %v611_v55, %v612_v6  ;;  %v397_v32 = vrot.slane %v5987_v48, 4 }
 0x12a   : > { %v6215_v27 = vpop.permute.xlu1 %1351  ;;  %2223 = vmatpush1.bf16.msra.mxu0 %v5044_v63  ;;  %v533_v47 = vpop.permute.xlu0 %532  ;;  %v627_v59 = vsel %vm8791_vm11, %v598_v36, %v626_v31  ;;  %v555_v36 = vsel %vm406_vm6, %v543_v8, %v544_v2  ;;  %v1481_v31 = vrot.slane %v5999_v26, 4 }
 0x12b   : > { %v547_v33 = vrot.slane %v533_v47, 4  ;;  %v5047_v14 = vcombine.high %v619_v52, %v627_v59  ;;  %v5046_v42 = vcombine.low %v619_v52, %v627_v59  ;;  %v556_v52 = vsel %vm553_vm12, %v5977_v20, %v555_v36 }
 0x12c   : > { %382 = vrot.lane.b32.xlu1 %v5641_v9, %s5575_s12  ;;  %666 = vrot.lane.b32.xlu0 %v6099_v40, %s5572_s9  ;;  %v554_v9 = vsel %vm553_vm12, %v5947_v61, %v552_v51  ;;  %v407_v51 = vsel %vm406_vm6, %v396_v18, %v397_v32  ;;  %v402_v36 = vrot.slane %v6195_v25, 4 }
 0x12d   : > { %v561_v55 = vsel %vm406_vm6, %v547_v33, %v548_v34  ;;  %2263 = vmatprep.subr.bf16.mxu1 %v5047_v14  ;;  %v1499_v33 = vsel %vm406_vm6, %v1485_v50, %v1486_v10 }
 0x12e   : > { %v6234_v41 = vpop.permute.xlu1 %1355  ;;  %v562_v13 = vsel %vm553_vm12, %v533_v47, %v561_v55  ;;  %2264 = vmatpush1.bf16.msra.mxu1 %v5046_v42  ;;  %v6242_v44 = vpop.permute.xlu0 %536  ;;  %v1490_v42 = vsel %vm406_vm6, %v1480_v49, %v1481_v31 }
 0x12f   : > { %v8711_v63 = vrot.slane %v6242_v44, 4  ;;  %v5037_v8 = vcombine.high %v554_v9, %v562_v13  ;;  %v5036_v61 = vcombine.low %v554_v9, %v562_v13  ;;  %v1500_v13 = vsel %vm1491_vm14, %v6023_v39, %v1499_v33 }
 0x130   : > { %392 = vrot.lane.b32.xlu1 %v6019_v35, %s5575_s12  ;;  %593 = vrot.lane.b32.xlu0 %v6073_v3, %s5573_s10  ;;  %v8708_v35 = vrot.slane %v5975_v19, 4 }
 0x131   : > { %2224 = vmatprep.subr.bf16.mxu0 %v5037_v8  ;;  %v563_v59 = vsel %vm406_vm6, %v548_v34, %v8711_v63 }
 0x132   : > { %v6253_v47 = vpop.permute.xlu1 %1363  ;;  %2225 = vmatpush1.bf16.msra.mxu0 %v5036_v61  ;;  %v387_v14 = vpop.permute.xlu0 %386  ;;  %v564_v20 = vsel %vm553_vm12, %v6181_v57, %v563_v59  ;;  %v409_v57 = vsel %vm8713_vm13, %v5965_v17, %v407_v51  ;;  %v410_v49 = vsel %vm406_vm6, %v397_v32, %v8708_v35  ;;  %v8706_v59 = vrot.slane %v5997_v24, 4 }
 0x133   : > { %v401_v55 = vrot.slane %v387_v14, 4  ;;  %v5039_v34 = vcombine.high %v556_v52, %v564_v20  ;;  %v5038_v18 = vcombine.low %v556_v52, %v564_v20  ;;  %v1492_v52 = vsel %vm1491_vm14, %v5985_v23, %v1490_v42 }
 0x134   : > { %1466 = vrot.lane.b32.xlu1 %v5652_v16, %s5576_s13  ;;  %603 = vrot.lane.b32.xlu0 %v6099_v40, %s5573_s10  ;;  %v5133_v51 = vcombine.high %v1492_v52, %v1500_v13  ;;  %v411_v33 = vsel %vm8713_vm13, %v5987_v48, %v410_v49  ;;  %v5387_v42 = vpack.c.bf16 %v5819_v38, %v5819_v38 }
 0x135   : > { %v416_v9 = vsel %vm406_vm6, %v401_v55, %v402_v36  ;;  %2265 = vmatprep.subr.bf16.mxu1 %v5039_v34  ;;  %v1493_v34 = vsel %vm406_vm6, %v1481_v31, %v8706_v59 }
 0x136   : > { %v6272_v50 = vpop.permute.xlu1 %1288  ;;  %v417_v8 = vsel %vm8713_vm13, %v387_v14, %v416_v9  ;;  %2266 = vmatpush1.bf16.msra.mxu1 %v5038_v18  ;;  %v6282_v61 = vpop.permute.xlu0 %390  ;;  %v5132_v9 = vcombine.low %v1492_v52, %v1500_v13  ;;  %v1494_v31 = vsel %vm1491_vm14, %v5999_v26, %v1493_v34  ;;  %v8704_v26 = vrot.slane %v6234_v41, 4 }
 0x137   : > { %v8707_v20 = vrot.slane %v6282_v61, 4  ;;  %v5029_v17 = vcombine.high %v409_v57, %v417_v8  ;;  %v5028_v32 = vcombine.low %v409_v57, %v417_v8 }
 0x138   : > { %1476 = vrot.lane.b32.xlu1 %v8813_v22, %s5576_s13  ;;  %530 = vrot.lane.b32.xlu0 %v6073_v3, %s5574_s11 }
 0x139   : > { %2226 = vmatprep.subr.bf16.mxu0 %v5029_v17  ;;  %v418_v23 = vsel %vm406_vm6, %v402_v36, %v8707_v20 }
 0x13a   : > { %v6292_v39 = vpop.permute.xlu1 %1292  ;;  %2227 = vmatpush1.bf16.msra.mxu0 %v5028_v32  ;;  %v6299_v14 = vpop.permute.xlu0 %1474  ;;  %v419_v55 = vsel %vm8713_vm13, %v6195_v25, %v418_v23 }
 0x13b   : > { %v8705_v18 = vrot.slane %v6299_v14, 4  ;;  %2232 = vmatprep.subr.bf16.mxu0 %v5133_v51  ;;  %v5031_v48 = vcombine.high %v411_v33, %v419_v55  ;;  %v5030_v36 = vcombine.low %v411_v33, %v419_v55 }
 0x13c   : > { %1357 = vrot.lane.b32.xlu1 %v5652_v16, %s5578_s14  ;;  %540 = vrot.lane.b32.xlu0 %v5387_v42, %s5574_s11 }
 0x13d   : > { %2267 = vmatprep.subr.bf16.mxu1 %v5031_v48  ;;  %v1501_v25 = vsel %vm406_vm6, %v1486_v10, %v8705_v18  ;;  %v1371_v10 = vrot.slane %v6215_v27, 4 }
 0x13e   : > { %v6312_v38 = vpop.permute.xlu1 %1300  ;;  %2233 = vmatpush2.bf16.msra.mxu0 %v5132_v9  ;;  %2268 = vmatpush1.bf16.msra.mxu1 %v5030_v36  ;;  %v1354_v57 = vpop.permute.xlu0 %1353  ;;  %v1502_v49 = vsel %vm1491_vm14, %v6021_v37, %v1501_v25  ;;  %v1377_v37 = vrot.slane %v6253_v47, 4 }
 0x13f   : > { %v1372_v8 = vrot.slane %v1354_v57, 4  ;;  %v5135_v13 = vcombine.high %v1494_v31, %v1502_v49  ;;  %v5134_v52 = vcombine.low %v1494_v31, %v1502_v49 }
 0x140   : > { %1367 = vrot.lane.b32.xlu1 %v5846_v0, %s5578_s14  ;;  %384 = vrot.lane.b32.xlu0 %v6073_v3, %s5575_s12  ;;  %v5583_v3 = vmov 0  }
 0x141   : > { %2273 = vmatprep.subr.bf16.mxu1 %v5135_v13  ;;  %v1381_v23 = vsel %vm406_vm6, %v1371_v10, %v1372_v8  ;;  %5541 = vset.pattern.permute.xlu1 %v5583_v3  ;;  %2433 = vst [vmem:[#allocation4] sm:$0xf] %v5583_v3  ;;  %2434 = vst [vmem:[#allocation4 + $0x24] sm:$0xf] %v5583_v3 }
 0x142   : > { %v6328_v17 = vpop.permute.xlu1 %1225  ;;  %2274 = vmatpush2.bf16.msra.mxu1 %v5134_v52  ;;  %v1362_v32 = vpop.permute.xlu0 %1361  ;;  %5542 = vset.pattern.permute.xlu0 %v5583_v3  ;;  %v1383_v48 = vsel %vm1382_vm15, %v6215_v27, %v1381_v23  ;;  %v8702_v23 = vrot.slane %v6292_v39, 4 }
 0x143   : > { %v1376_v51 = vrot.slane %v1362_v32, 4 }
 0x144   : > { %1294 = vrot.lane.b32.xlu1 %v5652_v16, %s5579_s15  ;;  %394 = vrot.lane.b32.xlu0 %v6099_v40, %s5575_s12  ;;  %v1384_v40 = vsel %vm406_vm6, %v1372_v8, %v8704_v26 }
 0x145   : > { %v1390_v33 = vsel %vm406_vm6, %v1376_v51, %v1377_v37  ;;  %v1385_v49 = vsel %vm1382_vm15, %v1354_v57, %v1384_v40  ;;  %v1308_v51 = vrot.slane %v6272_v50, 4  ;;  %v6380_v40 = vpack.c.bf16 %v5808_v29, %v5808_v29 }
 0x146   : > { %v6338_v42 = vpop.permute.xlu1 %1229  ;;  %v1391_v55 = vsel %vm1382_vm15, %v1362_v32, %v1390_v33  ;;  %v6341_v34 = vpop.permute.xlu0 %1365 }
 0x147   : > { %v8703_v36 = vrot.slane %v6341_v34, 4  ;;  %v5125_v9 = vcombine.high %v1383_v48, %v1391_v55  ;;  %v5124_v25 = vcombine.low %v1383_v48, %v1391_v55 }
 0x148   : > { %1304 = vrot.lane.b32.xlu1 %v5846_v0, %s5579_s15  ;;  %1468 = vrot.lane.b32.xlu0 %v8813_v22, %s5576_s13 }
 0x149   : > { %2234 = vmatprep.subr.bf16.mxu0 %v5125_v9  ;;  %v1392_v27 = vsel %vm406_vm6, %v1377_v37, %v8703_v36 }
 0x14a   : > { %v6353_v31 = vpop.permute.xlu1 %1237  ;;  %2235 = vmatpush2.bf16.msra.mxu0 %v5124_v25  ;;  %v1291_v8 = vpop.permute.xlu0 %1290  ;;  %v1393_v13 = vsel %vm1382_vm15, %v6253_v47, %v1392_v27  ;;  %v1314_v47 = vrot.slane %v6312_v38, 4 }
 0x14b   : > { %v1309_v52 = vrot.slane %v1291_v8, 4  ;;  %v5127_v10 = vcombine.high %v1385_v49, %v1393_v13  ;;  %v5126_v32 = vcombine.low %v1385_v49, %v1393_v13 }
 0x14c   : > { %1231 = vrot.lane.b32.xlu1 %v5652_v16, %s5580_s16  ;;  %1478 = vrot.lane.b32.xlu0 %v8813_v22, %s5576_s13 }
 0x14d   : > { %2275 = vmatprep.subr.bf16.mxu1 %v5127_v10  ;;  %v1318_v33 = vsel %vm406_vm6, %v1308_v51, %v1309_v52  ;;  %v1321_v27 = vsel %vm406_vm6, %v1309_v52, %v8702_v23  ;;  %v8818_v23 = vld [vmem:[#allocation5_spill] sm:$0xff] }
 0x14e   : > { %v6366_v37 = vpop.permute.xlu1 %1162  ;;  %2276 = vmatpush2.bf16.msra.mxu1 %v5126_v32  ;;  %v1299_v57 = vpop.permute.xlu0 %1298  ;;  %v1322_v32 = vsel %vm1319_vm0, %v1291_v8, %v1321_v27  ;;  %v8819_v36 = vrot.slane %v8818_v23, 4 }
 0x14f   : > { %v1313_v3 = vrot.slane %v1299_v57, 4 }
 0x150   : > { %1241 = vrot.lane.b32.xlu1 %v5995_v60, %s5580_s16  ;;  %1359 = vrot.lane.b32.xlu0 %v8813_v22, %s5578_s14  ;;  %v1320_v60 = vsel %vm1319_vm0, %v6272_v50, %v1318_v33 }
 0x151   : > { %v1327_v55 = vsel %vm406_vm6, %v1313_v3, %v1314_v47 }
 0x152   : > { %v6376_v48 = vpop.permute.xlu1 %1166  ;;  %v1328_v9 = vsel %vm1319_vm0, %v1299_v57, %v1327_v55  ;;  %v6383_v25 = vpop.permute.xlu0 %1302  ;;  %v1245_v55 = vrot.slane %v6328_v17, 4 }
 0x153   : > { %v8699_v49 = vrot.slane %v6383_v25, 4  ;;  %v5117_v13 = vcombine.high %v1320_v60, %v1328_v9  ;;  %v5116_v10 = vcombine.low %v1320_v60, %v1328_v9  ;;  %v8695_v9 = vrot.slane %v6338_v42, 4 }
 0x154   : > { %1168 = vrot.lane.b32.xlu1 %v5652_v16, %s5581_s17  ;;  %1369 = vrot.lane.b32.xlu0 %v6380_v40, %s5578_s14 }
 0x155   : > { %2236 = vmatprep.subr.bf16.mxu0 %v5117_v13  ;;  %v1329_v50 = vsel %vm406_vm6, %v1314_v47, %v8699_v49 }
 0x156   : > { %v6395_v29 = vpop.permute.xlu1 %1174  ;;  %2237 = vmatpush2.bf16.msra.mxu0 %v5116_v10  ;;  %v1228_v52 = vpop.permute.xlu0 %1227  ;;  %v1330_v51 = vsel %vm1319_vm0, %v6312_v38, %v1329_v50  ;;  %v1251_v38 = vrot.slane %v6353_v31, 4 }
 0x157   : > { %v1246_v57 = vrot.slane %v1228_v52, 4  ;;  %v5119_v3 = vcombine.high %v1322_v32, %v1330_v51  ;;  %v5118_v33 = vcombine.low %v1322_v32, %v1330_v51 }
 0x158   : > { %1178 = vrot.lane.b32.xlu1 %v5846_v0, %s5581_s17  ;;  %1296 = vrot.lane.b32.xlu0 %v8813_v22, %s5579_s15 }
 0x159   : > { %2277 = vmatprep.subr.bf16.mxu1 %v5119_v3  ;;  %v1255_v27 = vsel %vm406_vm6, %v1245_v55, %v1246_v57 }
 0x15a   : > { %v6408_v47 = vpop.permute.xlu1 %1099  ;;  %2278 = vmatpush2.bf16.msra.mxu1 %v5118_v33  ;;  %v1236_v8 = vpop.permute.xlu0 %1235  ;;  %v1257_v51 = vsel %vm1256_vm1, %v6328_v17, %v1255_v27 }
 0x15b   : > { %v1250_v60 = vrot.slane %v1236_v8, 4 }
 0x15c   : > { %1105 = vrot.lane.b32.xlu1 %v5652_v16, %s5582_s18  ;;  %1306 = vrot.lane.b32.xlu0 %v6380_v40, %s5579_s15  ;;  %v1258_v16 = vsel %vm406_vm6, %v1246_v57, %v8695_v9 }
 0x15d   : > { %v1264_v13 = vsel %vm406_vm6, %v1250_v60, %v1251_v38  ;;  %v1259_v60 = vsel %vm1256_vm1, %v1228_v52, %v1258_v16  ;;  %v1188_v16 = vrot.slane %v6395_v29, 4 }
 0x15e   : > { %v6418_v10 = vpop.permute.xlu1 %1103  ;;  %v1265_v50 = vsel %vm1256_vm1, %v1236_v8, %v1264_v13  ;;  %v6421_v32 = vpop.permute.xlu0 %1239  ;;  %v1636_v8 = vld [vmem:[%s8678_s3] sm:$0xff] }
 0x15f   : > { %v8697_v3 = vrot.slane %v6421_v32, 4  ;;  %v5109_v33 = vcombine.high %v1257_v51, %v1265_v50  ;;  %v5108_v55 = vcombine.low %v1257_v51, %v1265_v50 }
 0x160   : > { %1115 = vrot.lane.b32.xlu1 %v5846_v0, %s5582_s18  ;;  %1233 = vrot.lane.b32.xlu0 %v8813_v22, %s5580_s16 }
 0x161   : > { %2238 = vmatprep.subr.bf16.mxu0 %v5109_v33  ;;  %v1266_v57 = vsel %vm406_vm6, %v1251_v38, %v8697_v3  ;;  %v1182_v33 = vrot.slane %v6366_v37, 4  ;;  %v8698_v38 = vrot.slane %v6376_v48, 4 }
 0x162   : > { %v6436_v17 = vpop.permute.xlu1 %1111  ;;  %2239 = vmatpush2.bf16.msra.mxu0 %v5108_v55  ;;  %v1165_v0 = vpop.permute.xlu0 %1164  ;;  %v1267_v27 = vsel %vm1256_vm1, %v6353_v31, %v1266_v57 }
 0x163   : > { %v1183_v13 = vrot.slane %v1165_v0, 4  ;;  %v5111_v50 = vcombine.high %v1259_v60, %v1267_v27  ;;  %v5110_v51 = vcombine.low %v1259_v60, %v1267_v27 }
 0x164   : > { %1639 = vperm.xlu1 %5541, %v1636_v8   ;;  %1243 = vrot.lane.b32.xlu0 %v6055_v28, %s5580_s16 }
 0x165   : > { %2279 = vmatprep.subr.bf16.mxu1 %v5111_v50  ;;  %v1192_v55 = vsel %vm406_vm6, %v1182_v33, %v1183_v13  ;;  %v1195_v50 = vsel %vm406_vm6, %v1183_v13, %v8698_v38 }
 0x166   : > { %v6447_v9 = vpop.permute.xlu1 %1019  ;;  %2280 = vmatpush2.bf16.msra.mxu1 %v5110_v51  ;;  %v1173_v52 = vpop.permute.xlu0 %1172  ;;  %v1194_v27 = vsel %vm8715_vm2, %v6366_v37, %v1192_v55  ;;  %v1196_v37 = vsel %vm8715_vm2, %v1165_v0, %v1195_v50  ;;  %v1125_v0 = vrot.slane %v6436_v17, 4 }
 0x167   : > { %v1187_v31 = vrot.slane %v1173_v52, 4  ;;  %v1036_v49 = vrot.slane %v6447_v9, 4 }
 0x168   : > { %1170 = vrot.lane.b32.xlu0 %v8813_v22, %s5581_s17 }
 0x169   : > { %v1201_v28 = vsel %vm406_vm6, %v1187_v31, %v1188_v16  ;;  %v1048_v26 = vsel %vm406_vm6, %v8819_v36, %v1036_v49 }
 0x16a   : > { %v6455_v8 = vpop.permute.xlu1 %1029  ;;  %v1202_v57 = vsel %vm8715_vm2, %v1173_v52, %v1201_v28  ;;  %v6458_v60 = vpop.permute.xlu0 %1176 }
 0x16b   : > { %v8701_v51 = vrot.slane %v6458_v60, 4  ;;  %v5101_v33 = vcombine.high %v1194_v27, %v1202_v57  ;;  %v5100_v3 = vcombine.low %v1194_v27, %v1202_v57  ;;  %v1041_v28 = vrot.slane %v6455_v8, 4 }
 0x16c   : > { %1180 = vrot.lane.b32.xlu0 %v6380_v40, %s5581_s17 }
 0x16d   : > { %2240 = vmatprep.subr.bf16.mxu0 %v5101_v33  ;;  %v1203_v52 = vsel %vm406_vm6, %v1188_v16, %v8701_v51  ;;  %v1119_v33 = vrot.slane %v6408_v47, 4 }
 0x16e   : > { %v6468_v31 = vpop.permute.xlu1 %932  ;;  %2241 = vmatpush2.bf16.msra.mxu0 %v5100_v3  ;;  %v1102_v55 = vpop.permute.xlu0 %1101  ;;  %v1204_v13 = vsel %vm8715_vm2, %v6395_v29, %v1203_v52  ;;  %v8709_v3 = vrot.slane %v6418_v10, 4 }
 0x16f   : > { %v1120_v57 = vrot.slane %v1102_v55, 4  ;;  %v5103_v27 = vcombine.high %v1196_v37, %v1204_v13  ;;  %v5102_v38 = vcombine.low %v1196_v37, %v1204_v13 }
 0x170   : > { %1107 = vrot.lane.b32.xlu0 %v8813_v22, %s5582_s18  ;;  %v8817_v22 = vrot.slane %v6042_v43, 4 }
 0x171   : > { %2281 = vmatprep.subr.bf16.mxu1 %v5103_v27  ;;  %v1129_v37 = vsel %vm406_vm6, %v1119_v33, %v1120_v57  ;;  %v949_v27 = vrot.slane %v6468_v31, 4  ;;  %v1132_v33 = vsel %vm406_vm6, %v1120_v57, %v8709_v3  ;;  %v8820_v57 = vld [vmem:[#allocation6_spill] sm:$0xff] }
 0x172   : > { %v6481_v16 = vpop.permute.xlu1 %942  ;;  %2282 = vmatpush2.bf16.msra.mxu1 %v5102_v38  ;;  %v1110_v29 = vpop.permute.xlu0 %1109  ;;  %v1056_v13 = vsel %vm406_vm6, %v8817_v22, %v1041_v28 }
 0x173   : > { %v954_v50 = vrot.slane %v6481_v16, 4  ;;  %v1124_v52 = vrot.slane %v1110_v29, 4 }
 0x174   : > { %1117 = vrot.lane.b32.xlu0 %v6380_v40, %s5582_s18  ;;  %v1131_v40 = vsel %vm8714_vm4, %v6408_v47, %v1129_v37 }
 0x175   : > { %v1138_v51 = vsel %vm406_vm6, %v1124_v52, %v1125_v0  ;;  %v1057_v52 = vsel %vm8782_vm3, %v6042_v43, %v1056_v13  ;;  %v969_v36 = vsel %vm406_vm6, %v953_v21, %v954_v50  ;;  %v8821_v21 = vrot.slane %v5925_v12, 4 }
 0x176   : > { %v6496_v38 = vpop.permute.xlu1 %862  ;;  %v1139_v18 = vsel %vm8714_vm4, %v1110_v29, %v1138_v51  ;;  %v6505_v22 = vpop.permute.xlu0 %1113  ;;  %v1049_v51 = vsel %vm8782_vm3, %v8818_v23, %v1048_v26  ;;  %v6521_v29 = vcombine.low %v8820_v57, %v8820_v57  ;;  %v1133_v23 = vsel %vm8714_vm4, %v1102_v55, %v1132_v33 }
 0x177   : > { %v8710_v59 = vrot.slane %v6505_v22, 4  ;;  %v5093_v20 = vcombine.high %v1131_v40, %v1139_v18  ;;  %v5092_v35 = vcombine.low %v1131_v40, %v1139_v18  ;;  %v879_v47 = vrot.slane %v6496_v38, 4 }
 0x178   : > { %v5089_v37 = vcombine.high %v1049_v51, %v1057_v52  ;;  %v961_v26 = vsel %vm406_vm6, %v8821_v21, %v949_v27  ;;  %v970_v57 = vsel %vm8780_vm7, %v6090_v58, %v969_v36  ;;  %v5088_v63 = vcombine.low %v1049_v51, %v1057_v52 }
 0x179   : > { %2242 = vmatprep.subr.bf16.mxu0 %v5093_v20  ;;  %v1140_v18 = vsel %vm406_vm6, %v1125_v0, %v8710_v59  ;;  %v962_v21 = vsel %vm8780_vm7, %v5925_v12, %v961_v26  ;;  %v8822_v55 = vrot.slane %v6092_v4, 4  ;;  %v8823_v33 = vrot.slane %v5866_v5, 4  ;;  %v8824_v26 = vld [vmem:[#allocation7_spill] sm:$0xff] }
 0x17a   : > { %v6524_v43 = vpop.permute.xlu1 %872  ;;  %2243 = vmatpush2.bf16.msra.mxu0 %v5092_v35  ;;  %v1022_v40 = vpop.permute.xlu0 %1021  ;;  %v1141_v20 = vsel %vm8714_vm4, %v6436_v17, %v1140_v18  ;;  %v5081_v58 = vcombine.high %v962_v21, %v970_v57 }
 0x17b   : > { %v884_v13 = vrot.slane %v6524_v43, 4  ;;  %v1037_v3 = vrot.slane %v1022_v40, 4  ;;  %2294 = vmatprep.subr.bf16.mxu0 %v5089_v37  ;;  %v5095_v0 = vcombine.high %v1133_v23, %v1141_v20  ;;  %v5094_v59 = vcombine.low %v1133_v23, %v1141_v20 }
 0x17c   : > { %v891_v52 = vsel %vm406_vm6, %v8823_v33, %v879_v47  ;;  %v5080_v23 = vcombine.low %v962_v21, %v970_v57 }
 0x17d   : > { %v899_v35 = vsel %vm406_vm6, %v8822_v55, %v884_v13  ;;  %2245 = vmatmul.mubr.bf16.vlgmr.msra.gmra.mxu0 %v6521_v29  ;;  %2283 = vmatprep.subr.bf16.mxu1 %v5095_v0  ;;  %v1050_v37 = vsel %vm406_vm6, %v1036_v49, %v1037_v3  ;;  %v892_v40 = vsel %vm887_vm8, %v5866_v5, %v891_v52  ;;  %v8825_v5 = vrot.slane %v5887_v30, 4 }
 0x17e   : > { %v6548_v17 = vpop.permute.xlu1 %799  ;;  %2284 = vmatpush2.bf16.msra.mxu1 %v5094_v59  ;;  %2295 = vmatpush1.bf16.msra.mxu0 %v5088_v63  ;;  %v1032_v36 = vpop.permute.xlu0 %1031  ;;  %v900_v51 = vsel %vm887_vm8, %v6092_v4, %v899_v35  ;;  %v1051_v20 = vsel %vm8782_vm3, %v6447_v9, %v1050_v37 }
 0x17f   : > { %v816_v12 = vrot.slane %v6548_v17, 4  ;;  %v1042_v18 = vrot.slane %v1032_v36, 4  ;;  %2296 = vmatprep.subr.bf16.mxu0 %v5081_v58  ;;  %5142 = vmatprep.mubr.msk.bf16.mxu0 %vm8781_vm5, %v8824_v26  ;;  %v5073_v4 = vcombine.high %v892_v40, %v900_v51  ;;  %v5072_v35 = vcombine.low %v892_v40, %v900_v51 }
 0x181   : > { %v1058_v59 = vsel %vm406_vm6, %v1041_v28, %v1042_v18  ;;  %2286 = vmatmul.mubr.bf16.vlgmr.msra.gmra.mxu1 %v6521_v29  ;;  %v828_v28 = vsel %vm406_vm6, %v8825_v5, %v816_v12 }
 0x182   : > { %v6567_v63 = vpop.permute.xlu1 %809  ;;  %2297 = vmatpush1.bf16.msra.mxu0 %v5080_v23  ;;  %v935_v3 = vpop.permute.xlu0 %934  ;;  %v1059_v57 = vsel %vm8782_vm3, %v6455_v8, %v1058_v59  ;;  %5143 = vmatprep.mubr.msk.bf16.mxu1 %vm8781_vm5, %v8824_v26  ;;  %v829_v58 = vsel %vm824_vm9, %v5887_v30, %v828_v28 }
 0x183   : > { %v821_v49 = vrot.slane %v6567_v63, 4  ;;  %v950_v0 = vrot.slane %v935_v3, 4  ;;  %2298 = vmatprep.subr.bf16.mxu0 %v5073_v4  ;;  %v5090_v21 = vcombine.low %v1051_v20, %v1059_v57  ;;  %v5091_v55 = vcombine.high %v1051_v20, %v1059_v57 }
 0x185   : > { %v836_v9 = vsel %vm406_vm6, %v820_v62, %v821_v49  ;;  %2335 = vmatprep.subr.bf16.mxu1 %v5091_v55  ;;  %v963_v62 = vsel %vm406_vm6, %v949_v27, %v950_v0 }
 0x186   : > { %v6586_v8 = vpop.permute.xlu1 %654  ;;  %v837_v33 = vsel %vm824_vm9, %v6138_v45, %v836_v9  ;;  %2299 = vmatpush1.bf16.msra.mxu0 %v5072_v35  ;;  %2336 = vmatpush1.bf16.msra.mxu1 %v5090_v21  ;;  %v945_v36 = vpop.permute.xlu0 %944  ;;  %v964_v40 = vsel %vm8780_vm7, %v6468_v31, %v963_v62 }
 0x187   : > { %v671_v52 = vrot.slane %v6586_v8, 4  ;;  %v5064_v51 = vcombine.low %v829_v58, %v837_v33  ;;  %v5065_v37 = vcombine.high %v829_v58, %v837_v33  ;;  %v955_v18 = vrot.slane %v945_v36, 4 }
 0x189   : > { %2300 = vmatprep.subr.bf16.mxu0 %v5065_v37  ;;  %v971_v30 = vsel %vm406_vm6, %v954_v50, %v955_v18  ;;  %v683_v27 = vsel %vm406_vm6, %v670_v46, %v671_v52 }
 0x18a   : > { %v6599_v26 = vpop.permute.xlu1 %664  ;;  %2301 = vmatpush1.bf16.msra.mxu0 %v5064_v51  ;;  %v865_v23 = vpop.permute.xlu0 %864  ;;  %v972_v59 = vsel %vm8780_vm7, %v6481_v16, %v971_v30  ;;  %v684_v16 = vsel %vm8795_vm10, %v5907_v53, %v683_v27 }
 0x18b   : > { %v676_v45 = vrot.slane %v6599_v26, 4  ;;  %v880_v4 = vrot.slane %v865_v23, 4  ;;  %v5082_v50 = vcombine.low %v964_v40, %v972_v59  ;;  %v5083_v3 = vcombine.high %v964_v40, %v972_v59 }
 0x18d   : > { %v691_v20 = vsel %vm406_vm6, %v675_v1, %v676_v45  ;;  %2337 = vmatprep.subr.bf16.mxu1 %v5083_v3  ;;  %v893_v21 = vsel %vm406_vm6, %v879_v47, %v880_v4 }
 0x18e   : > { %v6616_v31 = vpop.permute.xlu1 %591  ;;  %v692_v57 = vsel %vm8795_vm10, %v6167_v11, %v691_v20  ;;  %2338 = vmatpush1.bf16.msra.mxu1 %v5082_v50  ;;  %v875_v5 = vpop.permute.xlu0 %874  ;;  %v894_v9 = vsel %vm887_vm8, %v6496_v38, %v893_v21  ;;  %v8826_v20 = vrot.slane %v6242_v44, 4 }
 0x18f   : > { %v608_v46 = vrot.slane %v6616_v31, 4  ;;  %v5056_v28 = vcombine.low %v684_v16, %v692_v57  ;;  %v5057_v0 = vcombine.high %v684_v16, %v692_v57  ;;  %v885_v1 = vrot.slane %v875_v5, 4 }
 0x191   : > { %2302 = vmatprep.subr.bf16.mxu0 %v5057_v0  ;;  %v901_v55 = vsel %vm406_vm6, %v884_v13, %v885_v1  ;;  %v620_v47 = vsel %vm406_vm6, %v607_v15, %v608_v46 }
 0x192   : > { %v6629_v53 = vpop.permute.xlu1 %601  ;;  %2303 = vmatpush1.bf16.msra.mxu0 %v5056_v28  ;;  %v802_v35 = vpop.permute.xlu0 %801  ;;  %v902_v58 = vsel %vm887_vm8, %v6524_v43, %v901_v55  ;;  %v621_v43 = vsel %vm8791_vm11, %v5935_v54, %v620_v47 }
 0x193   : > { %v613_v11 = vrot.slane %v6629_v53, 4  ;;  %v817_v33 = vrot.slane %v802_v35, 4  ;;  %v5074_v13 = vcombine.low %v894_v9, %v902_v58  ;;  %v5075_v36 = vcombine.high %v894_v9, %v902_v58 }
 0x195   : > { %v628_v51 = vsel %vm406_vm6, %v612_v6, %v613_v11  ;;  %2339 = vmatprep.subr.bf16.mxu1 %v5075_v36  ;;  %v830_v23 = vsel %vm406_vm6, %v816_v12, %v817_v33  ;;  %v8828_v36 = vrot.slane %v6282_v61, 4 }
 0x196   : > { %v6646_v38 = vpop.permute.xlu1 %528  ;;  %v629_v37 = vsel %vm8791_vm11, %v6199_v56, %v628_v51  ;;  %2340 = vmatpush1.bf16.msra.mxu1 %v5074_v13  ;;  %v812_v62 = vpop.permute.xlu0 %811  ;;  %v831_v27 = vsel %vm824_vm9, %v6548_v17, %v830_v23 }
 0x197   : > { %v545_v15 = vrot.slane %v6646_v38, 4  ;;  %v5048_v18 = vcombine.low %v621_v43, %v629_v37  ;;  %v5049_v30 = vcombine.high %v621_v43, %v629_v37  ;;  %v822_v6 = vrot.slane %v812_v62, 4 }
 0x199   : > { %2304 = vmatprep.subr.bf16.mxu0 %v5049_v30  ;;  %v838_v40 = vsel %vm406_vm6, %v821_v49, %v822_v6  ;;  %v557_v12 = vsel %vm406_vm6, %v544_v2, %v545_v15 }
 0x19a   : > { %v6659_v54 = vpop.permute.xlu1 %538  ;;  %2305 = vmatpush1.bf16.msra.mxu0 %v5048_v18  ;;  %v657_v59 = vpop.permute.xlu0 %656  ;;  %v839_v4 = vsel %vm824_vm9, %v6567_v63, %v838_v40  ;;  %v558_v63 = vsel %vm553_vm12, %v5956_v7, %v557_v12 }
 0x19b   : > { %v550_v56 = vrot.slane %v6659_v54, 4  ;;  %v672_v50 = vrot.slane %v657_v59, 4  ;;  %v5066_v49 = vcombine.low %v831_v27, %v839_v4  ;;  %v5067_v3 = vcombine.high %v831_v27, %v839_v4 }
 0x19d   : > { %v565_v16 = vsel %vm406_vm6, %v8826_v20, %v550_v56  ;;  %2341 = vmatprep.subr.bf16.mxu1 %v5067_v3  ;;  %v685_v21 = vsel %vm406_vm6, %v671_v52, %v672_v50  ;;  %v8827_v52 = vrot.slane %v5975_v19, 4  ;;  %v8830_v3 = vrot.slane %v6299_v14, 4 }
 0x19e   : > { %v6676_v17 = vpop.permute.xlu1 %382  ;;  %v566_v57 = vsel %vm553_vm12, %v6242_v44, %v565_v16  ;;  %2342 = vmatpush1.bf16.msra.mxu1 %v5066_v49  ;;  %v667_v5 = vpop.permute.xlu0 %666  ;;  %v686_v9 = vsel %vm8795_vm10, %v6586_v8, %v685_v21 }
 0x19f   : > { %v399_v2 = vrot.slane %v6676_v17, 4  ;;  %v5040_v28 = vcombine.low %v558_v63, %v566_v57  ;;  %v5041_v0 = vcombine.high %v558_v63, %v566_v57  ;;  %v677_v1 = vrot.slane %v667_v5, 4 }
 0x1a1   : > { %2306 = vmatprep.subr.bf16.mxu0 %v5041_v0  ;;  %v693_v55 = vsel %vm406_vm6, %v676_v45, %v677_v1  ;;  %v412_v47 = vsel %vm406_vm6, %v8827_v52, %v399_v2 }
 0x1a2   : > { %v6689_v7 = vpop.permute.xlu1 %392  ;;  %2307 = vmatpush1.bf16.msra.mxu0 %v5040_v28  ;;  %v594_v35 = vpop.permute.xlu0 %593  ;;  %v694_v58 = vsel %vm8795_vm10, %v6599_v26, %v693_v55  ;;  %v413_v26 = vsel %vm8713_vm13, %v5975_v19, %v412_v47 }
 0x1a3   : > { %v404_v44 = vrot.slane %v6689_v7, 4  ;;  %v609_v33 = vrot.slane %v594_v35, 4  ;;  %v5058_v45 = vcombine.low %v686_v9, %v694_v58  ;;  %v5059_v13 = vcombine.high %v686_v9, %v694_v58 }
 0x1a5   : > { %v420_v51 = vsel %vm406_vm6, %v8828_v36, %v404_v44  ;;  %2343 = vmatprep.subr.bf16.mxu1 %v5059_v13  ;;  %v622_v23 = vsel %vm406_vm6, %v608_v46, %v609_v33  ;;  %v8829_v46 = vrot.slane %v5997_v24, 4  ;;  %v8832_v33 = vrot.slane %v6341_v34, 4 }
 0x1a6   : > { %v6706_v8 = vpop.permute.xlu1 %1466  ;;  %v421_v43 = vsel %vm8713_vm13, %v6282_v61, %v420_v51  ;;  %2344 = vmatpush1.bf16.msra.mxu1 %v5058_v45  ;;  %v604_v62 = vpop.permute.xlu0 %603  ;;  %v623_v27 = vsel %vm8791_vm11, %v6616_v31, %v622_v23 }
 0x1a7   : > { %v1483_v37 = vrot.slane %v6706_v8, 4  ;;  %v5032_v18 = vcombine.low %v413_v26, %v421_v43  ;;  %v5033_v30 = vcombine.high %v413_v26, %v421_v43  ;;  %v614_v6 = vrot.slane %v604_v62, 4 }
 0x1a9   : > { %2308 = vmatprep.subr.bf16.mxu0 %v5033_v30  ;;  %v630_v40 = vsel %vm406_vm6, %v613_v11, %v614_v6  ;;  %v1495_v12 = vsel %vm406_vm6, %v8829_v46, %v1483_v37  ;;  %v8834_v46 = vrot.slane %v6383_v25, 4 }
 0x1aa   : > { %v6719_v19 = vpop.permute.xlu1 %1476  ;;  %2309 = vmatpush1.bf16.msra.mxu0 %v5032_v18  ;;  %v531_v59 = vpop.permute.xlu0 %530  ;;  %v631_v4 = vsel %vm8791_vm11, %v6629_v53, %v630_v40  ;;  %v1496_v53 = vsel %vm1491_vm14, %v5997_v24, %v1495_v12 }
 0x1ab   : > { %v1488_v61 = vrot.slane %v6719_v19, 4  ;;  %v546_v50 = vrot.slane %v531_v59, 4  ;;  %v5050_v11 = vcombine.low %v623_v27, %v631_v4  ;;  %v5051_v49 = vcombine.high %v623_v27, %v631_v4 }
 0x1ad   : > { %v1503_v20 = vsel %vm406_vm6, %v8830_v3, %v1488_v61  ;;  %2345 = vmatprep.subr.bf16.mxu1 %v5051_v49  ;;  %v559_v0 = vsel %vm406_vm6, %v545_v15, %v546_v50  ;;  %v8831_v15 = vrot.slane %v6234_v41, 4 }
 0x1ae   : > { %v6736_v31 = vpop.permute.xlu1 %1357  ;;  %v1504_v16 = vsel %vm1491_vm14, %v6299_v14, %v1503_v20  ;;  %2346 = vmatpush1.bf16.msra.mxu1 %v5050_v11  ;;  %v541_v57 = vpop.permute.xlu0 %540  ;;  %v560_v35 = vsel %vm553_vm12, %v6646_v38, %v559_v0 }
 0x1af   : > { %v1374_v63 = vrot.slane %v6736_v31, 4  ;;  %v5136_v5 = vcombine.low %v1496_v53, %v1504_v16  ;;  %v5137_v28 = vcombine.high %v1496_v53, %v1504_v16  ;;  %v551_v21 = vrot.slane %v541_v57, 4 }
 0x1b1   : > { %2314 = vmatprep.subr.bf16.mxu0 %v5137_v28  ;;  %v567_v1 = vsel %vm406_vm6, %v550_v56, %v551_v21  ;;  %v1386_v58 = vsel %vm406_vm6, %v8831_v15, %v1374_v63 }
 0x1b2   : > { %v6749_v24 = vpop.permute.xlu1 %1367  ;;  %2315 = vmatpush2.bf16.msra.mxu0 %v5136_v5  ;;  %v385_v55 = vpop.permute.xlu0 %384  ;;  %v568_v9 = vsel %vm553_vm12, %v6659_v54, %v567_v1  ;;  %v1387_v54 = vsel %vm1382_vm15, %v6234_v41, %v1386_v58 }
 0x1b3   : > { %v1379_v14 = vrot.slane %v6749_v24, 4  ;;  %v400_v52 = vrot.slane %v385_v55, 4  ;;  %v5042_v56 = vcombine.low %v560_v35, %v568_v9  ;;  %v5043_v47 = vcombine.high %v560_v35, %v568_v9 }
 0x1b4   : > { %v8836_v35 = vrot.slane %v6421_v32, 4 }
 0x1b5   : > { %v1394_v45 = vsel %vm406_vm6, %v8832_v33, %v1379_v14  ;;  %2347 = vmatprep.subr.bf16.mxu1 %v5043_v47  ;;  %v414_v62 = vsel %vm406_vm6, %v399_v2, %v400_v52  ;;  %v8833_v2 = vrot.slane %v6292_v39, 4 }
 0x1b6   : > { %v6766_v38 = vpop.permute.xlu1 %1294  ;;  %v1395_v13 = vsel %vm1382_vm15, %v6341_v34, %v1394_v45  ;;  %2348 = vmatpush1.bf16.msra.mxu1 %v5042_v56  ;;  %v395_v51 = vpop.permute.xlu0 %394  ;;  %v415_v6 = vsel %vm8713_vm13, %v6676_v17, %v414_v62 }
 0x1b7   : > { %v1311_v36 = vrot.slane %v6766_v38, 4  ;;  %v5128_v26 = vcombine.low %v1387_v54, %v1395_v13  ;;  %v5129_v43 = vcombine.high %v1387_v54, %v1395_v13  ;;  %v405_v18 = vrot.slane %v395_v51, 4 }
 0x1b9   : > { %2316 = vmatprep.subr.bf16.mxu0 %v5129_v43  ;;  %v422_v30 = vsel %vm406_vm6, %v404_v44, %v405_v18  ;;  %v1323_v59 = vsel %vm406_vm6, %v8833_v2, %v1311_v36 }
 0x1ba   : > { %v6779_v41 = vpop.permute.xlu1 %1304  ;;  %2317 = vmatpush2.bf16.msra.mxu0 %v5128_v26  ;;  %v1469_v23 = vpop.permute.xlu0 %1468  ;;  %v423_v40 = vsel %vm8713_vm13, %v6689_v7, %v422_v30  ;;  %v1324_v7 = vsel %vm1319_vm0, %v6292_v39, %v1323_v59  ;;  %v8838_v30 = vrot.slane %v6458_v60, 4  ;;  %vm3218_vm13 = vcmask 973824  }
 0x1bb   : > { %v1316_v34 = vrot.slane %v6779_v41, 4  ;;  %v1484_v27 = vrot.slane %v1469_v23, 4  ;;  %v5034_v44 = vcombine.low %v415_v6, %v423_v40  ;;  %v5035_v4 = vcombine.high %v415_v6, %v423_v40 }
 0x1bd   : > { %v1331_v12 = vsel %vm406_vm6, %v8834_v46, %v1316_v34  ;;  %2349 = vmatprep.subr.bf16.mxu1 %v5035_v4  ;;  %v1497_v53 = vsel %vm406_vm6, %v1483_v37, %v1484_v27  ;;  %v8835_v37 = vrot.slane %v6338_v42, 4 }
 0x1be   : > { %v6796_v17 = vpop.permute.xlu1 %1231  ;;  %v1332_v50 = vsel %vm1319_vm0, %v6383_v25, %v1331_v12  ;;  %2350 = vmatpush1.bf16.msra.mxu1 %v5034_v44  ;;  %v1479_v49 = vpop.permute.xlu0 %1478  ;;  %v1498_v28 = vsel %vm1491_vm14, %v6706_v8, %v1497_v53 }
 0x1bf   : > { %v1248_v11 = vrot.slane %v6796_v17, 4  ;;  %v5120_v3 = vcombine.low %v1324_v7, %v1332_v50  ;;  %v5121_v20 = vcombine.high %v1324_v7, %v1332_v50  ;;  %v1489_v16 = vrot.slane %v1479_v49, 4 }
 0x1c0   : > { %v8839_v49 = vrot.slane %v6418_v10, 4 }
 0x1c1   : > { %2318 = vmatprep.subr.bf16.mxu0 %v5121_v20  ;;  %v1505_v57 = vsel %vm406_vm6, %v1488_v61, %v1489_v16  ;;  %v1260_v21 = vsel %vm406_vm6, %v8835_v37, %v1248_v11  ;;  %v8840_v16 = vrot.slane %v6505_v22, 4 }
 0x1c2   : > { %v6809_v39 = vpop.permute.xlu1 %1241  ;;  %2319 = vmatpush2.bf16.msra.mxu0 %v5120_v3  ;;  %v1360_v5 = vpop.permute.xlu0 %1359  ;;  %v1506_v0 = vsel %vm1491_vm14, %v6719_v19, %v1505_v57  ;;  %v1261_v19 = vsel %vm1256_vm1, %v6338_v42, %v1260_v21 }
 0x1c3   : > { %v1253_v25 = vrot.slane %v6809_v39, 4  ;;  %v1375_v1 = vrot.slane %v1360_v5, 4  ;;  %v5138_v61 = vcombine.low %v1498_v28, %v1506_v0  ;;  %v5139_v55 = vcombine.high %v1498_v28, %v1506_v0 }
 0x1c5   : > { %v1268_v9 = vsel %vm406_vm6, %v8836_v35, %v1253_v25  ;;  %2355 = vmatprep.subr.bf16.mxu1 %v5139_v55  ;;  %v1388_v33 = vsel %vm406_vm6, %v1374_v63, %v1375_v1  ;;  %v8837_v63 = vrot.slane %v6376_v48, 4 }
 0x1c6   : > { %v6826_v8 = vpop.permute.xlu1 %1168  ;;  %v1269_v15 = vsel %vm1256_vm1, %v6421_v32, %v1268_v9  ;;  %2356 = vmatpush2.bf16.msra.mxu1 %v5138_v61  ;;  %v1370_v52 = vpop.permute.xlu0 %1369  ;;  %v1389_v51 = vsel %vm1382_vm15, %v6736_v31, %v1388_v33 }
 0x1c7   : > { %v1185_v58 = vrot.slane %v6826_v8, 4  ;;  %v5112_v56 = vcombine.low %v1261_v19, %v1269_v15  ;;  %v5113_v47 = vcombine.high %v1261_v19, %v1269_v15  ;;  %v1380_v45 = vrot.slane %v1370_v52, 4 }
 0x1c9   : > { %2320 = vmatprep.subr.bf16.mxu0 %v5113_v47  ;;  %v1396_v54 = vsel %vm406_vm6, %v1379_v14, %v1380_v45  ;;  %v1197_v43 = vsel %vm406_vm6, %v8837_v63, %v1185_v58 }
 0x1ca   : > { %v6839_v42 = vpop.permute.xlu1 %1178  ;;  %2321 = vmatpush2.bf16.msra.mxu0 %v5112_v56  ;;  %v1297_v13 = vpop.permute.xlu0 %1296  ;;  %v1397_v26 = vsel %vm1382_vm15, %v6749_v24, %v1396_v54  ;;  %v1198_v31 = vsel %vm8715_vm2, %v6376_v48, %v1197_v43 }
 0x1cb   : > { %v1190_v32 = vrot.slane %v6839_v42, 4  ;;  %v1312_v62 = vrot.slane %v1297_v13, 4  ;;  %v5130_v14 = vcombine.low %v1389_v51, %v1397_v26  ;;  %v5131_v18 = vcombine.high %v1389_v51, %v1397_v26 }
 0x1cd   : > { %v1205_v23 = vsel %vm406_vm6, %v8838_v30, %v1190_v32  ;;  %2357 = vmatprep.subr.bf16.mxu1 %v5131_v18  ;;  %v1325_v44 = vsel %vm406_vm6, %v1311_v36, %v1312_v62  ;;  %v6910_v62 = vld [vmem:[%s8676_s1] sm:$0xff] }
 0x1ce   : > { %v1106_v6 = vpop.permute.xlu1 %1105  ;;  %v1206_v24 = vsel %vm8715_vm2, %v6458_v60, %v1205_v23  ;;  %2358 = vmatpush2.bf16.msra.mxu1 %v5130_v14  ;;  %v1307_v2 = vpop.permute.xlu0 %1306  ;;  %v1326_v60 = vsel %vm1319_vm0, %v6766_v38, %v1325_v44 }
 0x1cf   : > { %v1122_v40 = vrot.slane %v1106_v6, 4  ;;  %v5104_v59 = vcombine.low %v1198_v31, %v1206_v24  ;;  %v5105_v27 = vcombine.high %v1198_v31, %v1206_v24  ;;  %v1317_v4 = vrot.slane %v1307_v2, 4 }
 0x1d1   : > { %2322 = vmatprep.subr.bf16.mxu0 %v5105_v27  ;;  %v1333_v46 = vsel %vm406_vm6, %v1316_v34, %v1317_v4  ;;  %v1134_v36 = vsel %vm406_vm6, %v8839_v49, %v1122_v40 }
 0x1d2   : > { %v1116_v12 = vpop.permute.xlu1 %1115  ;;  %2323 = vmatpush2.bf16.msra.mxu0 %v5104_v59  ;;  %v1234_v7 = vpop.permute.xlu0 %1233  ;;  %v1334_v50 = vsel %vm1319_vm0, %v6779_v41, %v1333_v46  ;;  %v1135_v57 = vsel %vm8714_vm4, %v6418_v10, %v1134_v36 }
 0x1d3   : > { %v1127_v48 = vrot.slane %v1116_v12, 4  ;;  %v1249_v3 = vrot.slane %v1234_v7, 4  ;;  %v5122_v20 = vcombine.low %v1326_v60, %v1334_v50  ;;  %v5123_v53 = vcombine.high %v1326_v60, %v1334_v50 }
 0x1d5   : > { %v1142_v34 = vsel %vm406_vm6, %v8840_v16, %v1127_v48  ;;  %2359 = vmatprep.subr.bf16.mxu1 %v5123_v53  ;;  %v1262_v0 = vsel %vm406_vm6, %v1248_v11, %v1249_v3 }
 0x1d6   : > { %v1143_v38 = vsel %vm8714_vm4, %v6505_v22, %v1142_v34  ;;  %2360 = vmatpush2.bf16.msra.mxu1 %v5122_v20  ;;  %v1244_v41 = vpop.permute.xlu0 %1243  ;;  %v1263_v10 = vsel %vm1256_vm1, %v6796_v17, %v1262_v0 }
 0x1d7   : > { %v5096_v5 = vcombine.low %v1135_v57, %v1143_v38  ;;  %v5097_v28 = vcombine.high %v1135_v57, %v1143_v38  ;;  %v1254_v37 = vrot.slane %v1244_v41, 4 }
 0x1d9   : > { %2324 = vmatprep.subr.bf16.mxu0 %v5097_v28  ;;  %v1270_v21 = vsel %vm406_vm6, %v1253_v25, %v1254_v37 }
 0x1da   : > { %2325 = vmatpush2.bf16.msra.mxu0 %v5096_v5  ;;  %v1171_v1 = vpop.permute.xlu0 %1170  ;;  %v1271_v22 = vsel %vm1256_vm1, %v6809_v39, %v1270_v21 }
 0x1db   : > { %v1186_v61 = vrot.slane %v1171_v1, 4  ;;  %v5114_v55 = vcombine.low %v1263_v10, %v1271_v22  ;;  %v5115_v35 = vcombine.high %v1263_v10, %v1271_v22 }
 0x1dd   : > { %2327 = vmatmul.mubr.bf16.vlgmr.msra.gmra.mxu0 %v6521_v29  ;;  %2361 = vmatprep.subr.bf16.mxu1 %v5115_v35  ;;  %v1199_v25 = vsel %vm406_vm6, %v1185_v58, %v1186_v61 }
 0x1de   : > { %2362 = vmatpush2.bf16.msra.mxu1 %v5114_v55  ;;  %v1181_v11 = vpop.permute.xlu0 %1180  ;;  %v1200_v17 = vsel %vm8715_vm2, %v6826_v8, %v1199_v25 }
 0x1df   : > { %v1191_v9 = vrot.slane %v1181_v11, 4  ;;  %v6905_v43 = vpop.permute.xlu1 %1639 }
 0x1e1   : > { %v1207_v19 = vsel %vm406_vm6, %v1190_v32, %v1191_v9 }
 0x1e2   : > { %v1108_v15 = vpop.permute.xlu0 %1107  ;;  %v1208_v39 = vsel %vm8715_vm2, %v6839_v42, %v1207_v19  ;;  %v2385_v42 = vlaneseq }
 0x1e3   : > { %v1123_v52 = vrot.slane %v1108_v15, 4  ;;  %v5106_v56 = vcombine.low %v1200_v17, %v1208_v39  ;;  %v5107_v47 = vcombine.high %v1200_v17, %v1208_v39 }
 0x1e4   : > { %v6902_v26 = vshrl.u32 %v2385_v42, 7 }
 0x1e5   : > { %2363 = vmatprep.subr.bf16.mxu1 %v5107_v47  ;;  %v1136_v45 = vsel %vm406_vm6, %v1122_v40, %v1123_v52 }
 0x1e6   : > { %2364 = vmatpush2.bf16.msra.mxu1 %v5106_v56  ;;  %v1118_v33 = vpop.permute.xlu0 %1117  ;;  %v1137_v32 = vsel %vm8714_vm4, %v1106_v6, %v1136_v45  ;;  %v2387_v63 = vsub.s32 0, %v6902_v26  ;;  %v2391_v14 = vsub.s32 1, %v6902_v26  ;;  %v2399_v2 = vsub.s32 3, %v6902_v26 }
 0x1e7   : > { %v1128_v54 = vrot.slane %v1118_v33, 4  ;;  %v2403_v1 = vsub.s32 4, %v6902_v26  ;;  %v2407_v10 = vsub.s32 5, %v6902_v26  ;;  %v2411_v45 = vsub.s32 6, %v6902_v26 }
 0x1e8   : > { %v6915_v23 = vrot.slane %v6910_v62, %v2387_v63  ;;  %v6920_v40 = vrot.slane %v6910_v62, %v2391_v14  ;;  %v6931_v36 = vrot.slane %v6910_v62, %v2399_v2 }
 0x1e9   : > { %v1144_v58 = vsel %vm406_vm6, %v1127_v48, %v1128_v54  ;;  %v7025_v11 = vrot.slane %v6910_v62, %v2403_v1  ;;  %v7029_v9 = vrot.slane %v6910_v62, %v2407_v10  ;;  %v2415_v54 = vsub.s32 7, %v6902_v26 }
 0x1ea   : > { %v1145_v13 = vsel %vm8714_vm4, %v1116_v12, %v1144_v58  ;;  %8841 = vst [vmem:[#allocation5_spill] sm:$0xff] %v6915_v23  ;;  %8842 = vst [vmem:[#allocation6_spill] sm:$0xff] %v6920_v40  ;;  %vm8861_vm4 = vcmask 408576  }
 0x1eb   : > { %v5098_v51 = vcombine.low %v1137_v32, %v1145_v13  ;;  %v5099_v8 = vcombine.high %v1137_v32, %v1145_v13  ;;  %8844 = vst [vmem:[#allocation8_spill] sm:$0xff] %v6931_v36  ;;  %8845 = vst [vmem:[#allocation9_spill] sm:$0xff] %v7025_v11  ;;  %v7059_v13 = vrot.slane %v6910_v62, %v2411_v45 }
 0x1ec   : > { %8846 = vst [vmem:[#allocation10_spill] sm:$0xff] %v7029_v9  ;;  %vm8862_vm2 = vmmov %vm8861_vm4 }
 0x1ed   : > { %2365 = vmatprep.subr.bf16.mxu1 %v5099_v8  ;;  %8847 = vst [vmem:[#allocation11_spill] sm:$0xff] %v7059_v13 }
 0x1ee   : > { %2366 = vmatpush2.bf16.msra.mxu1 %v5098_v51 }
 0x1f1   : > { %2368 = vmatmul.mubr.bf16.vlgmr.msra.gmra.mxu1 %v6521_v29  ;;  %v2395_v29 = vsub.s32 2, %v6902_v26  ;;  %v7065_v26 = vrot.slane %v6910_v62, %v2415_v54 }
 0x1f3   : > { %v6926_v12 = vrot.slane %v6910_v62, %v2395_v29  ;;  %8848 = vst [vmem:[#allocation12_spill] sm:$0xff] %v7065_v26 }
 0x1f5   : > { %8843 = vst [vmem:[#allocation7_spill] sm:$0xff] %v6926_v12 }
 0x23d   : > { %v2246_v18 = vpop.f32.mrf.mxu0 }
 0x23e   : > { %v2247_v30 = vadd.f32 %v2246_v18, %v6905_v43 }
 0x23f   : > { %v2248_v6 = vpop.f32.mrf.mxu0 }
 0x240   : > { %v2249_v31 = vadd.f32 %v2248_v6, %v6905_v43  ;;  %v2376_v24 = vmax.f32 %v2247_v30, 0.0 }
 0x241   : > { %v2287_v59 = vpop.f32.mrf.mxu1  ;;  %v2250_v27 = vpop.f32.mrf.mxu0 }
 0x242   : > { %v2377_v44 = vmax.f32 %v2249_v31, 0.0  ;;  %v2425_v4 = vmul.f32 %v6915_v23, %v2376_v24  ;;  %v2288_v46 = vadd.f32 %v2287_v59, %v6905_v43 }
 0x243   : > { %v2289_v48 = vpop.f32.mrf.mxu1  ;;  %v2251_v7 = vpop.f32.mrf.mxu0 }
 0x244   : > { %v2426_v60 = vmul.f32 %v6920_v40, %v2377_v44  ;;  %v2378_v50 = vmax.f32 %v2288_v46, 0.0  ;;  %v2290_v49 = vadd.f32 %v2289_v48, %v6905_v43 }
 0x245   : > { %v2291_v3 = vpop.f32.mrf.mxu1 }
 0x246   : > { %v5430_v20 = vpack.c.bf16 %v2426_v60, %v2425_v4  ;;  %v2427_v53 = vmul.f32 %v6926_v12, %v2378_v50  ;;  %v2379_v16 = vmax.f32 %v2290_v49, 0.0 }
 0x247   : > { %v2292_v34 = vpop.f32.mrf.mxu1 }
 0x248   : > { %2467 = vst [vmem:[#allocation4 + $0x4] sm:$0xff] %v5430_v20  ;;  %v2428_v57 = vmul.f32 %v6931_v36, %v2379_v16 }
 0x24a   : > { %v5431_v38 = vpack.c.bf16 %v2428_v57, %v2427_v53 }
 0x24c   : > { %2468 = vst [vmem:[#allocation4 + $0xc] sm:$0xff] %v5431_v38 }
 0x24f   : > { %v2471_v41 = vld [vmem:[#allocation4] sm:$0xff] }
 0x250   : > { %v6935_v5 = vcombine.high %v2471_v41, %v2471_v41  ;;  %v6947_v21 = vcombine.low %v2471_v41, %v2471_v41 }
 0x252   : > { %2501 = vrot.lane.b32.xlu0 %v6935_v5, %s5567_s28 }
 0x253   : > { %v2472_v28 = vld [vmem:[#allocation4 + $0x8] sm:$0xff] }
 0x254   : > { %v6939_v0 = vcombine.low %v2472_v28, %v2472_v28  ;;  %v6941_v37 = vcombine.high %v2472_v28, %v2472_v28 }
 0x256   : > { %2505 = vrot.lane.b32.xlu0 %v6941_v37, %s5567_s28  ;;  %2503 = vrot.lane.b32.xlu1 %v6939_v0, %s5567_s28 }
 0x25a   : > { %2499 = vrot.lane.b32.xlu0 %v6947_v21, %s5567_s28  ;;  %2920 = vrot.lane.b32.xlu1 %v6947_v21, %s5568_s29 }
 0x25e   : > { %2922 = vrot.lane.b32.xlu0 %v6935_v5, %s5568_s29  ;;  %2924 = vrot.lane.b32.xlu1 %v6939_v0, %s5568_s29 }
 0x262   : > { %2926 = vrot.lane.b32.xlu0 %v6941_v37, %s5568_s29  ;;  %2654 = vrot.lane.b32.xlu1 %v6935_v5, %s5566_s27 }
 0x266   : > { %2652 = vrot.lane.b32.xlu0 %v6947_v21, %s5566_s27  ;;  %2658 = vrot.lane.b32.xlu1 %v6941_v37, %s5566_s27 }
 0x26a   : > { %2656 = vrot.lane.b32.xlu0 %v6939_v0, %s5566_s27  ;;  %3202 = vrot.lane.b32.xlu1 %v6939_v0, %s5584_s20 }
 0x26e   : > { %3204 = vrot.lane.b32.xlu0 %v6941_v37, %s5584_s20  ;;  %3200 = vrot.lane.b32.xlu1 %v6935_v5, %s5584_s20 }
 0x272   : > { %3917 = vrot.lane.b32.xlu0 %v6935_v5, %s5576_s13  ;;  %3919 = vrot.lane.b32.xlu1 %v6939_v0, %s5576_s13 }
 0x276   : > { %3921 = vrot.lane.b32.xlu0 %v6941_v37, %s5576_s13  ;;  %3794 = vrot.lane.b32.xlu1 %v6939_v0, %s5578_s14 }
 0x27a   : > { %3796 = vrot.lane.b32.xlu0 %v6941_v37, %s5578_s14  ;;  %3820 = vrot.lane.b32.xlu1 %v6939_v0, %s5585_s24 }
 0x27e   : > { %3822 = vrot.lane.b32.xlu0 %v6941_v37, %s5585_s24  ;;  %3792 = vrot.lane.b32.xlu1 %v6935_v5, %s5578_s14 }
 0x282   : > { %3818 = vrot.lane.b32.xlu0 %v6935_v5, %s5585_s24  ;;  %3669 = vrot.lane.b32.xlu1 %v6939_v0, %s5579_s15 }
 0x286   : > { %3671 = vrot.lane.b32.xlu0 %v6941_v37, %s5579_s15  ;;  %3695 = vrot.lane.b32.xlu1 %v6939_v0, %s5586_s25 }
 0x28a   : > { %3697 = vrot.lane.b32.xlu0 %v6941_v37, %s5586_s25  ;;  %3667 = vrot.lane.b32.xlu1 %v6935_v5, %s5579_s15 }
 0x28e   : > { %3693 = vrot.lane.b32.xlu0 %v6935_v5, %s5586_s25  ;;  %3544 = vrot.lane.b32.xlu1 %v6939_v0, %s5580_s16 }
 0x292   : > { %3546 = vrot.lane.b32.xlu0 %v6941_v37, %s5580_s16  ;;  %3570 = vrot.lane.b32.xlu1 %v6939_v0, %s5587_s26 }
 0x296   : > { %3572 = vrot.lane.b32.xlu0 %v6941_v37, %s5587_s26  ;;  %3542 = vrot.lane.b32.xlu1 %v6935_v5, %s5580_s16 }
 0x29a   : > { %3568 = vrot.lane.b32.xlu0 %v6935_v5, %s5587_s26  ;;  %3419 = vrot.lane.b32.xlu1 %v6939_v0, %s5581_s17 }
 0x29d   : > { %v2328_v22 = vpop.f32.mrf.mxu0 }
 0x29e   : > { %v2329_v61 = vadd.f32 %v2328_v22, %v6905_v43  ;;  %3421 = vrot.lane.b32.xlu0 %v6941_v37, %s5581_s17  ;;  %3445 = vrot.lane.b32.xlu1 %v6939_v0, %s5588_s19 }
 0x29f   : > { %v2330_v55 = vpop.f32.mrf.mxu0 }
 0x2a0   : > { %v2380_v35 = vmax.f32 %v2329_v61, 0.0  ;;  %v2331_v25 = vadd.f32 %v2330_v55, %v6905_v43 }
 0x2a1   : > { %v2332_v19 = vpop.f32.mrf.mxu0 }
 0x2a2   : > { %v2381_v15 = vmax.f32 %v2331_v25, 0.0  ;;  %3447 = vrot.lane.b32.xlu0 %v6941_v37, %s5588_s19  ;;  %3417 = vrot.lane.b32.xlu1 %v6935_v5, %s5581_s17  ;;  %v2429_v39 = vmul.f32 %v7025_v11, %v2380_v35 }
 0x2a3   : > { %v2333_v17 = vpop.f32.mrf.mxu0 }
 0x2a4   : > { %v2430_v52 = vmul.f32 %v7029_v9, %v2381_v15 }
 0x2a6   : > { %v5432_v56 = vpack.c.bf16 %v2430_v52, %v2429_v39  ;;  %3294 = vrot.lane.b32.xlu1 %v6939_v0, %s5582_s18  ;;  %3443 = vrot.lane.b32.xlu0 %v6935_v5, %s5588_s19 }
 0x2a8   : > { %2469 = vst [vmem:[#allocation4 + $0x14] sm:$0xff] %v5432_v56 }
 0x2aa   : > { %3320 = vrot.lane.b32.xlu1 %v6939_v0, %s5589_s23  ;;  %3296 = vrot.lane.b32.xlu0 %v6941_v37, %s5582_s18 }
 0x2ae   : > { %3292 = vrot.lane.b32.xlu1 %v6935_v5, %s5582_s18  ;;  %3322 = vrot.lane.b32.xlu0 %v6941_v37, %s5589_s23 }
 0x2af   : > { %v2473_v47 = vld [vmem:[#allocation4 + $0x10] sm:$0xff] }
 0x2b0   : > { %v7049_v33 = vcombine.low %v2473_v47, %v2473_v47  ;;  %v7061_v8 = vcombine.high %v2473_v47, %v2473_v47 }
 0x2b1   : > { %v2369_v58 = vpop.f32.mrf.mxu1 }
 0x2b2   : > { %v2370_v32 = vadd.f32 %v2369_v58, %v6905_v43  ;;  %2507 = vrot.lane.b32.xlu1 %v7049_v33, %s5567_s28  ;;  %3318 = vrot.lane.b32.xlu0 %v6935_v5, %s5589_s23 }
 0x2b3   : > { %v2371_v51 = vpop.f32.mrf.mxu1 }
 0x2b4   : > { %v2382_v42 = vmax.f32 %v2370_v32, 0.0  ;;  %v2372_v63 = vadd.f32 %v2371_v51, %v6905_v43 }
 0x2b5   : > { %v2373_v14 = vpop.f32.mrf.mxu1 }
 0x2b6   : > { %v2383_v18 = vmax.f32 %v2372_v63, 0.0  ;;  %2509 = vrot.lane.b32.xlu0 %v7061_v8, %s5567_s28  ;;  %v2431_v29 = vmul.f32 %v7059_v13, %v2382_v42 }
 0x2b7   : > { %v2374_v30 = vpop.f32.mrf.mxu1 }
 0x2b8   : > { %v2432_v6 = vmul.f32 %v7065_v26, %v2383_v18 }
 0x2ba   : > { %v5433_v31 = vpack.c.bf16 %v2432_v6, %v2431_v29  ;;  %2930 = vrot.lane.b32.xlu0 %v7061_v8, %s5568_s29 }
 0x2bc   : > { %2470 = vst [vmem:[#allocation4 + $0x1c] sm:$0xff] %v5433_v31 }
 0x2be   : > { %2660 = vrot.lane.b32.xlu0 %v7049_v33, %s5566_s27 }
 0x2c3   : > { %v2474_v43 = vld [vmem:[#allocation4 + $0x18] sm:$0xff]  ;;  %v7079_v2 = vld [vmem:[#allocation4 + $0x20] sm:$0xff] }
 0x2c4   : > { %v7075_v62 = vcombine.low %v2474_v43, %v2474_v43  ;;  %v7077_v24 = vpop.permute.xlu0 %2501  ;;  %v7087_v59 = vcombine.low %v7079_v2, %v7079_v2  ;;  %v7103_v48 = vcombine.high %v2474_v43, %v2474_v43  ;;  %v7244_v29 = vcombine.high %v7079_v2, %v7079_v2 }
 0x2c6   : > { %2664 = vrot.lane.b32.xlu0 %v7075_v62, %s5566_s27  ;;  %2511 = vrot.lane.b32.xlu1 %v7075_v62, %s5567_s28 }
 0x2c8   : > { %v2504_v27 = vpop.permute.xlu1 %2503  ;;  %v7089_v44 = vpop.permute.xlu0 %2505 }
 0x2c9   : > { %v7139_v38 = vsel %vm8782_vm3, %v7077_v24, %v2504_v27  ;;  %v7143_v41 = vsel %vm8782_vm3, %v2504_v27, %v7089_v44 }
 0x2ca   : > { %2515 = vrot.lane.b32.xlu0 %v7087_v59, %s5567_s28  ;;  %2928 = vrot.lane.b32.xlu1 %v7049_v33, %s5568_s29 }
 0x2cc   : > { %v7095_v4 = vpop.permute.xlu1 %2920  ;;  %v7097_v46 = vpop.permute.xlu0 %2499 }
 0x2ce   : > { %3208 = vrot.lane.b32.xlu0 %v7061_v8, %s5584_s20  ;;  %2932 = vrot.lane.b32.xlu1 %v7075_v62, %s5568_s29 }
 0x2d0   : > { %v7105_v7 = vpop.permute.xlu1 %2924  ;;  %v7107_v60 = vpop.permute.xlu0 %2922 }
 0x2d1   : > { %v2940_v26 = vsel %vm8862_vm2, %v7107_v60, %v7105_v7  ;;  %vm8867_vm2 = vcmask 982016  }
 0x2d2   : > { %2934 = vrot.lane.b32.xlu0 %v7103_v48, %s5568_s29  ;;  %2662 = vrot.lane.b32.xlu1 %v7061_v8, %s5566_s27 }
 0x2d4   : > { %v7113_v50 = vpop.permute.xlu1 %2654  ;;  %v7115_v49 = vpop.permute.xlu0 %2926 }
 0x2d6   : > { %2666 = vrot.lane.b32.xlu0 %v7103_v48, %s5566_s27  ;;  %2513 = vrot.lane.b32.xlu1 %v7103_v48, %s5567_s28 }
 0x2d8   : > { %v7121_v3 = vpop.permute.xlu1 %2658  ;;  %v7123_v20 = vpop.permute.xlu0 %2652 }
 0x2da   : > { %3925 = vrot.lane.b32.xlu0 %v7061_v8, %s5576_s13  ;;  %3206 = vrot.lane.b32.xlu1 %v7049_v33, %s5584_s20 }
 0x2dc   : > { %v3203_v53 = vpop.permute.xlu1 %3202  ;;  %v7129_v16 = vpop.permute.xlu0 %2656 }
 0x2de   : > { %3800 = vrot.lane.b32.xlu0 %v7061_v8, %s5578_s14  ;;  %2936 = vrot.lane.b32.xlu1 %v7087_v59, %s5568_s29 }
 0x2e0   : > { %v3201_v34 = vpop.permute.xlu1 %3200  ;;  %v7135_v57 = vpop.permute.xlu0 %3204 }
 0x2e1   : > { %v3219_v28 = vsel %vm3218_vm13, %v3201_v34, %v3203_v53  ;;  %v3220_v1 = vsel %vm3218_vm13, %v3203_v53, %v7135_v57  ;;  %v2531_v53 = vsel %vm406_vm6, %v6935_v5, %v7139_v38  ;;  %v2517_v34 = vsel %vm8782_vm3, %v7097_v46, %v7077_v24 }
 0x2e2   : > { %3826 = vrot.lane.b32.xlu0 %v7061_v8, %s5585_s24  ;;  %2668 = vrot.lane.b32.xlu1 %v7087_v59, %s5566_s27  ;;  %v3230_v10 = vsel %vm406_vm6, %v7143_v41, %v3220_v1  ;;  %v3228_v22 = vsel %vm406_vm6, %v7139_v38, %v3219_v28  ;;  %v3127_v28 = vsel %vm406_vm6, %v6947_v21, %v7077_v24 }
 0x2e3   : > { %4696 = vmatprep.subr.bf16.mxu0 %v3230_v10  ;;  %v2528_v38 = vsel %vm406_vm6, %v6947_v21, %v2517_v34  ;;  %v2939_v46 = vsel %vm8861_vm4, %v7095_v4, %v7107_v60  ;;  %v2950_v34 = vsel %vm406_vm6, %v6935_v5, %v2940_v26  ;;  %v5187_v36 = vcombine.low %v3127_v28, %v2531_v53  ;;  %vm8868_vm4 = vmmov %vm8867_vm2 }
 0x2e4   : > { %v7156_v61 = vpop.permute.xlu1 %3919  ;;  %4697 = vmatpush1.bf16.msra.mxu0 %v3228_v22  ;;  %v7158_v55 = vpop.permute.xlu0 %3917  ;;  %v5188_v22 = vcombine.high %v3127_v28, %v2531_v53  ;;  %v5157_v24 = vcombine.low %v2528_v38, %v2531_v53  ;;  %v2948_v13 = vsel %vm406_vm6, %v6947_v21, %v2939_v46  ;;  %v2672_v26 = vsel %vm8867_vm2, %v7113_v50, %v7129_v16 }
 0x2e5   : > { %v5177_v4 = vcombine.low %v2948_v13, %v2950_v34  ;;  %v5162_v12 = vcombine.high %v2528_v38, %v2531_v53  ;;  %v2671_v40 = vsel %vm8868_vm4, %v7123_v20, %v7113_v50  ;;  %v5182_v28 = vcombine.high %v2948_v13, %v2950_v34 }
 0x2e6   : > { %3675 = vrot.lane.b32.xlu0 %v7061_v8, %s5579_s15  ;;  %3923 = vrot.lane.b32.xlu1 %v7049_v33, %s5576_s13  ;;  %vm8874_vm2 = vcmask 408576  }
 0x2e7   : > { %vm8876_vm4 = vmmov %vm8874_vm2 }
 0x2e8   : > { %v7164_v35 = vpop.permute.xlu1 %3794  ;;  %v7166_v25 = vpop.permute.xlu0 %3921 }
 0x2ea   : > { %3701 = vrot.lane.b32.xlu0 %v7061_v8, %s5586_s25  ;;  %3798 = vrot.lane.b32.xlu1 %v7049_v33, %s5578_s14 }
 0x2ec   : > { %v7172_v19 = vpop.permute.xlu1 %3820  ;;  %v7174_v15 = vpop.permute.xlu0 %3796 }
 0x2ee   : > { %3550 = vrot.lane.b32.xlu0 %v7061_v8, %s5580_s16  ;;  %3824 = vrot.lane.b32.xlu1 %v7049_v33, %s5585_s24 }
 0x2f0   : > { %v7180_v17 = vpop.permute.xlu1 %3792  ;;  %v7182_v39 = vpop.permute.xlu0 %3822 }
 0x2f2   : > { %3576 = vrot.lane.b32.xlu0 %v7061_v8, %s5587_s26  ;;  %3673 = vrot.lane.b32.xlu1 %v7049_v33, %s5579_s15 }
 0x2f4   : > { %v7188_v52 = vpop.permute.xlu1 %3669  ;;  %v7190_v56 = vpop.permute.xlu0 %3818 }
 0x2f6   : > { %3425 = vrot.lane.b32.xlu0 %v7061_v8, %s5581_s17  ;;  %3699 = vrot.lane.b32.xlu1 %v7049_v33, %s5586_s25 }
 0x2f8   : > { %v7196_v47 = vpop.permute.xlu1 %3695  ;;  %v7198_v45 = vpop.permute.xlu0 %3671 }
 0x2fa   : > { %3451 = vrot.lane.b32.xlu0 %v7061_v8, %s5588_s19  ;;  %3548 = vrot.lane.b32.xlu1 %v7049_v33, %s5580_s16 }
 0x2fc   : > { %v7204_v54 = vpop.permute.xlu1 %3667  ;;  %v7206_v58 = vpop.permute.xlu0 %3697 }
 0x2fe   : > { %3300 = vrot.lane.b32.xlu0 %v7061_v8, %s5582_s18  ;;  %3574 = vrot.lane.b32.xlu1 %v7049_v33, %s5587_s26 }
 0x300   : > { %v7212_v32 = vpop.permute.xlu1 %3544  ;;  %v7214_v51 = vpop.permute.xlu0 %3693 }
 0x301   : > { %8849 = vst [vmem:[#allocation13_spill] sm:$0xff] %v7212_v32 }
 0x302   : > { %3326 = vrot.lane.b32.xlu0 %v7061_v8, %s5589_s23  ;;  %3423 = vrot.lane.b32.xlu1 %v7049_v33, %s5581_s17 }
 0x304   : > { %v7220_v42 = vpop.permute.xlu1 %3570  ;;  %v7222_v63 = vpop.permute.xlu0 %3546 }
 0x305   : > { %8850 = vst [vmem:[#allocation14_spill] sm:$0xff] %v7220_v42 }
 0x306   : > { %3210 = vrot.lane.b32.xlu0 %v7075_v62, %s5584_s20  ;;  %3449 = vrot.lane.b32.xlu1 %v7049_v33, %s5588_s19 }
 0x308   : > { %v7228_v14 = vpop.permute.xlu0 %3572  ;;  %v7230_v18 = vpop.permute.xlu1 %3542 }
 0x309   : > { %8851 = vst [vmem:[#allocation15_spill] sm:$0xff] %v7228_v14  ;;  %8852 = vst [vmem:[#allocation16_spill] sm:$0xff] %v7230_v18 }
 0x30a   : > { %3214 = vrot.lane.b32.xlu0 %v7087_v59, %s5584_s20  ;;  %3298 = vrot.lane.b32.xlu1 %v7049_v33, %s5582_s18 }
 0x30c   : > { %v7236_v30 = vpop.permute.xlu0 %3568  ;;  %v7246_v6 = vpop.permute.xlu1 %3419 }
 0x30d   : > { %8853 = vst [vmem:[#allocation17_spill] sm:$0xff] %v7236_v30  ;;  %8854 = vst [vmem:[#allocation18_spill] sm:$0xff] %v7246_v6 }
 0x30e   : > { %3927 = vrot.lane.b32.xlu0 %v7075_v62, %s5576_s13  ;;  %3324 = vrot.lane.b32.xlu1 %v7049_v33, %s5589_s23 }
 0x310   : > { %v7248_v31 = vpop.permute.xlu0 %3421  ;;  %v7256_v27 = vpop.permute.xlu1 %3445 }
 0x311   : > { %8855 = vst [vmem:[#allocation19_spill] sm:$0xff] %v7248_v31  ;;  %8857 = vst [vmem:[#allocation21_spill] sm:$0xff] %v7256_v27 }
 0x312   : > { %3931 = vrot.lane.b32.xlu0 %v7087_v59, %s5576_s13  ;;  %3197 = vrot.lane.b32.xlu1 %v7244_v29, %s5567_s28 }
 0x314   : > { %v7254_v43 = vpop.permute.xlu0 %3447  ;;  %v7277_v1 = vpop.permute.xlu1 %3417 }
 0x315   : > { %8856 = vst [vmem:[#allocation20_spill] sm:$0xff] %v7254_v43  ;;  %8859 = vst [vmem:[#allocation23_spill] sm:$0xff] %v7277_v1 }
 0x316   : > { %3802 = vrot.lane.b32.xlu0 %v7075_v62, %s5578_s14  ;;  %3212 = vrot.lane.b32.xlu1 %v7103_v48, %s5584_s20 }
 0x318   : > { %v7262_v2 = vpop.permute.xlu0 %3443  ;;  %v7298_v11 = vpop.permute.xlu1 %3294 }
 0x319   : > { %8858 = vst [vmem:[#allocation22_spill] sm:$0xff] %v7262_v2  ;;  %8864 = vst [vmem:[#allocation26_spill] sm:$0xff] %v7298_v11 }
 0x31a   : > { %3216 = vrot.lane.b32.xlu1 %v7244_v29, %s5584_s20  ;;  %3806 = vrot.lane.b32.xlu0 %v7087_v59, %s5578_s14 }
 0x31c   : > { %v7279_v10 = vpop.permute.xlu0 %3296 }
 0x31d   : > { %8860 = vst [vmem:[#allocation24_spill] sm:$0xff] %v7279_v10 }
 0x31e   : > { %3929 = vrot.lane.b32.xlu1 %v7103_v48, %s5576_s13  ;;  %3143 = vrot.lane.b32.xlu0 %v5188_v22, %s5569_s30  ;;  %v7308_v22 = vpop.permute.xlu1 %3320 }
 0x31f   : > { %8866 = vst [vmem:[#allocation28_spill] sm:$0xff] %v7308_v22 }
 0x320   : > { %v7292_v9 = vpop.permute.xlu0 %3322 }
 0x321   : > { %8863 = vst [vmem:[#allocation25_spill] sm:$0xff] %v7292_v9 }
 0x322   : > { %3933 = vrot.lane.b32.xlu1 %v7244_v29, %s5576_s13  ;;  %3064 = vrot.lane.b32.xlu0 %v5157_v24, %s5570_s7  ;;  %v7320_v23 = vpop.permute.xlu1 %3292 }
 0x323   : > { %8869 = vst [vmem:[#allocation29_spill] sm:$0xff] %v7320_v23 }
 0x324   : > { %v7303_v60 = vpop.permute.xlu0 %3318 }
 0x325   : > { %8865 = vst [vmem:[#allocation27_spill] sm:$0xff] %v7303_v60 }
 0x326   : > { %3804 = vrot.lane.b32.xlu1 %v7103_v48, %s5578_s14  ;;  %3002 = vrot.lane.b32.xlu0 %v5177_v4, %s5571_s8  ;;  %v2682_v4 = vsel %vm406_vm6, %v6935_v5, %v2672_v26  ;;  %v2508_v50 = vpop.permute.xlu1 %2507 }
 0x328   : > { %v2510_v46 = vpop.permute.xlu0 %2509 }
 0x32a   : > { %3133 = vrot.lane.b32.xlu1 %v5187_v36, %s5569_s30  ;;  %2858 = vrot.lane.b32.xlu0 %v5157_v24, %s5572_s9  ;;  %v2680_v36 = vsel %vm406_vm6, %v6947_v21, %v2671_v40 }
 0x32b   : > { %v5167_v22 = vcombine.low %v2680_v36, %v2682_v4  ;;  %v5172_v40 = vcombine.high %v2680_v36, %v2682_v4 }
 0x32c   : > { %v2931_v60 = vpop.permute.xlu0 %2930 }
 0x32e   : > { %3074 = vrot.lane.b32.xlu1 %v5162_v12, %s5570_s7  ;;  %2796 = vrot.lane.b32.xlu0 %v5157_v24, %s5573_s10 }
 0x330   : > { %v7328_v20 = vpop.permute.xlu0 %2660 }
 0x332   : > { %3012 = vrot.lane.b32.xlu1 %v5182_v28, %s5571_s8  ;;  %2734 = vrot.lane.b32.xlu0 %v5167_v22, %s5574_s11 }
 0x336   : > { %2868 = vrot.lane.b32.xlu1 %v5162_v12, %s5572_s9  ;;  %2590 = vrot.lane.b32.xlu0 %v5157_v24, %s5575_s12  ;;  %v2520_v24 = vsel %vm8782_vm3, %v7089_v44, %v2508_v50 }
 0x337   : > { %v2537_v36 = vsel %vm406_vm6, %v6941_v37, %v2520_v24 }
 0x338   : > { %v7332_v5 = vpop.permute.xlu1 %2511  ;;  %v7334_v53 = vpop.permute.xlu0 %2664 }
 0x339   : > { %v7360_v28 = vsel %vm8782_vm3, %v2510_v46, %v7332_v5 }
 0x33a   : > { %2806 = vrot.lane.b32.xlu1 %v5162_v12, %s5573_s10  ;;  %8872 = vst [vmem:[#allocation32_spill] sm:$0xff] %v7360_v28  ;;  %v2543_v23 = vsel %vm406_vm6, %v7061_v8, %v7360_v28 }
 0x33c   : > { %v2929_v21 = vpop.permute.xlu1 %2928  ;;  %v7337_v13 = vpop.permute.xlu0 %2515 }
 0x33d   : > { %8870 = vst [vmem:[#allocation30_spill] sm:$0xff] %v7337_v13  ;;  %v2552_v38 = vsel %vm406_vm6, %v7087_v59, %v7337_v13 }
 0x33e   : > { %v7342_v34 = vcombine.low %v2552_v38, %v2552_v38  ;;  %2744 = vrot.lane.b32.xlu1 %v5172_v40, %s5574_s11  ;;  %v7353_v4 = vcombine.high %v2552_v38, %v2552_v38  ;;  %v2534_v38 = vsel %vm406_vm6, %v6939_v0, %v7143_v41 }
 0x33f   : > { %v7371_v9 = vcombine.low %v2534_v38, %v2537_v36 }
 0x340   : > { %v7347_v22 = vpop.permute.xlu1 %2932  ;;  %3141 = vrot.lane.b32.xlu0 %v7342_v34, %s5569_s30  ;;  %v7351_v26 = vpop.permute.xlu0 %3208 }
 0x341   : > { %8871 = vst [vmem:[#allocation31_spill] sm:$0xff] %v7351_v26  ;;  %v2944_v43 = vsel %vm8874_vm2, %v2931_v60, %v7347_v22 }
 0x342   : > { %2600 = vrot.lane.b32.xlu1 %v5162_v12, %s5575_s12  ;;  %v2521_v12 = vsel %vm8782_vm3, %v2508_v50, %v2510_v46 }
 0x343   : > { %v2540_v41 = vsel %vm406_vm6, %v7049_v33, %v2521_v12 }
 0x344   : > { %v7362_v40 = vpop.permute.xlu1 %2662  ;;  %3151 = vrot.lane.b32.xlu0 %v7353_v4, %s5569_s30  ;;  %v7366_v44 = vpop.permute.xlu0 %2934  ;;  %v7387_v2 = vcombine.high %v2540_v41, %v2543_v23  ;;  %v7399_v6 = vcombine.low %v2540_v41, %v2543_v23  ;;  %v7414_v41 = vcombine.high %v2534_v38, %v2537_v36 }
 0x346   : > { %3072 = vrot.lane.b32.xlu1 %v7342_v34, %s5570_s7 }
 0x348   : > { %v7379_v11 = vpop.permute.xlu1 %2513  ;;  %3135 = vrot.lane.b32.xlu0 %v7371_v9, %s5569_s30  ;;  %v7383_v10 = vpop.permute.xlu0 %2666 }
 0x34a   : > { %3082 = vrot.lane.b32.xlu1 %v7353_v4, %s5570_s7 }
 0x34c   : > { %v3207_v46 = vpop.permute.xlu1 %3206  ;;  %3147 = vrot.lane.b32.xlu0 %v7387_v2, %s5569_s30  ;;  %v7393_v50 = vpop.permute.xlu0 %3925 }
 0x34d   : > { %8873 = vst [vmem:[#allocation33_spill] sm:$0xff] %v7393_v50  ;;  %v3221_v28 = vsel %vm3218_vm13, %v7135_v57, %v3207_v46  ;;  %v3222_v1 = vsel %vm3218_vm13, %v3207_v46, %v7351_v26 }
 0x34e   : > { %v3234_v31 = vsel %vm406_vm6, %v2521_v12, %v3222_v1  ;;  %v3232_v27 = vsel %vm406_vm6, %v2520_v24, %v3221_v28  ;;  %v2943_v1 = vsel %vm8876_vm4, %v2929_v21, %v2931_v60  ;;  %v7419_v24 = vsel %vm406_vm6, %v7061_v8, %v2944_v43  ;;  %vm8878_vm4 = vmmov %vm8874_vm2 }
 0x34f   : > { %4737 = vmatprep.subr.bf16.mxu1 %v3234_v31  ;;  %v2942_v28 = vsel %vm8874_vm2, %v7115_v49, %v2929_v21  ;;  %v7432_v60 = vsel %vm406_vm6, %v7049_v33, %v2943_v1  ;;  %v2941_v43 = vsel %vm8878_vm4, %v7105_v7, %v7115_v49  ;;  %vm8883_vm2 = vcmask 982016  }
 0x350   : > { %v7405_v30 = vpop.permute.xlu1 %2936  ;;  %3068 = vrot.lane.b32.xlu0 %v7399_v6, %s5570_s7  ;;  %4738 = vmatpush1.bf16.msra.mxu1 %v3232_v27  ;;  %v7409_v57 = vpop.permute.xlu0 %3800  ;;  %v5179_v21 = vcombine.low %v7432_v60, %v7419_v24  ;;  %v7441_v38 = vsel %vm406_vm6, %v6941_v37, %v2942_v28  ;;  %v2675_v26 = vsel %vm8883_vm2, %v7328_v20, %v7362_v40  ;;  %vm8884_vm4 = vmmov %vm8883_vm2 }
 0x351   : > { %8875 = vst [vmem:[#allocation34_spill] sm:$0xff] %v7409_v57  ;;  %v2964_v23 = vsel %vm406_vm6, %v7087_v59, %v7405_v30 }
 0x352   : > { %v5181_v31 = vcombine.low %v2964_v23, %v2964_v23  ;;  %v5186_v36 = vcombine.high %v2964_v23, %v2964_v23 }
 0x354   : > { %v7423_v12 = vpop.permute.xlu1 %2668  ;;  %3010 = vrot.lane.b32.xlu1 %v5181_v31, %s5571_s8  ;;  %3076 = vrot.lane.b32.xlu0 %v7414_v41, %s5570_s7  ;;  %v7428_v27 = vpop.permute.xlu0 %3826  ;;  %v7451_v31 = vsel %vm406_vm6, %v6939_v0, %v2941_v43 }
 0x355   : > { %8877 = vst [vmem:[#allocation35_spill] sm:$0xff] %v7428_v27  ;;  %v5183_v7 = vcombine.high %v7451_v31, %v7441_v38 }
 0x358   : > { %v7443_v46 = vpop.permute.xlu1 %3923  ;;  %3020 = vrot.lane.b32.xlu1 %v5186_v36, %s5571_s8  ;;  %3006 = vrot.lane.b32.xlu0 %v5179_v21, %s5571_s8  ;;  %v7447_v1 = vpop.permute.xlu0 %3675 }
 0x359   : > { %8879 = vst [vmem:[#allocation36_spill] sm:$0xff] %v7443_v46 }
 0x35c   : > { %v7455_v49 = vpop.permute.xlu1 %3798  ;;  %2866 = vrot.lane.b32.xlu1 %v7342_v34, %s5572_s9  ;;  %3014 = vrot.lane.b32.xlu0 %v5183_v7, %s5571_s8  ;;  %v7460_v23 = vpop.permute.xlu0 %3701  ;;  %v2696_v7 = vsel %vm406_vm6, %v7087_v59, %v7423_v12 }
 0x35d   : > { %8880 = vst [vmem:[#allocation37_spill] sm:$0xff] %v7455_v49  ;;  %v5171_v49 = vcombine.low %v2696_v7, %v2696_v7 }
 0x360   : > { %v7462_v28 = vpop.permute.xlu1 %3824  ;;  %2876 = vrot.lane.b32.xlu1 %v7353_v4, %s5572_s9  ;;  %2862 = vrot.lane.b32.xlu0 %v7399_v6, %s5572_s9  ;;  %v7468_v43 = vpop.permute.xlu0 %3550 }
 0x361   : > { %8881 = vst [vmem:[#allocation38_spill] sm:$0xff] %v7462_v28  ;;  %v7497_v28 = vsel %vm406_vm6, %v7049_v33, %v2675_v26  ;;  %v5176_v26 = vcombine.high %v2696_v7, %v2696_v7 }
 0x364   : > { %v7470_v21 = vpop.permute.xlu1 %3673  ;;  %2804 = vrot.lane.b32.xlu1 %v7342_v34, %s5573_s10  ;;  %2870 = vrot.lane.b32.xlu0 %v7414_v41, %s5572_s9  ;;  %v7476_v36 = vpop.permute.xlu0 %3576 }
 0x365   : > { %8882 = vst [vmem:[#allocation39_spill] sm:$0xff] %v7470_v21  ;;  %v2676_v21 = vsel %vm8884_vm4, %v7362_v40, %v7334_v53  ;;  %v2674_v40 = vsel %vm8883_vm2, %v7121_v3, %v7328_v20  ;;  %vm8889_vm4 = vmmov %vm8883_vm2  ;;  %vm8911_vm2 = vcmask 408576  }
 0x366   : > { %v7501_v46 = vsel %vm406_vm6, %v7061_v8, %v2676_v21  ;;  %v2673_v33 = vsel %vm8889_vm4, %v7129_v16, %v7121_v3  ;;  %v2686_v20 = vsel %vm406_vm6, %v6941_v37, %v2674_v40  ;;  %vm8912_vm4 = vmmov %vm8911_vm2 }
 0x367   : > { %v5169_v8 = vcombine.low %v7497_v28, %v7501_v46 }
 0x368   : > { %v7487_v50 = vpop.permute.xlu1 %3699  ;;  %2814 = vrot.lane.b32.xlu1 %v7353_v4, %s5573_s10  ;;  %2800 = vrot.lane.b32.xlu0 %v7399_v6, %s5573_s10  ;;  %v7493_v57 = vpop.permute.xlu0 %3425 }
 0x369   : > { %8885 = vst [vmem:[#allocation40_spill] sm:$0xff] %v7487_v50  ;;  %8886 = vst [vmem:[#allocation41_spill] sm:$0xff] %v7493_v57 }
 0x36c   : > { %v7506_v50 = vpop.permute.xlu1 %3548  ;;  %2742 = vrot.lane.b32.xlu1 %v5171_v49, %s5574_s11  ;;  %2808 = vrot.lane.b32.xlu0 %v7414_v41, %s5573_s10  ;;  %v7511_v57 = vpop.permute.xlu0 %3451 }
 0x36d   : > { %8887 = vst [vmem:[#allocation42_spill] sm:$0xff] %v7506_v50  ;;  %8888 = vst [vmem:[#allocation43_spill] sm:$0xff] %v7511_v57  ;;  %v2684_v57 = vsel %vm406_vm6, %v6939_v0, %v2673_v33 }
 0x36e   : > { %v5173_v50 = vcombine.high %v2684_v57, %v2686_v20 }
 0x370   : > { %v7520_v21 = vpop.permute.xlu1 %3574  ;;  %2752 = vrot.lane.b32.xlu1 %v5176_v26, %s5574_s11  ;;  %2738 = vrot.lane.b32.xlu0 %v5169_v8, %s5574_s11  ;;  %v7524_v49 = vpop.permute.xlu0 %3300  ;;  %v5178_v8 = vcombine.low %v7451_v31, %v7441_v38 }
 0x371   : > { %8890 = vst [vmem:[#allocation44_spill] sm:$0xff] %v7520_v21  ;;  %8891 = vst [vmem:[#allocation45_spill] sm:$0xff] %v7524_v49 }
 0x374   : > { %v7528_v3 = vpop.permute.xlu1 %3423  ;;  %2598 = vrot.lane.b32.xlu1 %v7342_v34, %s5575_s12  ;;  %2746 = vrot.lane.b32.xlu0 %v5173_v50, %s5574_s11  ;;  %v7533_v37 = vpop.permute.xlu0 %3326 }
 0x375   : > { %8892 = vst [vmem:[#allocation46_spill] sm:$0xff] %v7528_v3  ;;  %8893 = vst [vmem:[#allocation47_spill] sm:$0xff] %v7533_v37 }
 0x378   : > { %v7535_v16 = vpop.permute.xlu1 %3449  ;;  %2608 = vrot.lane.b32.xlu1 %v7353_v4, %s5575_s12  ;;  %2594 = vrot.lane.b32.xlu0 %v7399_v6, %s5575_s12  ;;  %v7541_v7 = vpop.permute.xlu0 %3210 }
 0x379   : > { %8894 = vst [vmem:[#allocation48_spill] sm:$0xff] %v7535_v16  ;;  %8895 = vst [vmem:[#allocation49_spill] sm:$0xff] %v7541_v7 }
 0x37c   : > { %v7543_v0 = vpop.permute.xlu1 %3298  ;;  %3137 = vrot.lane.b32.xlu1 %v7399_v6, %s5569_s30  ;;  %2602 = vrot.lane.b32.xlu0 %v7414_v41, %s5575_s12  ;;  %v7549_v34 = vpop.permute.xlu0 %3214 }
 0x37d   : > { %8896 = vst [vmem:[#allocation50_spill] sm:$0xff] %v7543_v0  ;;  %8897 = vst [vmem:[#allocation51_spill] sm:$0xff] %v7549_v34  ;;  %v7633_v34 = vsel %vm8782_vm3, %v7379_v11, %v7337_v13 }
 0x37e   : > { %8910 = vst [vmem:[#allocation64_spill] sm:$0xff] %v7633_v34 }
 0x380   : > { %v7551_v50 = vpop.permute.xlu1 %3324  ;;  %3145 = vrot.lane.b32.xlu1 %v7414_v41, %s5569_s30  ;;  %3828 = vrot.lane.b32.xlu0 %v7075_v62, %s5585_s24  ;;  %v7557_v4 = vpop.permute.xlu0 %3927 }
 0x381   : > { %8898 = vst [vmem:[#allocation52_spill] sm:$0xff] %v7551_v50  ;;  %8899 = vst [vmem:[#allocation53_spill] sm:$0xff] %v7557_v4  ;;  %v5184_v4 = vcombine.high %v7432_v60, %v7419_v24 }
 0x384   : > { %v7559_v40 = vpop.permute.xlu1 %3197  ;;  %3066 = vrot.lane.b32.xlu1 %v7371_v9, %s5570_s7  ;;  %3832 = vrot.lane.b32.xlu0 %v7087_v59, %s5585_s24  ;;  %v7565_v6 = vpop.permute.xlu0 %3931 }
 0x385   : > { %8900 = vst [vmem:[#allocation54_spill] sm:$0xff] %v7559_v40  ;;  %8901 = vst [vmem:[#allocation55_spill] sm:$0xff] %v7565_v6 }
 0x388   : > { %v7567_v33 = vpop.permute.xlu1 %3212  ;;  %3078 = vrot.lane.b32.xlu1 %v7387_v2, %s5570_s7  ;;  %3677 = vrot.lane.b32.xlu0 %v7075_v62, %s5579_s15  ;;  %v7573_v41 = vpop.permute.xlu0 %3802 }
 0x389   : > { %8902 = vst [vmem:[#allocation56_spill] sm:$0xff] %v7567_v33  ;;  %8903 = vst [vmem:[#allocation57_spill] sm:$0xff] %v7573_v41 }
 0x38c   : > { %v7577_v26 = vpop.permute.xlu1 %3216  ;;  %3004 = vrot.lane.b32.xlu1 %v5178_v8, %s5571_s8  ;;  %3681 = vrot.lane.b32.xlu0 %v7087_v59, %s5579_s15  ;;  %v7582_v6 = vpop.permute.xlu0 %3806 }
 0x38d   : > { %8904 = vst [vmem:[#allocation58_spill] sm:$0xff] %v7577_v26  ;;  %8905 = vst [vmem:[#allocation59_spill] sm:$0xff] %v7582_v6 }
 0x390   : > { %v7586_v40 = vpop.permute.xlu1 %3929  ;;  %3016 = vrot.lane.b32.xlu1 %v5184_v4, %s5571_s8  ;;  %3703 = vrot.lane.b32.xlu0 %v7075_v62, %s5586_s25  ;;  %v7591_v38 = vpop.permute.xlu0 %3143 }
 0x391   : > { %8906 = vst [vmem:[#allocation60_spill] sm:$0xff] %v7586_v40  ;;  %v7628_v40 = vsel %vm8782_vm3, %v7332_v5, %v7379_v11  ;;  %vm3336_vm3 = vcmask 957440  }
 0x392   : > { %8909 = vst [vmem:[#allocation63_spill] sm:$0xff] %v7628_v40  ;;  %v2546_v5 = vsel %vm406_vm6, %v7075_v62, %v7628_v40 }
 0x394   : > { %v7593_v31 = vpop.permute.xlu1 %3933  ;;  %2860 = vrot.lane.b32.xlu1 %v7371_v9, %s5572_s9  ;;  %3707 = vrot.lane.b32.xlu0 %v7087_v59, %s5586_s25  ;;  %v7599_v8 = vpop.permute.xlu0 %3064 }
 0x395   : > { %8907 = vst [vmem:[#allocation61_spill] sm:$0xff] %v7593_v31 }
 0x398   : > { %v7601_v24 = vpop.permute.xlu1 %3804  ;;  %2872 = vrot.lane.b32.xlu1 %v7387_v2, %s5572_s9  ;;  %3552 = vrot.lane.b32.xlu0 %v7075_v62, %s5580_s16  ;;  %v7607_v60 = vpop.permute.xlu0 %3002 }
 0x399   : > { %8908 = vst [vmem:[#allocation62_spill] sm:$0xff] %v7601_v24  ;;  %v5168_v24 = vcombine.low %v2684_v57, %v2686_v20  ;;  %v5174_v57 = vcombine.high %v7497_v28, %v7501_v46  ;;  %v2549_v20 = vsel %vm406_vm6, %v7103_v48, %v7633_v34  ;;  %v2946_v46 = vsel %vm8911_vm2, %v7366_v44, %v7405_v30 }
 0x39a   : > { %v2945_v34 = vsel %vm8912_vm4, %v7347_v22, %v7366_v44  ;;  %v2962_v33 = vsel %vm406_vm6, %v7103_v48, %v2946_v46  ;;  %vm8922_vm2 = vcmask 982016  }
 0x39b   : > { %vm8923_vm4 = vmmov %vm8922_vm2 }
 0x39c   : > { %v7609_v4 = vpop.permute.xlu1 %3133  ;;  %2798 = vrot.lane.b32.xlu1 %v7371_v9, %s5573_s10  ;;  %3556 = vrot.lane.b32.xlu0 %v7087_v59, %s5580_s16  ;;  %v7615_v6 = vpop.permute.xlu0 %2858 }
 0x3a0   : > { %v7617_v41 = vpop.permute.xlu1 %3074  ;;  %2810 = vrot.lane.b32.xlu1 %v7387_v2, %s5573_s10  ;;  %3578 = vrot.lane.b32.xlu0 %v7075_v62, %s5587_s26  ;;  %v7623_v31 = vpop.permute.xlu0 %2796 }
 0x3a1   : > { %v3089_v42 = vrot.slane %v7617_v41, 4 }
 0x3a4   : > { %v7635_v26 = vpop.permute.xlu1 %3012  ;;  %2736 = vrot.lane.b32.xlu1 %v5168_v24, %s5574_s11  ;;  %3582 = vrot.lane.b32.xlu0 %v7087_v59, %s5587_s26  ;;  %v7648_v11 = vpop.permute.xlu0 %2734  ;;  %v5160_v24 = vcombine.low %v2546_v5, %v2549_v20 }
 0x3a8   : > { %v7650_v13 = vpop.permute.xlu1 %2868  ;;  %2748 = vrot.lane.b32.xlu1 %v5174_v57, %s5574_s11  ;;  %3427 = vrot.lane.b32.xlu0 %v7075_v62, %s5581_s17  ;;  %v5165_v57 = vcombine.high %v2546_v5, %v2549_v20  ;;  %v7666_v40 = vpop.permute.xlu0 %2590 }
 0x3a9   : > { %8913 = vst [vmem:[#allocation65_spill] sm:$0xff] %v7666_v40 }
 0x3ac   : > { %v7658_v28 = vpop.permute.xlu1 %2806  ;;  %2592 = vrot.lane.b32.xlu1 %v7371_v9, %s5575_s12  ;;  %3070 = vrot.lane.b32.xlu0 %v5160_v24, %s5570_s7  ;;  %v2960_v9 = vsel %vm406_vm6, %v7075_v62, %v2945_v34 }
 0x3ad   : > { %v5180_v30 = vcombine.low %v2960_v9, %v2962_v33  ;;  %v5185_v22 = vcombine.high %v2960_v9, %v2962_v33  ;;  %v7701_v33 = vld [vmem:[%s8679_s4] sm:$0xff] }
 0x3ae   : > { %8919 = vst [vmem:[#allocation71_spill] sm:$0xff] %v7701_v33  ;;  %v7705_v46 = vcombine.high %v7701_v33, %v7701_v33 }
 0x3b0   : > { %v7670_v0 = vpop.permute.xlu1 %2744  ;;  %2604 = vrot.lane.b32.xlu1 %v7387_v2, %s5575_s12  ;;  %3080 = vrot.lane.b32.xlu0 %v5165_v57, %s5570_s7  ;;  %8920 = vst [vmem:[#allocation72_spill] sm:$0xff] %v7705_v46 }
 0x3b1   : > { %5360 = vmatprep.mubr.msk.bf16.mxu0 %vm8781_vm5, %v7705_v46  ;;  %5361 = vmatprep.mubr.msk.bf16.mxu1 %vm8781_vm5, %v7705_v46  ;;  %vm3461_vm5 = vcmask 310272  }
 0x3b2   : > { %v7677_v49 = vpop.permute.xlu0 %3141 }
 0x3b3   : > { %8914 = vst [vmem:[#allocation66_spill] sm:$0xff] %v7677_v49 }
 0x3b4   : > { %3808 = vrot.lane.b32.xlu1 %v7244_v29, %s5578_s14  ;;  %3008 = vrot.lane.b32.xlu0 %v5180_v30, %s5571_s8  ;;  %v7682_v44 = vpop.permute.xlu1 %2600 }
 0x3b5   : > { %8915 = vst [vmem:[#allocation67_spill] sm:$0xff] %v7682_v44 }
 0x3b6   : > { %v7684_v5 = vpop.permute.xlu0 %3151 }
 0x3b7   : > { %8916 = vst [vmem:[#allocation68_spill] sm:$0xff] %v7684_v5  ;;  %v2677_v5 = vsel %vm8923_vm4, %v7334_v53, %v7383_v10  ;;  %vm3711_vm4 = vcmask 220160  }
 0x3b8   : > { %3830 = vrot.lane.b32.xlu1 %v7103_v48, %s5585_s24  ;;  %3018 = vrot.lane.b32.xlu0 %v5185_v22, %s5571_s8  ;;  %v7691_v34 = vpop.permute.xlu1 %3072  ;;  %v2678_v22 = vsel %vm8922_vm2, %v7383_v10, %v7423_v12  ;;  %v2692_v12 = vsel %vm406_vm6, %v7075_v62, %v2677_v5  ;;  %vm3836_vm2 = vcmask 146432  }
 0x3b9   : > { %8917 = vst [vmem:[#allocation69_spill] sm:$0xff] %v7691_v34  ;;  %v2694_v49 = vsel %vm406_vm6, %v7103_v48, %v2678_v22 }
 0x3ba   : > { %v7689_v2 = vpop.permute.xlu0 %3135  ;;  %v5170_v50 = vcombine.low %v2692_v12, %v2694_v49  ;;  %v5175_v10 = vcombine.high %v2692_v12, %v2694_v49 }
 0x3bc   : > { %3834 = vrot.lane.b32.xlu1 %v7244_v29, %s5585_s24  ;;  %2864 = vrot.lane.b32.xlu0 %v5160_v24, %s5572_s9  ;;  %v7714_v9 = vpop.permute.xlu1 %3082 }
 0x3bd   : > { %8921 = vst [vmem:[#allocation73_spill] sm:$0xff] %v7714_v9 }
 0x3be   : > { %v7696_v20 = vpop.permute.xlu0 %3147 }
 0x3bf   : > { %8918 = vst [vmem:[#allocation70_spill] sm:$0xff] %v7696_v20 }
 0x3c0   : > { %3679 = vrot.lane.b32.xlu1 %v7103_v48, %s5579_s15  ;;  %2874 = vrot.lane.b32.xlu0 %v5165_v57, %s5572_s9 }
 0x3c2   : > { %v7716_v30 = vpop.permute.xlu0 %3068 }
 0x3c4   : > { %3683 = vrot.lane.b32.xlu1 %v7244_v29, %s5579_s15  ;;  %2802 = vrot.lane.b32.xlu0 %v5160_v24, %s5573_s10 }
 0x3c6   : > { %v7727_v33 = vpop.permute.xlu1 %3010  ;;  %v7729_v46 = vpop.permute.xlu0 %3076 }
 0x3c7   : > { %8924 = vst [vmem:[#allocation74_spill] sm:$0xff] %v7727_v33  ;;  %v3153_v33 = vrot.slane %v7609_v4, 4 }
 0x3c8   : > { %3705 = vrot.lane.b32.xlu1 %v7103_v48, %s5586_s25  ;;  %2812 = vrot.lane.b32.xlu0 %v5165_v57, %s5573_s10 }
 0x3ca   : > { %v7738_v37 = vpop.permute.xlu1 %3020  ;;  %v7740_v7 = vpop.permute.xlu0 %3006 }
 0x3cb   : > { %8925 = vst [vmem:[#allocation75_spill] sm:$0xff] %v7738_v37 }
 0x3cc   : > { %3139 = vrot.lane.b32.xlu1 %v5160_v24, %s5569_s30  ;;  %2740 = vrot.lane.b32.xlu0 %v5170_v50, %s5574_s11 }
 0x3ce   : > { %v7744_v53 = vpop.permute.xlu1 %2866  ;;  %v7746_v22 = vpop.permute.xlu0 %3014 }
 0x3cf   : > { %8926 = vst [vmem:[#allocation76_spill] sm:$0xff] %v7744_v53 }
 0x3d0   : > { %3149 = vrot.lane.b32.xlu1 %v5165_v57, %s5569_s30  ;;  %2750 = vrot.lane.b32.xlu0 %v5175_v10, %s5574_s11 }
 0x3d2   : > { %v7750_v3 = vpop.permute.xlu1 %2876  ;;  %v7752_v5 = vpop.permute.xlu0 %2862 }
 0x3d3   : > { %8927 = vst [vmem:[#allocation77_spill] sm:$0xff] %v7750_v3 }
 0x3d4   : > { %3709 = vrot.lane.b32.xlu1 %v7244_v29, %s5586_s25  ;;  %2596 = vrot.lane.b32.xlu0 %v5160_v24, %s5575_s12 }
 0x3d6   : > { %v7757_v16 = vpop.permute.xlu1 %2804  ;;  %v7759_v49 = vpop.permute.xlu0 %2870 }
 0x3d7   : > { %8928 = vst [vmem:[#allocation78_spill] sm:$0xff] %v7757_v16 }
 0x3d8   : > { %3554 = vrot.lane.b32.xlu1 %v7103_v48, %s5580_s16  ;;  %2606 = vrot.lane.b32.xlu0 %v5165_v57, %s5575_s12 }
 0x3da   : > { %v7764_v50 = vpop.permute.xlu1 %2814  ;;  %v7766_v12 = vpop.permute.xlu0 %2800 }
 0x3db   : > { %8929 = vst [vmem:[#allocation79_spill] sm:$0xff] %v7764_v50 }
 0x3dc   : > { %3558 = vrot.lane.b32.xlu1 %v7244_v29, %s5580_s16  ;;  %3431 = vrot.lane.b32.xlu0 %v7087_v59, %s5581_s17 }
 0x3de   : > { %v7772_v24 = vpop.permute.xlu1 %2742  ;;  %v7774_v10 = vpop.permute.xlu0 %2808 }
 0x3df   : > { %8930 = vst [vmem:[#allocation80_spill] sm:$0xff] %v7772_v24 }
 0x3e0   : > { %3580 = vrot.lane.b32.xlu1 %v7103_v48, %s5587_s26  ;;  %3453 = vrot.lane.b32.xlu0 %v7075_v62, %s5588_s19 }
 0x3e2   : > { %v7780_v57 = vpop.permute.xlu1 %2752  ;;  %v7782_v50 = vpop.permute.xlu0 %2738 }
 0x3e3   : > { %8931 = vst [vmem:[#allocation81_spill] sm:$0xff] %v7780_v57  ;;  %8932 = vst [vmem:[#allocation82_spill] sm:$0xff] %v7782_v50 }
 0x3e4   : > { %3584 = vrot.lane.b32.xlu1 %v7244_v29, %s5587_s26  ;;  %3457 = vrot.lane.b32.xlu0 %v7087_v59, %s5588_s19 }
 0x3e6   : > { %v7788_v16 = vpop.permute.xlu1 %2598  ;;  %v7790_v24 = vpop.permute.xlu0 %2746 }
 0x3e7   : > { %8933 = vst [vmem:[#allocation83_spill] sm:$0xff] %v7788_v16  ;;  %v3154_v16 = vrot.slane %v7689_v2, 4 }
 0x3e8   : > { %3429 = vrot.lane.b32.xlu1 %v7103_v48, %s5581_s17  ;;  %3302 = vrot.lane.b32.xlu0 %v7075_v62, %s5582_s18 }
 0x3e9   : > { %v3163_v9 = vsel %vm406_vm6, %v3153_v33, %v3154_v16  ;;  %v3084_v33 = vrot.slane %v7599_v8, 4 }
 0x3ea   : > { %v7796_v3 = vpop.permute.xlu1 %2608  ;;  %v7798_v57 = vpop.permute.xlu0 %2594 }
 0x3eb   : > { %8934 = vst [vmem:[#allocation84_spill] sm:$0xff] %v7796_v3  ;;  %8935 = vst [vmem:[#allocation85_spill] sm:$0xff] %v7798_v57  ;;  %v3158_v3 = vrot.slane %v7591_v38, 4  ;;  %v3090_v57 = vrot.slane %v7729_v46, 4 }
 0x3ec   : > { %3433 = vrot.lane.b32.xlu1 %v7244_v29, %s5581_s17  ;;  %3306 = vrot.lane.b32.xlu0 %v7087_v59, %s5582_s18 }
 0x3ee   : > { %v7805_v53 = vpop.permute.xlu1 %3137  ;;  %v7807_v21 = vpop.permute.xlu0 %2602 }
 0x3ef   : > { %8936 = vst [vmem:[#allocation86_spill] sm:$0xff] %v7805_v53  ;;  %8937 = vst [vmem:[#allocation87_spill] sm:$0xff] %v7807_v21  ;;  %v8939_v21 = vrot.slane %v7805_v53, 4  ;;  %v8941_v53 = vrot.slane %v7696_v20, 4 }
 0x3f0   : > { %3455 = vrot.lane.b32.xlu1 %v7103_v48, %s5588_s19  ;;  %3328 = vrot.lane.b32.xlu0 %v7075_v62, %s5589_s23 }
 0x3f1   : > { %v3165_v50 = vsel %vm406_vm6, %v3154_v16, %v8939_v21  ;;  %v3164_v16 = vsel %vm8780_vm7, %v7609_v4, %v3163_v9 }
 0x3f2   : > { %v3146_v34 = vpop.permute.xlu1 %3145  ;;  %v7818_v40 = vpop.permute.xlu0 %3828 }
 0x3f3   : > { %8938 = vst [vmem:[#allocation88_spill] sm:$0xff] %v7818_v40  ;;  %v3159_v44 = vrot.slane %v3146_v34, 4  ;;  %v7827_v62 = vsel %vm3836_vm2, %v7428_v27, %v7818_v40  ;;  %v3166_v40 = vsel %vm8780_vm7, %v7689_v2, %v3165_v50 }
 0x3f4   : > { %8940 = vst [vmem:[#allocation89_spill] sm:$0xff] %v7827_v62  ;;  %3459 = vrot.lane.b32.xlu1 %v7244_v29, %s5588_s19  ;;  %3332 = vrot.lane.b32.xlu0 %v7087_v59, %s5589_s23  ;;  %v3102_v62 = vsel %vm406_vm6, %v3089_v42, %v3090_v57  ;;  %v8790_v42 = vrot.slane %v7716_v30, 4 }
 0x3f5   : > { %v3171_v37 = vsel %vm406_vm6, %v3158_v3, %v3159_v44  ;;  %v3173_v21 = vsel %vm406_vm6, %v3159_v44, %v8941_v53 }
 0x3f6   : > { %v3174_v27 = vsel %vm8780_vm7, %v3146_v34, %v3173_v21  ;;  %v3067_v14 = vpop.permute.xlu1 %3066  ;;  %v7845_v59 = vpop.permute.xlu0 %3832  ;;  %v3172_v3 = vsel %vm8780_vm7, %v7591_v38, %v3171_v37  ;;  %v3028_v34 = vrot.slane %v7746_v22, 4  ;;  %vm3586_vm7 = vcmask 236544  }
 0x3f7   : > { %v5298_v18 = vcombine.low %v3166_v40, %v3174_v27  ;;  %v5299_v20 = vcombine.high %v3166_v40, %v3174_v27  ;;  %v3085_v32 = vrot.slane %v3067_v14, 4  ;;  %v5296_v44 = vcombine.low %v3164_v16, %v3172_v3 }
 0x3f8   : > { %3304 = vrot.lane.b32.xlu1 %v7103_v48, %s5582_s18  ;;  %v5297_v4 = vcombine.high %v3164_v16, %v3172_v3  ;;  %v3103_v40 = vsel %vm887_vm8, %v7617_v41, %v3102_v62  ;;  %v4121_v16 = vld [vmem:[%s8680_s5] sm:$0xff]  ;;  %v3022_v3 = vrot.slane %v7607_v60, 4 }
 0x3f9   : > { %v3094_v2 = vsel %vm406_vm6, %v3084_v33, %v3085_v32  ;;  %4739 = vmatprep.subr.bf16.mxu1 %v5299_v20  ;;  %v3096_v38 = vsel %vm406_vm6, %v3085_v32, %v8790_v42  ;;  %v3027_v33 = vrot.slane %v7635_v26, 4  ;;  %4124 = vperm.xlu0 %5542, %v4121_v16   ;;  %v2878_v16 = vrot.slane %v7615_v6, 4 }
 0x3fa   : > { %4698 = vmatprep.subr.bf16.mxu0 %v5297_v4  ;;  %v7854_v9 = vpop.permute.xlu1 %3078  ;;  %4740 = vmatpush1.bf16.msra.mxu1 %v5298_v18  ;;  %v7856_v37 = vpop.permute.xlu0 %3677  ;;  %v3095_v27 = vsel %vm887_vm8, %v7599_v8, %v3094_v2  ;;  %v3097_v8 = vsel %vm887_vm8, %v3067_v14, %v3096_v38  ;;  %v8788_v2 = vrot.slane %v7740_v7, 4 }
 0x3fb   : > { %v8789_v20 = vrot.slane %v7854_v9, 4  ;;  %4699 = vmatpush1.bf16.msra.mxu0 %v5296_v44  ;;  %v5288_v53 = vcombine.low %v3095_v27, %v3103_v40  ;;  %v5289_v50 = vcombine.high %v3095_v27, %v3103_v40  ;;  %v3040_v41 = vsel %vm406_vm6, %v3027_v33, %v3028_v34 }
 0x3fc   : > { %3308 = vrot.lane.b32.xlu1 %v7244_v29, %s5582_s18  ;;  %v2884_v27 = vrot.slane %v7759_v49, 4  ;;  %v3689_v40 = vsel %vm1319_vm0, %v7447_v1, %v7856_v37 }
 0x3fd   : > { %v3104_v18 = vsel %vm406_vm6, %v3090_v57, %v8789_v20  ;;  %4700 = vmatprep.subr.bf16.mxu0 %v5289_v50 }
 0x3fe   : > { %v3005_v32 = vpop.permute.xlu1 %3004  ;;  %v7874_v62 = vpop.permute.xlu0 %3681  ;;  %v3105_v21 = vsel %vm887_vm8, %v7729_v46, %v3104_v18  ;;  %v3041_v46 = vsel %vm824_vm9, %v7635_v26, %v3040_v41 }
 0x3ff   : > { %v3023_v44 = vrot.slane %v3005_v32, 4  ;;  %4701 = vmatpush1.bf16.msra.mxu0 %v5288_v53  ;;  %v5290_v57 = vcombine.low %v3097_v8, %v3105_v21  ;;  %v5291_v4 = vcombine.high %v3097_v8, %v3105_v21  ;;  %v2883_v21 = vrot.slane %v7650_v13, 4 }
 0x400   : > { %3330 = vrot.lane.b32.xlu1 %v7103_v48, %s5589_s23 }
 0x401   : > { %v3032_v14 = vsel %vm406_vm6, %v3022_v3, %v3023_v44  ;;  %4741 = vmatprep.subr.bf16.mxu1 %v5291_v4  ;;  %v3034_v38 = vsel %vm406_vm6, %v3023_v44, %v8788_v2  ;;  %v2896_v4 = vsel %vm406_vm6, %v2883_v21, %v2884_v27 }
 0x402   : > { %v7895_v53 = vpop.permute.xlu1 %3016  ;;  %4742 = vmatpush1.bf16.msra.mxu1 %v5290_v57  ;;  %v7897_v48 = vpop.permute.xlu0 %3703  ;;  %v3033_v50 = vsel %vm824_vm9, %v7607_v60, %v3032_v14  ;;  %v3035_v3 = vsel %vm824_vm9, %v3005_v32, %v3034_v38  ;;  %v3935_v32 = vsel %vm1491_vm14, %v7158_v55, %v7156_v61  ;;  %v2822_v38 = vrot.slane %v7774_v10, 4 }
 0x403   : > { %8942 = vst [vmem:[#allocation90_spill] sm:$0xff] %v7897_v48  ;;  %v8787_v26 = vrot.slane %v7895_v53, 4  ;;  %v3716_v33 = vsel %vm3711_vm4, %v7460_v23, %v7897_v48  ;;  %v5280_v18 = vcombine.low %v3033_v50, %v3041_v46  ;;  %v5281_v41 = vcombine.high %v3033_v50, %v3041_v46 }
 0x404   : > { %3334 = vrot.lane.b32.xlu1 %v7244_v29, %s5589_s23  ;;  %v7908_v8 = vsel %vm406_vm6, %v3689_v40, %v3716_v33  ;;  %v8786_v50 = vrot.slane %v7752_v5, 4  ;;  %s9108_s23 = sshll.u32 %s9118_s22, 6 }
 0x405   : > { %8943 = vst [vmem:[#allocation91_spill] sm:$0xff] %v7908_v8  ;;  %v3042_v60 = vsel %vm406_vm6, %v3028_v34, %v8787_v26  ;;  %4702 = vmatprep.subr.bf16.mxu0 %v5281_v41  ;;  %v2897_v41 = vsel %vm8795_vm10, %v7650_v13, %v2896_v4  ;;  %v8963_v8 = vld [vmem:[#allocation18_spill] sm:$0xff]  ;;  %s8654_s9 = scalar_lea.vmem %s8681_s6, %s9108_s23 }
 0x406   : > { %v2861_v44 = vpop.permute.xlu1 %2860  ;;  %4703 = vmatpush1.bf16.msra.mxu0 %v5280_v18  ;;  %v7916_v57 = vpop.permute.xlu0 %3707  ;;  %v3043_v29 = vsel %vm824_vm9, %v7746_v22, %v3042_v60 }
 0x407   : > { %8944 = vst [vmem:[#allocation92_spill] sm:$0xff] %v7916_v57  ;;  %v2879_v14 = vrot.slane %v2861_v44, 4  ;;  %v5282_v46 = vcombine.low %v3035_v3, %v3043_v29  ;;  %v5283_v40 = vcombine.high %v3035_v3, %v3043_v29  ;;  %v2821_v3 = vrot.slane %v7658_v28, 4 }
 0x409   : > { %v2888_v34 = vsel %vm406_vm6, %v2878_v16, %v2879_v14  ;;  %4743 = vmatprep.subr.bf16.mxu1 %v5283_v40  ;;  %v2890_v21 = vsel %vm406_vm6, %v2879_v14, %v8786_v50  ;;  %v2834_v13 = vsel %vm406_vm6, %v2821_v3, %v2822_v38 }
 0x40a   : > { %v7927_v33 = vpop.permute.xlu1 %2872  ;;  %4744 = vmatpush1.bf16.msra.mxu1 %v5282_v46  ;;  %v7929_v22 = vpop.permute.xlu0 %3552  ;;  %v2889_v18 = vsel %vm8795_vm10, %v7615_v6, %v2888_v34  ;;  %v7944_v6 = vsel %vm406_vm6, %v3935_v32, 0  ;;  %v2891_v4 = vsel %vm8795_vm10, %v2861_v44, %v2890_v21  ;;  %v2816_v34 = vrot.slane %v7623_v31, 4 }
 0x40b   : > { %8945 = vst [vmem:[#allocation93_spill] sm:$0xff] %v7929_v22  ;;  %v8785_v60 = vrot.slane %v7927_v33, 4  ;;  %v5272_v55 = vcombine.low %v2889_v18, %v2897_v41  ;;  %v5273_v16 = vcombine.high %v2889_v18, %v2897_v41  ;;  %v3811_v32 = vsel %vm1382_vm15, %v7164_v35, %v7174_v15 }
 0x40c   : > { %v3810_v44 = vsel %vm1382_vm15, %v7180_v17, %v7164_v35  ;;  %v8784_v21 = vrot.slane %v7766_v12, 4  ;;  %v2835_v35 = vsel %vm8791_vm11, %v7658_v28, %v2834_v13  ;;  %v2760_v17 = vrot.slane %v7790_v24, 4 }
 0x40d   : > { %v2898_v29 = vsel %vm406_vm6, %v2884_v27, %v8785_v60  ;;  %4704 = vmatprep.subr.bf16.mxu0 %v5273_v16  ;;  %v3837_v16 = vsel %vm3836_vm2, %v7190_v56, %v7172_v19  ;;  %v8956_v60 = vld [vmem:[#allocation82_spill] sm:$0xff] }
 0x40e   : > { %v2799_v14 = vpop.permute.xlu1 %2798  ;;  %4705 = vmatpush1.bf16.msra.mxu0 %v5272_v55  ;;  %v7948_v46 = vpop.permute.xlu0 %3556  ;;  %v2899_v40 = vsel %vm8795_vm10, %v7759_v49, %v2898_v29  ;;  %v7963_v49 = vsel %vm1491_vm14, %v7156_v61, %v7166_v25  ;;  %v3838_v55 = vsel %vm3836_vm2, %v7172_v19, %v7182_v39  ;;  %v3564_v61 = vsel %vm1256_vm1, %v7468_v43, %v7929_v22  ;;  %v8975_v22 = vld [vmem:[#allocation69_spill] sm:$0xff] }
 0x40f   : > { %8946 = vst [vmem:[#allocation94_spill] sm:$0xff] %v7948_v46  ;;  %v2817_v18 = vrot.slane %v2799_v14, 4  ;;  %v5274_v27 = vcombine.low %v2891_v4, %v2899_v40  ;;  %v5275_v41 = vcombine.high %v2891_v4, %v2899_v40  ;;  %v8796_v50 = vrot.slane %v8956_v60, 4 }
 0x411   : > { %v2826_v3 = vsel %vm406_vm6, %v2816_v34, %v2817_v18  ;;  %4745 = vmatprep.subr.bf16.mxu1 %v5275_v41  ;;  %v2828_v29 = vsel %vm406_vm6, %v2817_v18, %v8784_v21  ;;  %v3686_v18 = vsel %vm1319_vm0, %v7188_v52, %v7198_v45  ;;  %v7995_v41 = vsel %vm406_vm6, %v3811_v32, %v3838_v55  ;;  %v8951_v21 = vld [vmem:[#allocation13_spill] sm:$0xff] }
 0x412   : > { %v7981_v4 = vpop.permute.xlu1 %2810  ;;  %4746 = vmatpush1.bf16.msra.mxu1 %v5274_v27  ;;  %v7983_v19 = vpop.permute.xlu0 %3578  ;;  %v2827_v56 = vsel %vm8791_vm11, %v7623_v31, %v2826_v3  ;;  %v7998_v27 = vsel %vm406_vm6, %v3810_v44, %v3837_v16  ;;  %v3713_v3 = vsel %vm3711_vm4, %v7196_v47, %v7206_v58  ;;  %v3685_v44 = vsel %vm1319_vm0, %v7204_v54, %v7188_v52  ;;  %v8952_v54 = vld [vmem:[#allocation16_spill] sm:$0xff] }
 0x413   : > { %8947 = vst [vmem:[#allocation95_spill] sm:$0xff] %v7981_v4  ;;  %8948 = vst [vmem:[#allocation96_spill] sm:$0xff] %v7983_v19  ;;  %v8783_v28 = vrot.slane %v7981_v4, 4  ;;  %v3591_v13 = vsel %vm3586_vm7, %v7476_v36, %v7983_v19  ;;  %v5264_v40 = vcombine.low %v2827_v56, %v2835_v35  ;;  %v5265_v34 = vcombine.high %v2827_v56, %v2835_v35 }
 0x414   : > { %v8001_v31 = vsel %vm406_vm6, %v3564_v61, %v3591_v13  ;;  %v3712_v35 = vsel %vm3711_vm4, %v7214_v51, %v7196_v47  ;;  %v2759_v56 = vrot.slane %v7670_v0, 4  ;;  %v2754_v55 = vrot.slane %v7648_v11, 4 }
 0x415   : > { %8949 = vst [vmem:[#allocation97_spill] sm:$0xff] %v8001_v31  ;;  %v2836_v32 = vsel %vm406_vm6, %v2822_v38, %v8783_v28  ;;  %4706 = vmatprep.subr.bf16.mxu0 %v5265_v34  ;;  %v2829_v16 = vsel %vm8791_vm11, %v2799_v14, %v2828_v29  ;;  %v3561_v52 = vsel %vm1256_vm1, %v8951_v21, %v7222_v63  ;;  %v8962_v31 = vld [vmem:[#allocation19_spill] sm:$0xff] }
 0x416   : > { %v2737_v61 = vpop.permute.xlu1 %2736  ;;  %4707 = vmatpush1.bf16.msra.mxu0 %v5264_v40  ;;  %v8018_v13 = vpop.permute.xlu0 %3582  ;;  %v2837_v47 = vsel %vm8791_vm11, %v7774_v10, %v2836_v32  ;;  %v2772_v51 = vsel %vm406_vm6, %v2759_v56, %v2760_v17  ;;  %v3560_v14 = vsel %vm1256_vm1, %v8952_v54, %v8951_v21  ;;  %v8030_v29 = vsel %vm406_vm6, %v3686_v18, %v3713_v3  ;;  %v8953_v10 = vld [vmem:[#allocation15_spill] sm:$0xff]  ;;  %v8954_v32 = vld [vmem:[#allocation14_spill] sm:$0xff]  ;;  %v8957_v21 = vld [vmem:[#allocation20_spill] sm:$0xff] }
 0x417   : > { %8950 = vst [vmem:[#allocation98_spill] sm:$0xff] %v8018_v13  ;;  %v2755_v38 = vrot.slane %v2737_v61, 4  ;;  %v5266_v34 = vcombine.low %v2829_v16, %v2837_v47  ;;  %v5267_v28 = vcombine.high %v2829_v16, %v2837_v47  ;;  %v8033_v40 = vsel %vm406_vm6, %v3685_v44, %v3712_v35  ;;  %v8955_v16 = vld [vmem:[#allocation17_spill] sm:$0xff]  ;;  %v8959_v3 = vld [vmem:[#allocation87_spill] sm:$0xff] }
 0x418   : > { %v3588_v56 = vsel %vm3586_vm7, %v8954_v32, %v8953_v10  ;;  %v3587_v47 = vsel %vm3586_vm7, %v8955_v16, %v8954_v32  ;;  %v8958_v54 = vld [vmem:[#allocation21_spill] sm:$0xff]  ;;  %v2616_v35 = vrot.slane %v8959_v3, 4  ;;  %v2773_v32 = vsel %vm553_vm12, %v7670_v0, %v2772_v51  ;;  %v8965_v13 = vld [vmem:[#allocation67_spill] sm:$0xff]  ;;  %v8968_v51 = vld [vmem:[#allocation22_spill] sm:$0xff] }
 0x419   : > { %v2764_v26 = vsel %vm406_vm6, %v2754_v55, %v2755_v38  ;;  %4747 = vmatprep.subr.bf16.mxu1 %v5267_v28  ;;  %v3463_v18 = vsel %vm3461_vm5, %v8958_v54, %v8957_v21  ;;  %v2766_v28 = vsel %vm406_vm6, %v2755_v38, %v8796_v50  ;;  %vm8964_vm11 = vcmask 318464   ;;  %v8966_v0 = vld [vmem:[#allocation23_spill] sm:$0xff] }
 0x41a   : > { %v8047_v44 = vpop.permute.xlu1 %2748  ;;  %4748 = vmatpush1.bf16.msra.mxu1 %v5266_v34  ;;  %v8049_v2 = vpop.permute.xlu0 %3427  ;;  %v2765_v20 = vsel %vm553_vm12, %v7648_v11, %v2764_v26  ;;  %v3436_v34 = vsel %vm8964_vm11, %v8963_v8, %v8962_v31  ;;  %v2615_v19 = vrot.slane %v8965_v13, 4  ;;  %v8064_v46 = vsel %vm406_vm6, %v3561_v52, %v3588_v56  ;;  %vm8967_vm10 = vmmov %vm8964_vm11  ;;  %v8969_v52 = vld [vmem:[#allocation65_spill] sm:$0xff] }
 0x41b   : > { %8960 = vst [vmem:[#allocation13_spill] sm:$0xff] %v8047_v44  ;;  %8961 = vst [vmem:[#allocation16_spill] sm:$0xff] %v8049_v2  ;;  %v8798_v55 = vrot.slane %v8047_v44, 4  ;;  %v5256_v16 = vcombine.low %v2765_v20, %v2773_v32  ;;  %v5257_v42 = vcombine.high %v2765_v20, %v2773_v32  ;;  %v8067_v11 = vsel %vm406_vm6, %v3560_v14, %v3587_v47  ;;  %v8977_v44 = vld [vmem:[#allocation25_spill] sm:$0xff]  ;;  %v8978_v2 = vld [vmem:[#allocation28_spill] sm:$0xff] }
 0x41c   : > { %v3435_v26 = vsel %vm8967_vm10, %v8966_v0, %v8963_v8  ;;  %v3462_v20 = vsel %vm3461_vm5, %v8968_v51, %v8958_v54  ;;  %v8079_v32 = vsel %vm406_vm6, %v3436_v34, %v3463_v18  ;;  %v2610_v56 = vrot.slane %v8969_v52, 4  ;;  %v8973_v34 = vld [vmem:[#allocation29_spill] sm:$0xff] }
 0x41d   : > { %v2774_v38 = vsel %vm406_vm6, %v2760_v17, %v8798_v55  ;;  %4708 = vmatprep.subr.bf16.mxu0 %v5257_v42  ;;  %v2628_v14 = vsel %vm406_vm6, %v2615_v19, %v2616_v35  ;;  %v2767_v47 = vsel %vm553_vm12, %v2737_v61, %v2766_v28  ;;  %v8970_v42 = vld [vmem:[#allocation24_spill] sm:$0xff]  ;;  %v8971_v55 = vld [vmem:[#allocation26_spill] sm:$0xff]  ;;  %vm8972_vm10 = vcmask 965632   ;;  %v8976_v28 = vld [vmem:[#allocation85_spill] sm:$0xff] }
 0x41e   : > { %v2593_v50 = vpop.permute.xlu1 %2592  ;;  %4709 = vmatpush1.bf16.msra.mxu0 %v5256_v16  ;;  %v3071_v8 = vpop.permute.xlu0 %3070  ;;  %v2775_v54 = vsel %vm553_vm12, %v7790_v24, %v2774_v38  ;;  %v3311_v18 = vsel %vm8972_vm10, %v8971_v55, %v8970_v42  ;;  %vm8974_vm11 = vmmov %vm8972_vm10  ;;  %v3088_v61 = vrot.slane %v8975_v22, 4  ;;  %v8808_v16 = vrot.slane %v8976_v28, 4  ;;  %v8979_v38 = vld [vmem:[#allocation27_spill] sm:$0xff] }
 0x41f   : > { %v2611_v0 = vrot.slane %v2593_v50, 4  ;;  %v3087_v51 = vrot.slane %v3071_v8, 4  ;;  %v5258_v60 = vcombine.low %v2767_v47, %v2775_v54  ;;  %v5259_v17 = vcombine.high %v2767_v47, %v2775_v54  ;;  %v8980_v54 = vld [vmem:[#allocation73_spill] sm:$0xff] }
 0x420   : > { %v3310_v19 = vsel %vm8974_vm11, %v8973_v34, %v8971_v55  ;;  %v3338_v24 = vsel %vm3336_vm3, %v8978_v2, %v8977_v44  ;;  %v3337_v47 = vsel %vm3336_vm3, %v8979_v38, %v8978_v2  ;;  %v3093_v4 = vrot.slane %v8980_v54, 4 }
 0x421   : > { %v2620_v42 = vsel %vm406_vm6, %v2610_v56, %v2611_v0  ;;  %4749 = vmatprep.subr.bf16.mxu1 %v5259_v17  ;;  %v2622_v55 = vsel %vm406_vm6, %v2611_v0, %v8808_v16  ;;  %v3100_v22 = vsel %vm406_vm6, %v3087_v51, %v3088_v61  ;;  %vm8981_vm10 = vcmask 908288  }
 0x422   : > { %v8106_v34 = vpop.permute.xlu1 %2604  ;;  %4750 = vmatpush1.bf16.msra.mxu1 %v5258_v60  ;;  %v3081_v57 = vpop.permute.xlu0 %3080  ;;  %v2621_v48 = vsel %vm8981_vm10, %v8969_v52, %v2620_v42  ;;  %vm8982_vm11 = vmmov %vm8981_vm10  ;;  %v8983_v28 = vrot.slane %v7716_v30, 4  ;;  %v8117_v61 = vsel %vm406_vm6, %v3435_v26, %v3462_v20  ;;  %v8120_v60 = vsel %vm406_vm6, %v3311_v18, %v3338_v24 }
 0x423   : > { %v2629_v2 = vsel %vm8982_vm11, %v8965_v13, %v2628_v14  ;;  %v8809_v38 = vrot.slane %v8106_v34, 4  ;;  %v3092_v56 = vrot.slane %v3081_v57, 4  ;;  %v8123_v52 = vsel %vm406_vm6, %v3310_v19, %v3337_v47  ;;  %vm8985_vm11 = vmmov %vm8981_vm10 }
 0x424   : > { %v5248_v17 = vcombine.low %v2621_v48, %v2629_v2  ;;  %v5249_v54 = vcombine.high %v2621_v48, %v2629_v2  ;;  %v3098_v0 = vsel %vm406_vm6, %v8983_v28, %v3087_v51  ;;  %v2623_v13 = vsel %vm8981_vm10, %v2593_v50, %v2622_v55  ;;  %v8986_v55 = vld [vmem:[#allocation36_spill] sm:$0xff]  ;;  %v8987_v2 = vld [vmem:[#allocation38_spill] sm:$0xff] }
 0x425   : > { %v2630_v14 = vsel %vm406_vm6, %v2616_v35, %v8809_v38  ;;  %v8984_v48 = vrot.slane %v7854_v9, 4  ;;  %v3108_v51 = vsel %vm406_vm6, %v3092_v56, %v3093_v4  ;;  %v8134_v26 = vsel %vm887_vm8, %v3071_v8, %v3100_v22  ;;  %v9033_v4 = vld [vmem:[#allocation71_spill] sm:$0xff] }
 0x426   : > { %4710 = vmatprep.subr.bf16.mxu0 %v5249_v54  ;;  %v8137_v20 = vsel %vm887_vm8, %v3081_v57, %v3108_v51  ;;  %v8139_v18 = vpop.permute.xlu1 %3808  ;;  %v3009_v50 = vpop.permute.xlu0 %3008  ;;  %v2631_v35 = vsel %vm8985_vm11, %v8959_v3, %v2630_v14  ;;  %v8155_v57 = vsel %vm887_vm8, %v7716_v30, %v3098_v0  ;;  %v3937_v22 = vsel %vm1491_vm14, %v7166_v25, %v8986_v55  ;;  %v8990_v0 = vld [vmem:[#allocation37_spill] sm:$0xff]  ;;  %v8991_v14 = vld [vmem:[#allocation34_spill] sm:$0xff] }
 0x427   : > { %v3106_v42 = vsel %vm406_vm6, %v8984_v48, %v3092_v56  ;;  %4711 = vmatpush1.bf16.msra.mxu0 %v5248_v17  ;;  %v5295_v8 = vcombine.high %v8134_v26, %v8137_v20  ;;  %v3025_v28 = vrot.slane %v3009_v50, 4  ;;  %v5250_v24 = vcombine.low %v2623_v13, %v2631_v35  ;;  %v8988_v56 = vld [vmem:[#allocation35_spill] sm:$0xff]  ;;  %v8989_v17 = vld [vmem:[#allocation74_spill] sm:$0xff] }
 0x428   : > { %v8145_v19 = vsel %vm887_vm8, %v7854_v9, %v3106_v42  ;;  %5434 = vmatprep.subr.msk.bf16.mxu0 %vm406_vm6, %v7963_v49  ;;  %v5251_v3 = vcombine.high %v2623_v13, %v2631_v35  ;;  %v3839_v49 = vsel %vm3836_vm2, %v7182_v39, %v8987_v2  ;;  %v3840_v30 = vsel %vm3836_vm2, %v8987_v2, %v8988_v56  ;;  %v8992_v42 = vld [vmem:[#allocation33_spill] sm:$0xff]  ;;  %v8993_v35 = vld [vmem:[#allocation75_spill] sm:$0xff] }
 0x429   : > { %v5292_v9 = vcombine.low %v8155_v57, %v8145_v19  ;;  %v5293_v47 = vcombine.high %v8155_v57, %v8145_v19  ;;  %v3026_v54 = vrot.slane %v8989_v17, 4  ;;  %v3812_v13 = vsel %vm1382_vm15, %v7174_v15, %v8990_v0  ;;  %v9070_v57 = vld [vmem:[#allocation93_spill] sm:$0xff] }
 0x42a   : > { %v3813_v48 = vsel %vm1382_vm15, %v8990_v0, %v8991_v14  ;;  %4751 = vmatprep.subr.bf16.mxu1 %v5251_v3  ;;  %v8177_v25 = vpop.permute.xlu1 %3830  ;;  %v3019_v39 = vpop.permute.xlu0 %3018  ;;  %v3938_v51 = vsel %vm1491_vm14, %v8986_v55, %v8992_v42  ;;  %v3031_v2 = vrot.slane %v8993_v35, 4  ;;  %v3949_v55 = vsel %vm406_vm6, %v3937_v22, 0  ;;  %v8995_v35 = vld [vmem:[#allocation40_spill] sm:$0xff] }
 0x42b   : > { %4717 = vmatpush2.bf16.msra.mxu0 %v7944_v6  ;;  %v3038_v56 = vsel %vm406_vm6, %v3025_v28, %v3026_v54  ;;  %v8188_v15 = vsel %vm3836_vm2, %v8177_v25, %v7845_v59  ;;  %4752 = vmatpush1.bf16.msra.mxu1 %v5250_v24  ;;  %v3030_v3 = vrot.slane %v3019_v39, 4  ;;  %v8994_v6 = vrot.slane %v7740_v7, 4  ;;  %v8997_v22 = vld [vmem:[#allocation44_spill] sm:$0xff] }
 0x42c   : > { %4718 = vmatprep.subr.bf16.mxu0 %v7995_v41  ;;  %5435 = vmatprep.subr.msk.bf16.mxu1 %vm406_vm6, %v3938_v51  ;;  %v3856_v0 = vsel %vm406_vm6, %v3813_v48, %v3840_v30  ;;  %v3853_v54 = vsel %vm406_vm6, %v3812_v13, %v3839_v49  ;;  %v3714_v16 = vsel %vm3711_vm4, %v7206_v58, %v8995_v35  ;;  %v8996_v24 = vrot.slane %v7895_v53, 4 }
 0x42d   : > { %v3036_v17 = vsel %vm406_vm6, %v8994_v6, %v3025_v28  ;;  %v3715_v41 = vsel %vm3711_vm4, %v8995_v35, %v7460_v23  ;;  %v3046_v51 = vsel %vm406_vm6, %v3030_v3, %v3031_v2  ;;  %v3590_v30 = vsel %vm3586_vm7, %v8997_v22, %v7476_v36  ;;  %v9028_v2 = vld [vmem:[#allocation51_spill] sm:$0xff] }
 0x42e   : > { %v3044_v28 = vsel %vm406_vm6, %v8996_v24, %v3030_v3  ;;  %v8212_v49 = vsel %vm824_vm9, %v3009_v50, %v3038_v56  ;;  %v8215_v13 = vsel %vm824_vm9, %v3019_v39, %v3046_v51  ;;  %v8217_v58 = vpop.permute.xlu1 %3834  ;;  %v2865_v23 = vpop.permute.xlu0 %2864  ;;  %v8231_v39 = vsel %vm824_vm9, %v7740_v7, %v3036_v17  ;;  %v9002_v24 = vld [vmem:[#allocation48_spill] sm:$0xff]  ;;  %v9029_v3 = vld [vmem:[#allocation63_spill] sm:$0xff] }
 0x42f   : > { %4719 = vmatpush2.bf16.msra.mxu0 %v7998_v27  ;;  %v8222_v48 = vsel %vm824_vm9, %v7895_v53, %v3044_v28  ;;  %4758 = vmatpush2.bf16.msra.mxu1 %v3949_v55  ;;  %v2881_v50 = vrot.slane %v2865_v23, 4  ;;  %v8998_v27 = vld [vmem:[#allocation39_spill] sm:$0xff]  ;;  %v3589_v53 = vsel %vm3586_vm7, %v8953_v10, %v8997_v22  ;;  %vm9005_vm8 = vcmask 318464  }
 0x430   : > { %4720 = vmatprep.subr.bf16.mxu0 %v8030_v29  ;;  %v3688_v56 = vsel %vm1319_vm0, %v8998_v27, %v7447_v1  ;;  %4759 = vmatprep.subr.bf16.mxu1 %v3856_v0  ;;  %v3687_v7 = vsel %vm1319_vm0, %v7198_v45, %v8998_v27  ;;  %v8999_v29 = vld [vmem:[#allocation42_spill] sm:$0xff]  ;;  %v9000_v1 = vld [vmem:[#allocation76_spill] sm:$0xff]  ;;  %v9001_v0 = vld [vmem:[#allocation43_spill] sm:$0xff]  ;;  %vm9014_vm10 = vcmask 744448  }
 0x431   : > { %v3563_v17 = vsel %vm1256_vm1, %v8999_v29, %v7468_v43  ;;  %v2882_v55 = vrot.slane %v9000_v1, 4  ;;  %v3731_v35 = vsel %vm406_vm6, %v3688_v56, %v3715_v41  ;;  %v3562_v10 = vsel %vm1256_vm1, %v7222_v63, %v8999_v29  ;;  %v9003_v27 = vld [vmem:[#allocation77_spill] sm:$0xff]  ;;  %v9004_v29 = vld [vmem:[#allocation46_spill] sm:$0xff]  ;;  %vm9007_vm9 = vmmov %vm9005_vm8 }
 0x432   : > { %v3465_v28 = vsel %vm3461_vm5, %v9002_v24, %v9001_v0  ;;  %v3680_v51 = vpop.permute.xlu1 %3679  ;;  %v2875_v45 = vpop.permute.xlu0 %2874  ;;  %v3728_v22 = vsel %vm406_vm6, %v3687_v7, %v3714_v16  ;;  %v3606_v43 = vsel %vm406_vm6, %v3563_v17, %v3590_v30  ;;  %v2887_v1 = vrot.slane %v9003_v27, 4  ;;  %v9010_v17 = vld [vmem:[#allocation31_spill] sm:$0xff]  ;;  %vm9015_vm11 = vmmov %vm9014_vm10 }
 0x433   : > { %4721 = vmatpush2.bf16.msra.mxu0 %v8033_v40  ;;  %v2894_v41 = vsel %vm406_vm6, %v2881_v50, %v2882_v55  ;;  %4760 = vmatpush2.bf16.msra.mxu1 %v3853_v54  ;;  %v2886_v56 = vrot.slane %v2875_v45, 4  ;;  %v3603_v63 = vsel %vm406_vm6, %v3562_v10, %v3589_v53  ;;  %v3437_v38 = vsel %vm9005_vm8, %v8962_v31, %v9004_v29  ;;  %v9006_v40 = vld [vmem:[#allocation41_spill] sm:$0xff]  ;;  %vm9016_vm8 = vmmov %vm9014_vm10 }
 0x434   : > { %4722 = vmatprep.subr.bf16.mxu0 %v8064_v46  ;;  %v3438_v16 = vsel %vm9007_vm9, %v9004_v29, %v9006_v40  ;;  %v3464_v30 = vsel %vm3461_vm5, %v8957_v21, %v9002_v24  ;;  %v9008_v7 = vrot.slane %v7752_v5, 4  ;;  %4761 = vmatprep.subr.bf16.mxu1 %v3731_v35  ;;  %v9009_v46 = vld [vmem:[#allocation49_spill] sm:$0xff]  ;;  %v9011_v31 = vrot.slane %v7927_v33, 4  ;;  %v9012_v29 = vld [vmem:[#allocation47_spill] sm:$0xff]  ;;  %v9013_v21 = vld [vmem:[#allocation52_spill] sm:$0xff] }
 0x435   : > { %v8279_v53 = vsel %vm3218_vm13, %v9010_v17, %v9009_v46  ;;  %v2902_v10 = vsel %vm406_vm6, %v2886_v56, %v2887_v1  ;;  %v3481_v27 = vsel %vm406_vm6, %v3438_v16, %v3465_v28  ;;  %v3340_v24 = vsel %vm3336_vm3, %v9013_v21, %v9012_v29  ;;  %vm9017_vm9 = vmmov %vm9016_vm8  ;;  %v9023_v28 = vld [vmem:[#allocation79_spill] sm:$0xff] }
 0x436   : > { %v2892_v54 = vsel %vm406_vm6, %v9008_v7, %v2881_v50  ;;  %v2900_v55 = vsel %vm406_vm6, %v9011_v31, %v2886_v56  ;;  %v8290_v50 = vsel %vm9014_vm10, %v2865_v23, %v2894_v41  ;;  %v8293_v35 = vsel %vm9015_vm11, %v2875_v45, %v2902_v10  ;;  %v8295_v7 = vpop.permute.xlu1 %3683  ;;  %v2803_v17 = vpop.permute.xlu0 %2802  ;;  %v9019_v41 = vld [vmem:[#allocation50_spill] sm:$0xff] }
 0x437   : > { %4723 = vmatpush2.bf16.msra.mxu0 %v8067_v11  ;;  %v8300_v1 = vsel %vm9016_vm8, %v7927_v33, %v2900_v55  ;;  %4762 = vmatpush2.bf16.msra.mxu1 %v3728_v22  ;;  %v2819_v23 = vrot.slane %v2803_v17, 4  ;;  %v8309_v45 = vsel %vm9017_vm9, %v7752_v5, %v2892_v54  ;;  %v9018_v11 = vld [vmem:[#allocation45_spill] sm:$0xff]  ;;  %vm9020_vm10 = vcmask 965632   ;;  %v9021_v55 = vld [vmem:[#allocation56_spill] sm:$0xff]  ;;  %v9022_v54 = vld [vmem:[#allocation78_spill] sm:$0xff] }
 0x438   : > { %4724 = vmatprep.subr.bf16.mxu0 %v8079_v32  ;;  %v3313_v16 = vsel %vm9020_vm10, %v9019_v41, %v9018_v11  ;;  %4763 = vmatprep.subr.bf16.mxu1 %v3606_v43  ;;  %v3478_v33 = vsel %vm406_vm6, %v3437_v38, %v3464_v30  ;;  %v3339_v32 = vsel %vm3336_vm3, %v8977_v44, %v9013_v21  ;;  %v2820_v10 = vrot.slane %v9022_v54, 4  ;;  %v9025_v22 = vld [vmem:[#allocation90_spill] sm:$0xff] }
 0x439   : > { %v3224_v5 = vsel %vm3218_vm13, %v9009_v46, %v9021_v55  ;;  %v3356_v43 = vsel %vm406_vm6, %v3313_v16, %v3340_v24  ;;  %v2825_v38 = vrot.slane %v9023_v28, 4  ;;  %v3690_v30 = vsel %vm1319_vm0, %v7856_v37, %v3680_v51  ;;  %v9026_v28 = vld [vmem:[#allocation92_spill] sm:$0xff] }
 0x43a   : > { %v3691_v31 = vsel %vm1319_vm0, %v3680_v51, %v7874_v62  ;;  %v9024_v56 = vrot.slane %v7766_v12, 4  ;;  %v3706_v21 = vpop.permute.xlu1 %3705  ;;  %v2813_v46 = vpop.permute.xlu0 %2812  ;;  %v2832_v54 = vsel %vm406_vm6, %v2819_v23, %v2820_v10  ;;  %v9027_v51 = vld [vmem:[#allocation58_spill] sm:$0xff]  ;;  %vm9034_vm11 = vcmask 818176  }
 0x43b   : > { %4725 = vmatpush2.bf16.msra.mxu0 %v8117_v61  ;;  %v3717_v24 = vsel %vm3711_vm4, %v9025_v22, %v3706_v21  ;;  %v3718_v16 = vsel %vm3711_vm4, %v3706_v21, %v9026_v28  ;;  %4764 = vmatpush2.bf16.msra.mxu1 %v3603_v63  ;;  %v2824_v37 = vrot.slane %v2813_v46, 4  ;;  %v3238_v61 = vsel %vm406_vm6, %v9029_v3, %v3224_v5  ;;  %v9030_v10 = vld [vmem:[#allocation66_spill] sm:$0xff]  ;;  %v9031_v63 = vld [vmem:[#allocation95_spill] sm:$0xff]  ;;  %vm9035_vm8 = vmmov %vm9034_vm11 }
 0x43c   : > { %v2830_v44 = vsel %vm406_vm6, %v9024_v56, %v2819_v23  ;;  %4726 = vmatprep.subr.bf16.mxu0 %v8120_v60  ;;  %v3226_v56 = vsel %vm3218_vm13, %v9028_v2, %v9027_v51  ;;  %4765 = vmatprep.subr.bf16.mxu1 %v3481_v27  ;;  %v8348_v23 = vsel %vm406_vm6, %v3690_v30, %v3717_v24  ;;  %v3157_v21 = vrot.slane %v9030_v10, 4  ;;  %vm9036_vm9 = vmmov %vm9035_vm8  ;;  %v9042_v51 = vld [vmem:[#allocation54_spill] sm:$0xff] }
 0x43d   : > { %v8351_v22 = vsel %vm406_vm6, %v3691_v31, %v3718_v16  ;;  %v9032_v36 = vrot.slane %v9031_v63, 4  ;;  %v2840_v6 = vsel %vm406_vm6, %v2824_v37, %v2825_v38  ;;  %v8360_v27 = vcombine.low %v9033_v4, %v9033_v4  ;;  %vm9037_vm10 = vmmov %vm9035_vm8  ;;  %v9043_v10 = vld [vmem:[#allocation30_spill] sm:$0xff] }
 0x43e   : > { %v8363_v3 = vsel %vm9034_vm11, %v2803_v17, %v2832_v54  ;;  %v8366_v5 = vsel %vm9035_vm8, %v2813_v46, %v2840_v6  ;;  %v3140_v31 = vpop.permute.xlu1 %3139  ;;  %v8369_v30 = vpop.permute.xlu0 %2740  ;;  %v9038_v46 = vld [vmem:[#allocation80_spill] sm:$0xff]  ;;  %vm9041_vm11 = vcmask 965632   ;;  %vm9044_vm8 = vcmask 1039360  }
 0x43f   : > { %v2838_v60 = vsel %vm406_vm6, %v9032_v36, %v2824_v37  ;;  %4727 = vmatpush2.bf16.msra.mxu0 %v8123_v52  ;;  %v8373_v36 = vsel %vm9036_vm9, %v7766_v12, %v2830_v44  ;;  %v3156_v17 = vrot.slane %v3140_v31, 4  ;;  %4766 = vmatpush2.bf16.msra.mxu1 %v3478_v33  ;;  %v2757_v52 = vrot.slane %v8369_v30, 4  ;;  %v9039_v12 = vld [vmem:[#allocation32_spill] sm:$0xff] }
 0x440   : > { %v8377_v38 = vsel %vm9037_vm10, %v9031_v63, %v2838_v60  ;;  %4778 = vmatprep.subr.bf16.mxu0 %v3238_v61  ;;  %v2758_v54 = vrot.slane %v9038_v46, 4  ;;  %4767 = vmatprep.subr.bf16.mxu1 %v3356_v43  ;;  %v3236_v44 = vsel %vm406_vm6, %v9039_v12, %v8279_v53  ;;  %v9040_v37 = vld [vmem:[#allocation24_spill] sm:$0xff]  ;;  %v3199_v61 = vsel %vm9044_vm8, %v9043_v10, %v9042_v51  ;;  %v9046_v10 = vld [vmem:[#allocation81_spill] sm:$0xff] }
 0x441   : > { %v5269_v16 = vcombine.high %v8373_v36, %v8377_v38  ;;  %v3312_v33 = vsel %vm9041_vm11, %v9040_v37, %v9019_v41  ;;  %v3225_v43 = vsel %vm3218_vm13, %v9021_v55, %v9028_v2  ;;  %v3169_v53 = vsel %vm406_vm6, %v3156_v17, %v3157_v21  ;;  %v9045_v63 = vld [vmem:[#allocation68_spill] sm:$0xff]  ;;  %v9047_v2 = vld [vmem:[#allocation86_spill] sm:$0xff] }
 0x442   : > { %4729 = vmatmul.mubr.bf16.vlgmr.msra.gmra.mxu0 %v8360_v27  ;;  %v3162_v60 = vrot.slane %v9045_v63, 4  ;;  %v2770_v46 = vsel %vm406_vm6, %v2757_v52, %v2758_v54  ;;  %v3150_v12 = vpop.permute.xlu1 %3149  ;;  %v3353_v41 = vsel %vm406_vm6, %v3312_v33, %v3339_v32  ;;  %v2751_v37 = vpop.permute.xlu0 %2750  ;;  %v3243_v51 = vsel %vm406_vm6, %v3199_v61, %v3226_v56  ;;  %v9049_v6 = vld [vmem:[#allocation72_spill] sm:$0xff] }
 0x443   : > { %4779 = vmatpush1.bf16.msra.mxu0 %v3236_v44  ;;  %v2763_v4 = vrot.slane %v9046_v10, 4  ;;  %v9048_v55 = vrot.slane %v9047_v2, 4  ;;  %v3161_v24 = vrot.slane %v3150_v12, 4  ;;  %4768 = vmatpush2.bf16.msra.mxu1 %v3353_v41  ;;  %v2762_v63 = vrot.slane %v2751_v37, 4  ;;  %v9052_v56 = vld [vmem:[#allocation64_spill] sm:$0xff] }
 0x444   : > { %vm9050_vm13 = vcmask 785408   ;;  %v3692_v32 = vsel %vm1319_vm0, %v7874_v62, %v8295_v7  ;;  %vm9051_vm9 = vcmask 7168   ;;  %4819 = vmatprep.subr.bf16.mxu1 %v3243_v51  ;;  %v3240_v44 = vsel %vm406_vm6, %v9052_v56, %v3225_v43 }
 0x445   : > { %v3167_v21 = vsel %vm406_vm6, %v9048_v55, %v3156_v17  ;;  %5362 = vmatprep.mubr.msk.bf16.mxu0 %vm9050_vm13, %v9049_v6  ;;  %v3170_v54 = vsel %vm9051_vm9, %v3140_v31, %v3169_v53  ;;  %v8423_v33 = vsel %vm553_vm12, %v8369_v30, %v2770_v46  ;;  %v9053_v17 = vld [vmem:[#allocation70_spill] sm:$0xff]  ;;  %v3177_v10 = vsel %vm406_vm6, %v3161_v24, %v3162_v60  ;;  %vm9055_vm10 = vmmov %vm9051_vm9 }
 0x446   : > { %v9054_v61 = vrot.slane %v9053_v17, 4  ;;  %v2778_v55 = vsel %vm406_vm6, %v2762_v63, %v2763_v4  ;;  %v3178_v62 = vsel %vm9055_vm10, %v3150_v12, %v3177_v10  ;;  %4770 = vmatmul.mubr.bf16.vlgmr.msra.gmra.mxu1 %v8360_v27  ;;  %v3710_v31 = vpop.permute.xlu1 %3709  ;;  %v8435_v43 = vpop.permute.xlu0 %2596  ;;  %vm9056_vm0 = vmmov %vm9051_vm9  ;;  %vm9067_vm9 = vcmask 318464  }
 0x447   : > { %v8432_v7 = vsel %vm553_vm12, %v2751_v37, %v2778_v55  ;;  %v3168_v53 = vsel %vm9056_vm0, %v9047_v2, %v3167_v21  ;;  %vm9057_vm11 = vmmov %vm9056_vm0  ;;  %v5302_v51 = vcombine.low %v3170_v54, %v3178_v62  ;;  %4820 = vmatpush1.bf16.msra.mxu1 %v3240_v44  ;;  %v3719_v12 = vsel %vm3711_vm4, %v9026_v28, %v3710_v31  ;;  %v9059_v2 = vld [vmem:[#allocation83_spill] sm:$0xff]  ;;  %v9060_v44 = vld [vmem:[#allocation84_spill] sm:$0xff] }
 0x448   : > { %v3175_v41 = vsel %vm406_vm6, %v9054_v61, %v3161_v24  ;;  %v5303_v24 = vcombine.high %v3170_v54, %v3178_v62  ;;  %v5262_v4 = vcombine.low %v8423_v33, %v8432_v7  ;;  %v5263_v60 = vcombine.high %v8423_v33, %v8432_v7  ;;  %vm9058_vm8 = vmmov %vm9050_vm13  ;;  %v9094_v7 = vld [vmem:[#allocation88_spill] sm:$0xff] }
 0x449   : > { %v3176_v46 = vsel %vm9057_vm11, %v9053_v17, %v3175_v41  ;;  %v2613_v37 = vrot.slane %v8435_v43, 4  ;;  %5363 = vmatprep.mubr.msk.bf16.mxu1 %vm9058_vm8, %v9049_v6  ;;  %v2614_v21 = vrot.slane %v9059_v2, 4  ;;  %v8452_v54 = vsel %vm406_vm6, %v3692_v32, %v3719_v12 }
 0x44a   : > { %v5300_v56 = vcombine.low %v3168_v53, %v3176_v46  ;;  %v5301_v61 = vcombine.high %v3168_v53, %v3176_v46  ;;  %4821 = vmatprep.subr.bf16.mxu1 %v5303_v24  ;;  %v3555_v17 = vpop.permute.xlu1 %3554  ;;  %v2607_v41 = vpop.permute.xlu0 %2606  ;;  %v2619_v10 = vrot.slane %v9060_v44, 4  ;;  %vm9061_vm4 = vcmask 908288   ;;  %v9066_v24 = vld [vmem:[#allocation16_spill] sm:$0xff] }
 0x44b   : > { %v2626_v28 = vsel %vm406_vm6, %v2613_v37, %v2614_v21  ;;  %4822 = vmatpush1.bf16.msra.mxu1 %v5302_v51  ;;  %v2618_v55 = vrot.slane %v2607_v41, 4  ;;  %vm9062_vm13 = vmmov %vm9061_vm4  ;;  %v3439_v12 = vsel %vm9067_vm9, %v9006_v40, %v9066_v24  ;;  %v9074_v40 = vcombine.low %v8231_v39, %v8222_v48 }
 0x44c   : > { %4780 = vmatprep.subr.bf16.mxu0 %v5301_v61  ;;  %4823 = vmatprep.subr.bf16.mxu1 %v5295_v8  ;;  %v2627_v32 = vsel %vm9061_vm4, %v8435_v43, %v2626_v28  ;;  %v9064_v8 = vcombine.high %v8231_v39, %v8222_v48  ;;  %v9065_v43 = vcombine.high %v8212_v49, %v8215_v13 }
 0x44d   : > { %4781 = vmatpush1.bf16.msra.mxu0 %v5300_v56  ;;  %v2634_v6 = vsel %vm406_vm6, %v2618_v55, %v2619_v10  ;;  %v9068_v56 = vld [vmem:[#allocation13_spill] sm:$0xff]  ;;  %v9073_v10 = vld [vmem:[#allocation98_spill] sm:$0xff] }
 0x44e   : > { %4782 = vmatprep.subr.bf16.mxu0 %v5293_v47  ;;  %v2635_v62 = vsel %vm9062_vm13, %v2607_v41, %v2634_v6  ;;  %v3559_v31 = vpop.permute.xlu1 %3558  ;;  %v8466_v53 = vpop.permute.xlu0 %3431  ;;  %v9063_v47 = vcombine.low %v8134_v26, %v8137_v20  ;;  %v9069_v61 = vrot.slane %v9068_v56, 4  ;;  %v3565_v26 = vsel %vm1256_vm1, %v9070_v57, %v3555_v17  ;;  %v9071_v20 = vld [vmem:[#allocation94_spill] sm:$0xff]  ;;  %v9072_v41 = vld [vmem:[#allocation96_spill] sm:$0xff] }
 0x44f   : > { %v5254_v46 = vcombine.low %v2627_v32, %v2635_v62  ;;  %v5255_v51 = vcombine.high %v2627_v32, %v2635_v62  ;;  %v9076_v6 = vcombine.high %v8309_v45, %v8300_v1  ;;  %v9077_v32 = vcombine.high %v8290_v50, %v8293_v35 }
 0x450   : > { %4824 = vmatpush1.bf16.msra.mxu1 %v9063_v47  ;;  %v2776_v19 = vsel %vm406_vm6, %v9069_v61, %v2762_v63  ;;  %v9075_v63 = vcombine.low %v8212_v49, %v8215_v13  ;;  %v9078_v13 = vld [vmem:[#allocation82_spill] sm:$0xff]  ;;  %v9080_v61 = vcombine.low %v8309_v45, %v8300_v1 }
 0x451   : > { %4783 = vmatpush1.bf16.msra.mxu0 %v5292_v9  ;;  %4825 = vmatprep.subr.bf16.mxu1 %v9065_v43  ;;  %v3566_v9 = vsel %vm1256_vm1, %v3555_v17, %v9071_v20  ;;  %v9079_v39 = vrot.slane %v9078_v13, 4  ;;  %v2777_v30 = vsel %vm553_vm12, %v9068_v56, %v2776_v19 }
 0x452   : > { %4784 = vmatprep.subr.bf16.mxu0 %v9064_v8  ;;  %v3581_v2 = vpop.permute.xlu1 %3580  ;;  %v8490_v21 = vpop.permute.xlu0 %3453  ;;  %v3567_v8 = vsel %vm1256_vm1, %v9071_v20, %v3559_v31  ;;  %v9083_v31 = vcombine.high %v8363_v3, %v8366_v5  ;;  %vm9103_vm1 = vmmov %vm9067_vm9 }
 0x453   : > { %v3592_v44 = vsel %vm3586_vm7, %v9072_v41, %v3581_v2  ;;  %v3593_v28 = vsel %vm3586_vm7, %v3581_v2, %v9073_v10  ;;  %v3466_v17 = vsel %vm3461_vm5, %v9001_v0, %v8490_v21  ;;  %v2768_v0 = vsel %vm406_vm6, %v9079_v39, %v2757_v52 }
 0x454   : > { %4826 = vmatpush1.bf16.msra.mxu1 %v9075_v63  ;;  %v8512_v62 = vsel %vm406_vm6, %v3565_v26, %v3592_v44  ;;  %v8515_v48 = vsel %vm406_vm6, %v3566_v9, %v3593_v28  ;;  %v8518_v49 = vsel %vm406_vm6, %v3439_v12, %v3466_v17  ;;  %v9081_v12 = vcombine.low %v8290_v50, %v8293_v35  ;;  %v9084_v35 = vld [vmem:[#allocation85_spill] sm:$0xff]  ;;  %v9092_v44 = vld [vmem:[#allocation60_spill] sm:$0xff]  ;;  %v9095_v63 = vld [vmem:[#allocation62_spill] sm:$0xff] }
 0x455   : > { %4785 = vmatpush1.bf16.msra.mxu0 %v9074_v40  ;;  %4827 = vmatprep.subr.bf16.mxu1 %v9077_v32  ;;  %v9082_v52 = vrot.slane %v8106_v34, 4  ;;  %v2769_v50 = vsel %vm553_vm12, %v9078_v13, %v2768_v0  ;;  %v9085_v45 = vrot.slane %v9084_v35, 4  ;;  %v9086_v26 = vcombine.low %v8373_v36, %v8377_v38  ;;  %vm9089_vm12 = vmmov %vm9061_vm4  ;;  %v9093_v28 = vld [vmem:[#allocation61_spill] sm:$0xff] }
 0x456   : > { %4786 = vmatprep.subr.bf16.mxu0 %v9076_v6  ;;  %v3585_v47 = vpop.permute.xlu1 %3584  ;;  %v3458_v2 = vpop.permute.xlu0 %3457  ;;  %v9096_v17 = vld [vmem:[#allocation57_spill] sm:$0xff]  ;;  %v9097_v6 = vld [vmem:[#allocation59_spill] sm:$0xff] }
 0x457   : > { %v3594_v43 = vsel %vm3586_vm7, %v9073_v10, %v3585_v47  ;;  %v2632_v57 = vsel %vm406_vm6, %v9082_v52, %v2618_v55  ;;  %v2624_v56 = vsel %vm406_vm6, %v9085_v45, %v2613_v37  ;;  %v5261_v55 = vcombine.high %v2769_v50, %v2777_v30  ;;  %vm9088_vm7 = vmmov %vm9061_vm4 }
 0x458   : > { %4828 = vmatpush1.bf16.msra.mxu1 %v9081_v12  ;;  %v3618_v1 = vsel %vm406_vm6, %v3567_v8, %v3594_v43  ;;  %v2633_v20 = vsel %vm9088_vm7, %v8106_v34, %v2632_v57  ;;  %v5260_v37 = vcombine.low %v2769_v50, %v2777_v30  ;;  %v2625_v9 = vsel %vm9089_vm12, %v9084_v35, %v2624_v56  ;;  %v9098_v43 = vld [vmem:[#allocation89_spill] sm:$0xff] }
 0x459   : > { %4787 = vmatpush1.bf16.msra.mxu0 %v9080_v61  ;;  %4829 = vmatprep.subr.bf16.mxu1 %v9083_v31  ;;  %v5253_v36 = vcombine.high %v2625_v9, %v2633_v20  ;;  %v5252_v34 = vcombine.low %v2625_v9, %v2633_v20  ;;  %v3817_v32 = vsel %vm1382_vm15, %v9097_v6, %v8139_v18 }
 0x45a   : > { %4788 = vmatprep.subr.bf16.mxu0 %v5269_v16  ;;  %v8552_v19 = vpop.permute.xlu1 %3429  ;;  %v9087_v16 = vcombine.low %v8363_v3, %v8366_v5  ;;  %v9090_v3 = vld [vmem:[#allocation53_spill] sm:$0xff]  ;;  %v3814_v0 = vsel %vm1382_vm15, %v8991_v14, %v9096_v17  ;;  %v3816_v18 = vsel %vm1382_vm15, %v9095_v63, %v9097_v6  ;;  %v9099_v14 = vld [vmem:[#allocation91_spill] sm:$0xff]  ;;  %v9110_v6 = vld [vmem:[#allocation6_spill] sm:$0xff] }
 0x45b   : > { %v3939_v5 = vsel %vm1491_vm14, %v8992_v42, %v9090_v3  ;;  %v3940_v33 = vsel %vm1491_vm14, %v9090_v3, %v9092_v44  ;;  %v3844_v42 = vsel %vm3836_vm2, %v7845_v59, %v8217_v58  ;;  %v3859_v61 = vsel %vm406_vm6, %v3814_v0, %v9098_v43 }
 0x45c   : > { %4830 = vmatpush1.bf16.msra.mxu1 %v9087_v16  ;;  %v3868_v58 = vsel %vm406_vm6, %v3817_v32, %v3844_v42  ;;  %v3865_v12 = vsel %vm406_vm6, %v3816_v18, %v8188_v15 }
 0x45d   : > { %4789 = vmatpush1.bf16.msra.mxu0 %v9086_v26  ;;  %4831 = vmatprep.subr.bf16.mxu1 %v5263_v60  ;;  %v9091_v60 = vld [vmem:[#allocation55_spill] sm:$0xff] }
 0x45e   : > { %4790 = vmatprep.subr.bf16.mxu0 %v5261_v55  ;;  %v3434_v41 = vpop.permute.xlu1 %3433  ;;  %v3941_v10 = vsel %vm1491_vm14, %v9092_v44, %v9091_v60  ;;  %v3942_v40 = vsel %vm1491_vm14, %v9091_v60, %v9093_v28  ;;  %vm9100_vm14 = vmmov %vm9067_vm9 }
 0x45f   : > { %v3957_v39 = vsel %vm406_vm6, %v3941_v10, 0  ;;  %v3440_v15 = vsel %vm9100_vm14, %v9066_v24, %v8552_v19  ;;  %v3441_v24 = vsel %vm9103_vm1, %v8552_v19, %v8466_v53  ;;  %v4862_v10 = vld [vmem:[#allocation3 + $0x18] sm:$0xff] }
 0x460   : > { %4832 = vmatpush1.bf16.msra.mxu1 %v5262_v4  ;;  %v3842_v4 = vsel %vm3836_vm2, %v9094_v7, %v8177_v25  ;;  %v3953_v25 = vsel %vm406_vm6, %v3939_v5, 0 }
 0x461   : > { %4791 = vmatpush1.bf16.msra.mxu0 %v5260_v37  ;;  %4833 = vmatprep.subr.bf16.mxu1 %v5255_v51  ;;  %v3303_v51 = vpop.permute.xlu0 %3302 }
 0x462   : > { %4792 = vmatprep.subr.bf16.mxu0 %v5253_v36  ;;  %v3456_v38 = vpop.permute.xlu1 %3455  ;;  %v4860_v36 = vld [vmem:[#allocation3 + $0x8] sm:$0xff] }
 0x463   : > { %v3467_v52 = vsel %vm3461_vm5, %v8490_v21, %v3456_v38  ;;  %v3468_v50 = vsel %vm3461_vm5, %v3456_v38, %v3458_v2 }
 0x464   : > { %4834 = vmatpush1.bf16.msra.mxu1 %v5254_v46  ;;  %v3815_v46 = vsel %vm1382_vm15, %v9096_v17, %v9095_v63  ;;  %vm9101_vm15 = vmmov %vm9067_vm9  ;;  %v3487_v21 = vsel %vm406_vm6, %v3440_v15, %v3467_v52  ;;  %v3490_v26 = vsel %vm406_vm6, %v3441_v24, %v3468_v50  ;;  %v4863_v63 = vld [vmem:[#allocation3 + $0x20] sm:$0xff] }
 0x465   : > { %4793 = vmatpush1.bf16.msra.mxu0 %v5252_v34  ;;  %5437 = vmatprep.subr.msk.bf16.mxu1 %vm406_vm6, %v3942_v40  ;;  %v3862_v59 = vsel %vm406_vm6, %v3815_v46, %v3842_v4  ;;  %v3307_v47 = vpop.permute.xlu0 %3306  ;;  %v9109_v4 = vld [vmem:[#allocation5_spill] sm:$0xff] }
 0x466   : > { %5436 = vmatprep.subr.msk.bf16.mxu0 %vm406_vm6, %v3940_v33  ;;  %v3460_v13 = vpop.permute.xlu1 %3459 }
 0x467   : > { %v3469_v31 = vsel %vm3461_vm5, %v3458_v2, %v3460_v13  ;;  %vm9104_vm5 = vcmask 965632  }
 0x468   : > { %4840 = vmatpush2.bf16.msra.mxu1 %v3957_v39  ;;  %vm9105_vm2 = vmmov %vm9104_vm5 }
 0x469   : > { %4799 = vmatpush2.bf16.msra.mxu0 %v3953_v25  ;;  %4841 = vmatprep.subr.bf16.mxu1 %v3868_v58  ;;  %v3329_v57 = vpop.permute.xlu0 %3328  ;;  %vm9106_vm10 = vmmov %vm9105_vm2  ;;  %v9111_v58 = vld [vmem:[#allocation7_spill] sm:$0xff] }
 0x46a   : > { %4800 = vmatprep.subr.bf16.mxu0 %v3862_v59  ;;  %v3305_v8 = vpop.permute.xlu1 %3304  ;;  %v3314_v19 = vsel %vm9106_vm10, %v9018_v11, %v3303_v51  ;;  %vm9107_vm0 = vmmov %vm9105_vm2  ;;  %v4861_v11 = vld [vmem:[#allocation3 + $0x10] sm:$0xff] }
 0x46b   : > { %v3315_v56 = vsel %vm9104_vm5, %v3303_v51, %v3305_v8  ;;  %v3316_v37 = vsel %vm9107_vm0, %v3305_v8, %v3307_v47 }
 0x46c   : > { %4842 = vmatpush2.bf16.msra.mxu1 %v3865_v12 }
 0x46d   : > { %4801 = vmatpush2.bf16.msra.mxu0 %v3859_v61  ;;  %4843 = vmatprep.subr.bf16.mxu1 %v8452_v54  ;;  %v3333_v45 = vpop.permute.xlu0 %3332  ;;  %v4864_v61 = vld [vmem:[#allocation3 + $0x28] sm:$0xff] }
 0x46e   : > { %4802 = vmatprep.subr.bf16.mxu0 %v8348_v23  ;;  %v3309_v30 = vpop.permute.xlu1 %3308  ;;  %v3442_v23 = vsel %vm9101_vm15, %v8466_v53, %v3434_v41 }
 0x46f   : > { %v3493_v35 = vsel %vm406_vm6, %v3442_v23, %v3469_v31  ;;  %v4865_v31 = vld [vmem:[#allocation3 + $0x30] sm:$0xff]  ;;  %v4867_v23 = vld [vmem:[#allocation3 + $0x40] sm:$0xff] }
 0x470   : > { %4844 = vmatpush2.bf16.msra.mxu1 %v8351_v22  ;;  %v9102_v22 = vld [vmem:[#allocation97_spill] sm:$0xff] }
 0x471   : > { %4803 = vmatpush2.bf16.msra.mxu0 %v9099_v14  ;;  %4845 = vmatprep.subr.bf16.mxu1 %v3618_v1  ;;  %v3341_v1 = vsel %vm3336_vm3, %v9012_v29, %v3329_v57 }
 0x472   : > { %4804 = vmatprep.subr.bf16.mxu0 %v8512_v62  ;;  %v3331_v54 = vpop.permute.xlu1 %3330  ;;  %v3359_v9 = vsel %vm406_vm6, %v3314_v19, %v3341_v1 }
 0x473   : > { %v3342_v62 = vsel %vm3336_vm3, %v3329_v57, %v3331_v54  ;;  %v3343_v16 = vsel %vm3336_vm3, %v3331_v54, %v3333_v45 }
 0x474   : > { %4846 = vmatpush2.bf16.msra.mxu1 %v8515_v48  ;;  %v3317_v48 = vsel %vm9105_vm2, %v3307_v47, %v3309_v30  ;;  %v3362_v53 = vsel %vm406_vm6, %v3315_v56, %v3342_v62  ;;  %v3365_v2 = vsel %vm406_vm6, %v3316_v37, %v3343_v16  ;;  %v9112_v47 = vld [vmem:[#allocation8_spill] sm:$0xff]  ;;  %v4866_v30 = vld [vmem:[#allocation3 + $0x38] sm:$0xff]  ;;  %v9115_v37 = vld [vmem:[#allocation10_spill] sm:$0xff] }
 0x475   : > { %4805 = vmatpush2.bf16.msra.mxu0 %v9102_v22  ;;  %4847 = vmatprep.subr.bf16.mxu1 %v3493_v35 }
 0x476   : > { %4806 = vmatprep.subr.bf16.mxu0 %v3487_v21  ;;  %v3335_v55 = vpop.permute.xlu1 %3334 }
 0x477   : > { %v3344_v20 = vsel %vm3336_vm3, %v3333_v45, %v3335_v55 }
 0x478   : > { %4848 = vmatpush2.bf16.msra.mxu1 %v3490_v26  ;;  %v3368_v29 = vsel %vm406_vm6, %v3317_v48, %v3344_v20  ;;  %v9113_v26 = vld [vmem:[#allocation9_spill] sm:$0xff]  ;;  %v9114_v20 = vld [vmem:[#allocation11_spill] sm:$0xff] }
 0x479   : > { %4807 = vmatpush2.bf16.msra.mxu0 %v8518_v49  ;;  %4849 = vmatprep.subr.bf16.mxu1 %v3368_v29  ;;  %v4125_v49 = vpop.permute.xlu0 %4124 }
 0x47a   : > { %4808 = vmatprep.subr.bf16.mxu0 %v3362_v53 }
 0x47c   : > { %4850 = vmatpush2.bf16.msra.mxu1 %v3365_v2  ;;  %v9116_v2 = vld [vmem:[#allocation12_spill] sm:$0xff] }
 0x47d   : > { %4809 = vmatpush2.bf16.msra.mxu0 %v3359_v9 }
 0x47f   : > { %4852 = vmatmul.mubr.bf16.vlgmr.msra.gmra.mxu1 %v8360_v27 }
 0x480   : > { %4811 = vmatmul.mubr.bf16.vlgmr.msra.gmra.mxu0 %v8360_v27 }
 0x502   : > { %v4730_v41 = vpop.f32.mrf.mxu0 }
 0x503   : > { %v4731_v34 = vadd.f32 %v4730_v41, %v4125_v49 }
 0x504   : > { %v4732_v3 = vpop.f32.mrf.mxu0 }
 0x505   : > { %v4733_v5 = vadd.f32 %v4732_v3, %v4125_v49  ;;  %v4868_v38 = vadd.f32 %v4860_v36, %v4731_v34 }
 0x506   : > { %v4734_v60 = vpop.f32.mrf.mxu0  ;;  %v4771_v44 = vpop.f32.mrf.mxu1 }
 0x507   : > { %v4869_v28 = vadd.f32 %v4861_v11, %v4733_v5  ;;  %v4876_v40 = vmax.f32 %v4868_v38, 0.0  ;;  %v4772_v27 = vadd.f32 %v4771_v44, %v4125_v49 }
 0x508   : > { %v4735_v33 = vpop.f32.mrf.mxu0  ;;  %v4773_v51 = vpop.f32.mrf.mxu1 }
 0x509   : > { %v4877_v7 = vmax.f32 %v4869_v28, 0.0  ;;  %v4884_v42 = vmul.f32 %v4876_v40, %v9109_v4  ;;  %v4870_v17 = vadd.f32 %v4862_v10, %v4772_v27  ;;  %v4774_v46 = vadd.f32 %v4773_v51, %v4125_v49 }
 0x50a   : > { %v4775_v13 = vpop.f32.mrf.mxu1 }
 0x50b   : > { %v4885_v32 = vmul.f32 %v4877_v7, %v9110_v6  ;;  %4892 = vst [vmem:[%s8654_s9] sm:$0xff] %v4884_v42  ;;  %v4878_v25 = vmax.f32 %v4870_v17, 0.0  ;;  %v4871_v39 = vadd.f32 %v4863_v63, %v4774_v46 }
 0x50c   : > { %v4776_v59 = vpop.f32.mrf.mxu1 }
 0x50d   : > { %4893 = vst [vmem:[%s8654_s9 + $0x8] sm:$0xff] %v4885_v32  ;;  %v4886_v0 = vmul.f32 %v4878_v25, %v9111_v58  ;;  %v4879_v18 = vmax.f32 %v4871_v39, 0.0 }
 0x50f   : > { %4894 = vst [vmem:[%s8654_s9 + $0x10] sm:$0xff] %v4886_v0  ;;  %v4887_v8 = vmul.f32 %v4879_v18, %v9112_v47 }
 0x511   : > { %4895 = vst [vmem:[%s8654_s9 + $0x18] sm:$0xff] %v4887_v8 }
 0x53f   : > { %v4853_v12 = vpop.f32.mrf.mxu1 }
 0x540   : > { %v4812_v43 = vpop.f32.mrf.mxu0  ;;  %v4854_v52 = vadd.f32 %v4853_v12, %v4125_v49 }
 0x541   : > { %v4813_v14 = vadd.f32 %v4812_v43, %v4125_v49  ;;  %v4855_v15 = vpop.f32.mrf.mxu1 }
 0x542   : > { %v4814_v57 = vpop.f32.mrf.mxu0  ;;  %v4874_v50 = vadd.f32 %v4866_v30, %v4854_v52  ;;  %v4856_v21 = vadd.f32 %v4855_v15, %v4125_v49 }
 0x543   : > { %v4872_v54 = vadd.f32 %v4864_v61, %v4813_v14  ;;  %v4815_v22 = vadd.f32 %v4814_v57, %v4125_v49  ;;  %v4857_v62 = vpop.f32.mrf.mxu1 }
 0x544   : > { %v4816_v35 = vpop.f32.mrf.mxu0  ;;  %v4882_v1 = vmax.f32 %v4874_v50, 0.0  ;;  %v4875_v56 = vadd.f32 %v4867_v23, %v4856_v21 }
 0x545   : > { %v4880_v24 = vmax.f32 %v4872_v54, 0.0  ;;  %v4873_v45 = vadd.f32 %v4865_v31, %v4815_v22  ;;  %v4858_v55 = vpop.f32.mrf.mxu1 }
 0x546   : > { %v4817_v48 = vpop.f32.mrf.mxu0  ;;  %v4890_v53 = vmul.f32 %v4882_v1, %v9114_v20  ;;  %v4883_v19 = vmax.f32 %v4875_v56, 0.0 }
 0x547   : > { %v4888_v16 = vmul.f32 %v4880_v24, %v9113_v26  ;;  %v4881_v29 = vmax.f32 %v4873_v45, 0.0 }
 0x548   : > { %4898 = vst [vmem:[%s8654_s9 + $0x30] sm:$0xff] %v4890_v53  ;;  %v4891_v49 = vmul.f32 %v4883_v19, %v9116_v2 }
 0x549   : > { %4896 = vst [vmem:[%s8654_s9 + $0x20] sm:$0xff] %v4888_v16  ;;  %v4889_v9 = vmul.f32 %v4881_v29, %v9115_v37 }
 0x54a   : > { %4899 = vst [vmem:[%s8654_s9 + $0x38] sm:$0xff] %v4891_v49 }
 0x54b   : > { %4897 = vst [vmem:[%s8654_s9 + $0x28] sm:$0xff] %v4889_v9 }
 0x54c PF: > { %s16_s21 = sadd.s32 1, %s5563_s21  }
 0x54d   : > { %p13_p4 = scmp.ge.s32.totalorder %s16_s21, 4  }
 0x54f   :  { %15 = sbr.rel (!%p13_p4) target bundleno = 1 (0x1), region = 74 }

</bundles_post_ra>
